<compile_context>
chip_gen: v7x
topology: tpu7x:2x2x1
jax: 0.10.0
libtpu: 0.0.40
codegen_flags: <defaults>
</compile_context>

<pallas_src>
import functools
import math

import jax
import jax.numpy as jnp
from jax.experimental import pallas as pl
from jax.experimental.pallas import tpu as pltpu


# ----------------------------------------------------------------------------
# Pallas kernels
# ----------------------------------------------------------------------------
def _prep_layer_kernel(w_ref, u_ref, v_ref, weff_ref, reg_ref,
                       *, lambda_o, lambda_2, n_elems):
    """Input-independent weight prep: gaussian gating + regularizer scalar."""
    u = u_ref[...]                                           # (n_in,  Dp) f32, Dp=8
    v = v_ref[...]                                           # (n_out, Dp) f32

    # w_hat[i,j] = exp(-||u_i - v_j||^2); contraction over the (8-lane) embedding
    # dim via dot_general (no in-kernel transpose of the big operand).
    u2 = jnp.sum(u * u, axis=1, keepdims=True)               # (n_in, 1)
    v2 = jnp.sum(v * v, axis=1, keepdims=True).T             # (1, n_out) (tiny vector)
    uv = jax.lax.dot_general(u, v, (((1,), (1,)), ((), ())),
                             preferred_element_type=jnp.float32)
    dist2 = jnp.maximum(u2 + v2 - 2.0 * uv, 0.0)
    w_hat = jnp.exp(-dist2)                                  # (n_in, n_out)

    w_eff = w_ref[...] * w_hat                               # gated weights, f32
    weff_ref[...] = w_eff.astype(weff_ref.dtype)             # bf16-resident for MXU

    inv_n = 1.0 / float(n_elems)
    sparse_reg = jnp.sum(w_hat * w_hat) * inv_n              # == mean(w_hat^2)
    l2_reg = jnp.sum(w_eff * w_eff) * inv_n                  # == mean(w_eff^2), f32
    reg_ref[0] = lambda_o * sparse_reg + lambda_2 * l2_reg   # SMEM scalar


def _fused_forward_kernel(x_ref, we_ref, be_ref, wd_ref, bd_ref,
                          y_ref, klp_ref,
                          *, kl_activation, batch, block_rows):
    """Fused encoder -> KL -> decoder for one batch tile.  h stays on-chip."""
    i = pl.program_id(0)

    # ---- encoder: z = x @ We + be (bf16 MXU, f32 accumulate) ----
    z = jnp.dot(x_ref[...], we_ref[...],
                preferred_element_type=jnp.float32) + be_ref[...]

    # Clamp z so sigmoid(z) lands in [eps, 1-eps]: reproduces the reference's
    # a = clamp(h, eps, 1-eps) exactly for the KL term, keeps exp/log overflow-free,
    # and perturbs the decoder input by < 1e-6 (invisible at bf16 matmul precision).
    eps = 1e-6
    zlim = math.log((1.0 - eps) / eps)
    zc = jnp.clip(z, -zlim, zlim)

    e = jnp.exp(-zc)                      # EUP op 1
    t = 1.0 + e
    h = 1.0 / t                           # exact sigmoid (feeds KL and decoder)
    log_t = jnp.log(t)                    # EUP op 2: log h = -log_t, log(1-h) = -zc - log_t

    # ---- KL sparsity regularizer (per-tile partial, reduced outside) ----
    g = min(max(float(kl_activation), eps), 1.0 - eps)       # python constant clamp
    log_g = math.log(g)
    log_1mg = math.log(1.0 - g)
    kl = h * (-log_t - log_g) + (1.0 - h) * (-zc - log_t - log_1mg)

    row = i * block_rows + jax.lax.broadcasted_iota(jnp.int32, (block_rows, 1), 0)
    valid = (row < batch).astype(jnp.float32)                # mask padded batch rows
    klp_ref[...] = jnp.zeros(klp_ref.shape, klp_ref.dtype)
    klp_ref[0:1, :] = jnp.sum(kl * valid, axis=0, keepdims=True)

    # ---- decoder: y = sigmoid(h @ Wd + bd), single-EUP tanh form ----
    z2 = jnp.dot(h.astype(wd_ref.dtype), wd_ref[...],
                 preferred_element_type=jnp.float32) + bd_ref[...]
    y_ref[...] = 0.5 * jnp.tanh(0.5 * z2) + 0.5               # EUP op 3


# ----------------------------------------------------------------------------
# Wrappers
# ----------------------------------------------------------------------------
def prepare_kernel_layer(W, u, v, *, lambda_o, lambda_2, out_dtype=jnp.bfloat16):
    """Per-layer, input-independent: returns (w_eff[bf16], reg[f32 scalar]).

    In training this only needs to rerun when the parameters change; cache it
    behind the weight-update boundary.
    """
    n_in, n_out = W.shape
    kern = functools.partial(_prep_layer_kernel, lambda_o=lambda_o,
                             lambda_2=lambda_2, n_elems=n_in * n_out)
    w_eff, reg = pl.pallas_call(
        kern,
        grid=(1,),
        in_specs=[
            pl.BlockSpec((n_in, n_out), lambda i: (0, 0)),
            pl.BlockSpec(u.shape, lambda i: (0, 0)),
            pl.BlockSpec(v.shape, lambda i: (0, 0)),
        ],
        out_specs=[
            pl.BlockSpec((n_in, n_out), lambda i: (0, 0)),
            pl.BlockSpec(memory_space=pltpu.MemorySpace.SMEM),
        ],
        out_shape=[
            jax.ShapeDtypeStruct((n_in, n_out), out_dtype),
            jax.ShapeDtypeStruct((1,), jnp.float32),
        ],
        compiler_params=pltpu.CompilerParams(dimension_semantics=("arbitrary",)),
    )(W, u, v)
    return w_eff, reg[0]


def fused_autoencoder_forward(x, w_eff_e, b_e, w_eff_d, b_d,
                              *, kl_activation, block_rows=256,
                              matmul_dtype=jnp.bfloat16):
    """Batch-tiled fused pallas_call for the per-batch hot path: returns (y, kl)."""
    B, n_in = x.shape
    n_hid = w_eff_e.shape[1]

    # Batch tile: multiple of 16 (bf16 sublane packing); don't over-pad tiny batches.
    tm = min(int(block_rows), max(16, -(-B // 16) * 16))
    num_tiles = pl.cdiv(B, tm)
    B_pad = num_tiles * tm
    if B_pad != B:
        x = jnp.pad(x, ((0, B_pad - B), (0, 0)))
    x = x.astype(matmul_dtype)                               # halve x HBM->VMEM DMA

    kern = functools.partial(_fused_forward_kernel,
                             kl_activation=float(kl_activation),
                             batch=B, block_rows=tm)
    # TODO(synk): for very large n_input/kernel_hidden (real deployments), tile the
    # reduction (K) axis with an f32 VMEM accumulator + pl.when init/finalize and
    # set vmem_limit_bytes explicitly (v7x only has 64 MiB VMEM; default scoped 32).
    y_pad, kl_parts = pl.pallas_call(
        kern,
        grid=(num_tiles,),
        in_specs=[
            pl.BlockSpec((tm, n_in), lambda i: (i, 0)),      # x tile (bf16)
            pl.BlockSpec((n_in, n_hid), lambda i: (0, 0)),   # W_e (bf16), VMEM-resident
            pl.BlockSpec((1, n_hid), lambda i: (0, 0)),      # b_e (f32)
            pl.BlockSpec((n_hid, n_in), lambda i: (0, 0)),   # W_d (bf16), VMEM-resident
            pl.BlockSpec((1, n_in), lambda i: (0, 0)),       # b_d (f32)
        ],
        out_specs=[
            pl.BlockSpec((tm, n_in), lambda i: (i, 0)),      # y tile (f32)
            pl.BlockSpec((8, n_hid), lambda i: (i, 0)),      # per-tile KL partial rows
        ],
        out_shape=[
            jax.ShapeDtypeStruct((B_pad, n_in), jnp.float32),
            jax.ShapeDtypeStruct((num_tiles * 8, n_hid), jnp.float32),
        ],
        compiler_params=pltpu.CompilerParams(
            dimension_semantics=("parallel",)),               # shard across v7x's 2 TCs
    )(x, w_eff_e, b_e, w_eff_d, b_d)

    y = y_pad[:B] if B_pad != B else y_pad
    kl = jnp.sum(kl_parts) * (1.0 / float(B))
    return y, kl


def init_params(key, n_input, kernel_hidden, hidden_dims, d_pad=8):
    """Deterministic synthetic parameters (shapes from the module's __init__)."""
    # Zero-pad the small embedding dim (hidden_dims=5) to 8 lanes; zero padding
    # leaves ||u_i - v_j||^2 (and hence the gaussian kernel) exactly unchanged.
    ks = jax.random.split(key, 8)

    def pad_d(a):
        return jnp.pad(a, ((0, 0), (0, d_pad - hidden_dims)))

    scale_e = 1.0 / jnp.sqrt(jnp.float32(n_input))
    scale_d = 1.0 / jnp.sqrt(jnp.float32(kernel_hidden))
    params = {
        "enc": {
            "W": jax.random.normal(ks[0], (n_input, kernel_hidden), jnp.float32) * scale_e,
            "u": pad_d(jax.random.normal(ks[1], (n_input, hidden_dims), jnp.float32) * 0.5),
            "v": pad_d(jax.random.normal(ks[2], (kernel_hidden, hidden_dims), jnp.float32) * 0.5),
            "b": jax.random.normal(ks[3], (1, kernel_hidden), jnp.float32) * 0.1,
        },
        "dec": {
            "W": jax.random.normal(ks[4], (kernel_hidden, n_input), jnp.float32) * scale_d,
            "u": pad_d(jax.random.normal(ks[5], (kernel_hidden, hidden_dims), jnp.float32) * 0.5),
            "v": pad_d(jax.random.normal(ks[6], (n_input, hidden_dims), jnp.float32) * 0.5),
            "b": jax.random.normal(ks[7], (1, n_input), jnp.float32) * 0.1,
        },
    }
    return params


def kernel_net_autoencoder_forward(params, x, *, lambda_o=0.013, lambda_2=60.0,
                                   kl_activation=0.02, block_rows=256,
                                   matmul_dtype=jnp.bfloat16):
    """Mirrors KernelNetAutoencoder.forward: returns (reconstruction, reg, kl_reg)."""
    # Input-independent weight prep (gaussian gating + regularizers).  In training
    # this only needs to rerun when the parameters change (cache w_eff_*/reg_*).
    w_eff_e, reg_e = prepare_kernel_layer(params["enc"]["W"], params["enc"]["u"],
                                          params["enc"]["v"], lambda_o=lambda_o,
                                          lambda_2=lambda_2, out_dtype=matmul_dtype)
    w_eff_d, reg_d = prepare_kernel_layer(params["dec"]["W"], params["dec"]["u"],
                                          params["dec"]["v"], lambda_o=lambda_o,
                                          lambda_2=lambda_2, out_dtype=matmul_dtype)

    # Single fused per-batch kernel: encoder + KL + decoder, tiled over the batch.
    # TODO(synk): the PyTorch module also prints the mean activation; host-side
    # stdout side-effect omitted so the script's stdout is exactly "KERNEL_OK".
    y, kl = fused_autoencoder_forward(x, w_eff_e, params["enc"]["b"],
                                      w_eff_d, params["dec"]["b"],
                                      kl_activation=kl_activation,
                                      block_rows=block_rows,
                                      matmul_dtype=matmul_dtype)
    return y, reg_e + reg_d, kl


# ----------------------------------------------------------------------------
# Main
# ----------------------------------------------------------------------------
if __name__ == "__main__":
    # Small, lane-dense shapes consistent with the module (feature dims multiples
    # of 128).  B=512 with block_rows=256 gives 2 grid steps, so the batch-tiled
    # pipeline (and v7x core-parallelism) is actually exercised.
    B = 512
    n_input = 128
    kernel_hidden = 256
    hidden_dims = 5

    key = jax.random.PRNGKey(0)
    k_param, k_x = jax.random.split(key)
    params = init_params(k_param, n_input, kernel_hidden, hidden_dims)
    x = jax.random.uniform(k_x, (B, n_input), jnp.float32)   # activations in [0, 1]

    fwd = jax.jit(functools.partial(kernel_net_autoencoder_forward,
                                    lambda_o=0.013, lambda_2=60.0,
                                    kl_activation=0.02, block_rows=256))
    recon, reg, kl = fwd(params, x)
    jax.block_until_ready((recon, reg, kl))

    assert recon.shape == (B, n_input)
    assert reg.shape == () and kl.shape == ()
    assert bool(jnp.all(jnp.isfinite(recon)))
    assert bool(jnp.all(recon >= 0.0)) and bool(jnp.all(recon <= 1.0))
    assert bool(jnp.isfinite(reg)) and bool(jnp.isfinite(kl))

    print("KERNEL_OK")
</pallas_src>

<mosaic_0001>
module attributes {stable_mosaic.version = 11 : i64} {
  func.func @_prep_layer_kernel(%arg0: i32, %arg1: memref<128x256xf32, #tpu.memory_space<vmem>>, %arg2: memref<128x8xf32, #tpu.memory_space<vmem>>, %arg3: memref<256x8xf32, #tpu.memory_space<vmem>>, %arg4: memref<128x256xbf16, #tpu.memory_space<vmem>>, %arg5: memref<1xf32, #tpu.memory_space<smem>>) attributes {dimension_semantics = [#tpu.dimension_semantics<arbitrary>], iteration_bounds = array<i64: 1>, scalar_prefetch = 0 : i64, scratch_operands = 0 : i64, tpu.core_type = #tpu.core_type<tc>, window_params = [{pipeline_mode = #tpu.pipeline_mode<synchronous>, transform_indices = @transform_0, window_bounds = array<i64: 128, 256>}, {pipeline_mode = #tpu.pipeline_mode<synchronous>, transform_indices = @transform_1, window_bounds = array<i64: 128, 8>}, {pipeline_mode = #tpu.pipeline_mode<synchronous>, transform_indices = @transform_2, window_bounds = array<i64: 256, 8>}, {pipeline_mode = #tpu.pipeline_mode<synchronous>, transform_indices = @transform_3, window_bounds = array<i64: 128, 256>}, {transform_indices = @transform_4, window_bounds = array<i64: 1>}]} {
    %c0 = arith.constant 0 : index
    %c0_0 = arith.constant 0 : index
    %0 = vector.load %arg2[%c0, %c0_0] : memref<128x8xf32, #tpu.memory_space<vmem>>, vector<128x8xf32>
    %c0_1 = arith.constant 0 : index
    %c0_2 = arith.constant 0 : index
    %1 = vector.load %arg3[%c0_1, %c0_2] : memref<256x8xf32, #tpu.memory_space<vmem>>, vector<256x8xf32>
    %2 = arith.mulf %0, %0 : vector<128x8xf32>
    %cst = arith.constant dense<0.000000e+00> : vector<128xf32>
    %3 = vector.multi_reduction <add>, %2, %cst [1] : vector<128x8xf32> to vector<128xf32>
    %4 = vector.shape_cast %3 : vector<128xf32> to vector<128x1xf32>
    %5 = arith.mulf %1, %1 : vector<256x8xf32>
    %cst_3 = arith.constant dense<0.000000e+00> : vector<256xf32>
    %6 = vector.multi_reduction <add>, %5, %cst_3 [1] : vector<256x8xf32> to vector<256xf32>
    %7 = vector.shape_cast %6 : vector<256xf32> to vector<256x1xf32>
    %8 = tpu.transpose %7, [1, 0] : vector<256x1xf32> -> vector<1x256xf32>
    %cst_4 = arith.constant dense<0.000000e+00> : vector<128x256xf32>
    %9 = tpu.matmul %0, %1, %cst_4 {dimension_numbers = #tpu.dot_dimension_numbers<[1], [1], [0], [0], [0, 0, 1, 0], [], []>} : vector<128x8xf32>, vector<256x8xf32>, vector<128x256xf32> -> vector<128x256xf32>
    %10 = vector.broadcast %4 : vector<128x1xf32> to vector<128x256xf32>
    %11 = vector.broadcast %8 : vector<1x256xf32> to vector<128x256xf32>
    %12 = arith.addf %10, %11 : vector<128x256xf32>
    %cst_5 = arith.constant 2.000000e+00 : f32
    %13 = vector.broadcast %cst_5 : f32 to vector<128x256xf32>
    %14 = arith.mulf %13, %9 : vector<128x256xf32>
    %15 = arith.subf %12, %14 : vector<128x256xf32>
    %cst_6 = arith.constant 0.000000e+00 : f32
    %16 = vector.broadcast %cst_6 : f32 to vector<128x256xf32>
    %17 = arith.maximumf %15, %16 : vector<128x256xf32>
    %cst_7 = arith.constant 0.000000e+00 : f32
    %18 = vector.broadcast %cst_7 : f32 to vector<128x256xf32>
    %19 = arith.subf %18, %17 : vector<128x256xf32>
    %20 = math.exp %19 : vector<128x256xf32>
    %c0_8 = arith.constant 0 : index
    %c0_9 = arith.constant 0 : index
    %21 = vector.load %arg1[%c0_8, %c0_9] : memref<128x256xf32, #tpu.memory_space<vmem>>, vector<128x256xf32>
    %22 = arith.mulf %21, %20 : vector<128x256xf32>
    %23 = arith.truncf %22 : vector<128x256xf32> to vector<128x256xbf16>
    %c0_10 = arith.constant 0 : index
    %c0_11 = arith.constant 0 : index
    %24 = vector.load %arg4[%c0_10, %c0_11] : memref<128x256xbf16, #tpu.memory_space<vmem>>, vector<128x256xbf16>
    tpu.vector_store %arg4[%c0_10, %c0_11], %23 {strides = array<i32>} : memref<128x256xbf16, #tpu.memory_space<vmem>>, vector<128x256xbf16>,
    %25 = arith.mulf %20, %20 : vector<128x256xf32>
    %26 = vector.shape_cast %25 : vector<128x256xf32> to vector<1x128x256xf32>
    %cst_12 = arith.constant dense<0.000000e+00> : vector<1xf32>
    %27 = vector.multi_reduction <add>, %26, %cst_12 [1, 2] : vector<1x128x256xf32> to vector<1xf32>
    %28 = vector.shape_cast %27 : vector<1xf32> to vector<1x1x1xf32>
    %29 = vector.extract %28[0, 0, 0] : f32 from vector<1x1x1xf32>
    %cst_13 = arith.constant 3.05175781E-5 : f32
    %30 = arith.mulf %29, %cst_13 : f32
    %31 = arith.mulf %22, %22 : vector<128x256xf32>
    %32 = vector.shape_cast %31 : vector<128x256xf32> to vector<1x128x256xf32>
    %cst_14 = arith.constant dense<0.000000e+00> : vector<1xf32>
    %33 = vector.multi_reduction <add>, %32, %cst_14 [1, 2] : vector<1x128x256xf32> to vector<1xf32>
    %34 = vector.shape_cast %33 : vector<1xf32> to vector<1x1x1xf32>
    %35 = vector.extract %34[0, 0, 0] : f32 from vector<1x1x1xf32>
    %cst_15 = arith.constant 3.05175781E-5 : f32
    %36 = arith.mulf %35, %cst_15 : f32
    %cst_16 = arith.constant 1.300000e-02 : f32
    %37 = arith.mulf %cst_16, %30 : f32
    %cst_17 = arith.constant 6.000000e+01 : f32
    %38 = arith.mulf %cst_17, %36 : f32
    %39 = arith.addf %37, %38 : f32
    %c0_18 = arith.constant 0 : index
    %40 = memref.load %arg5[%c0_18] : memref<1xf32, #tpu.memory_space<smem>>
    memref.store %39, %arg5[%c0_18] : memref<1xf32, #tpu.memory_space<smem>>
    return
  }
  func.func @transform_0(%arg0: i32) -> (i32, i32) {
    %c0_i32 = arith.constant 0 : i32
    %c0_i32_0 = arith.constant 0 : i32
    %c0_i32_1 = arith.constant 0 : i32
    return %c0_i32, %c0_i32_0 : i32, i32
  }
  func.func @transform_1(%arg0: i32) -> (i32, i32) {
    %c0_i32 = arith.constant 0 : i32
    %c0_i32_0 = arith.constant 0 : i32
    %c0_i32_1 = arith.constant 0 : i32
    return %c0_i32, %c0_i32_0 : i32, i32
  }
  func.func @transform_2(%arg0: i32) -> (i32, i32) {
    %c0_i32 = arith.constant 0 : i32
    %c0_i32_0 = arith.constant 0 : i32
    %c0_i32_1 = arith.constant 0 : i32
    return %c0_i32, %c0_i32_0 : i32, i32
  }
  func.func @transform_3(%arg0: i32) -> (i32, i32) {
    %c0_i32 = arith.constant 0 : i32
    %c0_i32_0 = arith.constant 0 : i32
    %c0_i32_1 = arith.constant 0 : i32
    return %c0_i32, %c0_i32_0 : i32, i32
  }
  func.func @transform_4(%arg0: i32) -> i32 {
    %c0_i32 = arith.constant 0 : i32
    %c0_i32_0 = arith.constant 0 : i32
    return %c0_i32 : i32
  }
}

module attributes {stable_mosaic.version = 11 : i64} {
  func.func @_prep_layer_kernel(%arg0: i32, %arg1: memref<256x128xf32, #tpu.memory_space<vmem>>, %arg2: memref<256x8xf32, #tpu.memory_space<vmem>>, %arg3: memref<128x8xf32, #tpu.memory_space<vmem>>, %arg4: memref<256x128xbf16, #tpu.memory_space<vmem>>, %arg5: memref<1xf32, #tpu.memory_space<smem>>) attributes {dimension_semantics = [#tpu.dimension_semantics<arbitrary>], iteration_bounds = array<i64: 1>, scalar_prefetch = 0 : i64, scratch_operands = 0 : i64, tpu.core_type = #tpu.core_type<tc>, window_params = [{pipeline_mode = #tpu.pipeline_mode<synchronous>, transform_indices = @transform_0, window_bounds = array<i64: 256, 128>}, {pipeline_mode = #tpu.pipeline_mode<synchronous>, transform_indices = @transform_1, window_bounds = array<i64: 256, 8>}, {pipeline_mode = #tpu.pipeline_mode<synchronous>, transform_indices = @transform_2, window_bounds = array<i64: 128, 8>}, {pipeline_mode = #tpu.pipeline_mode<synchronous>, transform_indices = @transform_3, window_bounds = array<i64: 256, 128>}, {transform_indices = @transform_4, window_bounds = array<i64: 1>}]} {
    %c0 = arith.constant 0 : index
    %c0_0 = arith.constant 0 : index
    %0 = vector.load %arg2[%c0, %c0_0] : memref<256x8xf32, #tpu.memory_space<vmem>>, vector<256x8xf32>
    %c0_1 = arith.constant 0 : index
    %c0_2 = arith.constant 0 : index
    %1 = vector.load %arg3[%c0_1, %c0_2] : memref<128x8xf32, #tpu.memory_space<vmem>>, vector<128x8xf32>
    %2 = arith.mulf %0, %0 : vector<256x8xf32>
    %cst = arith.constant dense<0.000000e+00> : vector<256xf32>
    %3 = vector.multi_reduction <add>, %2, %cst [1] : vector<256x8xf32> to vector<256xf32>
    %4 = vector.shape_cast %3 : vector<256xf32> to vector<256x1xf32>
    %5 = arith.mulf %1, %1 : vector<128x8xf32>
    %cst_3 = arith.constant dense<0.000000e+00> : vector<128xf32>
    %6 = vector.multi_reduction <add>, %5, %cst_3 [1] : vector<128x8xf32> to vector<128xf32>
    %7 = vector.shape_cast %6 : vector<128xf32> to vector<128x1xf32>
    %8 = tpu.transpose %7, [1, 0] : vector<128x1xf32> -> vector<1x128xf32>
    %cst_4 = arith.constant dense<0.000000e+00> : vector<256x128xf32>
    %9 = tpu.matmul %0, %1, %cst_4 {dimension_numbers = #tpu.dot_dimension_numbers<[1], [1], [0], [0], [0, 0, 1, 0], [], []>} : vector<256x8xf32>, vector<128x8xf32>, vector<256x128xf32> -> vector<256x128xf32>
    %10 = vector.broadcast %4 : vector<256x1xf32> to vector<256x128xf32>
    %11 = vector.broadcast %8 : vector<1x128xf32> to vector<256x128xf32>
    %12 = arith.addf %10, %11 : vector<256x128xf32>
    %cst_5 = arith.constant 2.000000e+00 : f32
    %13 = vector.broadcast %cst_5 : f32 to vector<256x128xf32>
    %14 = arith.mulf %13, %9 : vector<256x128xf32>
    %15 = arith.subf %12, %14 : vector<256x128xf32>
    %cst_6 = arith.constant 0.000000e+00 : f32
    %16 = vector.broadcast %cst_6 : f32 to vector<256x128xf32>
    %17 = arith.maximumf %15, %16 : vector<256x128xf32>
    %cst_7 = arith.constant 0.000000e+00 : f32
    %18 = vector.broadcast %cst_7 : f32 to vector<256x128xf32>
    %19 = arith.subf %18, %17 : vector<256x128xf32>
    %20 = math.exp %19 : vector<256x128xf32>
    %c0_8 = arith.constant 0 : index
    %c0_9 = arith.constant 0 : index
    %21 = vector.load %arg1[%c0_8, %c0_9] : memref<256x128xf32, #tpu.memory_space<vmem>>, vector<256x128xf32>
    %22 = arith.mulf %21, %20 : vector<256x128xf32>
    %23 = arith.truncf %22 : vector<256x128xf32> to vector<256x128xbf16>
    %c0_10 = arith.constant 0 : index
    %c0_11 = arith.constant 0 : index
    %24 = vector.load %arg4[%c0_10, %c0_11] : memref<256x128xbf16, #tpu.memory_space<vmem>>, vector<256x128xbf16>
    tpu.vector_store %arg4[%c0_10, %c0_11], %23 {strides = array<i32>} : memref<256x128xbf16, #tpu.memory_space<vmem>>, vector<256x128xbf16>,
    %25 = arith.mulf %20, %20 : vector<256x128xf32>
    %26 = vector.shape_cast %25 : vector<256x128xf32> to vector<1x256x128xf32>
    %cst_12 = arith.constant dense<0.000000e+00> : vector<1xf32>
    %27 = vector.multi_reduction <add>, %26, %cst_12 [1, 2] : vector<1x256x128xf32> to vector<1xf32>
    %28 = vector.shape_cast %27 : vector<1xf32> to vector<1x1x1xf32>
    %29 = vector.extract %28[0, 0, 0] : f32 from vector<1x1x1xf32>
    %cst_13 = arith.constant 3.05175781E-5 : f32
    %30 = arith.mulf %29, %cst_13 : f32
    %31 = arith.mulf %22, %22 : vector<256x128xf32>
    %32 = vector.shape_cast %31 : vector<256x128xf32> to vector<1x256x128xf32>
    %cst_14 = arith.constant dense<0.000000e+00> : vector<1xf32>
    %33 = vector.multi_reduction <add>, %32, %cst_14 [1, 2] : vector<1x256x128xf32> to vector<1xf32>
    %34 = vector.shape_cast %33 : vector<1xf32> to vector<1x1x1xf32>
    %35 = vector.extract %34[0, 0, 0] : f32 from vector<1x1x1xf32>
    %cst_15 = arith.constant 3.05175781E-5 : f32
    %36 = arith.mulf %35, %cst_15 : f32
    %cst_16 = arith.constant 1.300000e-02 : f32
    %37 = arith.mulf %cst_16, %30 : f32
    %cst_17 = arith.constant 6.000000e+01 : f32
    %38 = arith.mulf %cst_17, %36 : f32
    %39 = arith.addf %37, %38 : f32
    %c0_18 = arith.constant 0 : index
    %40 = memref.load %arg5[%c0_18] : memref<1xf32, #tpu.memory_space<smem>>
    memref.store %39, %arg5[%c0_18] : memref<1xf32, #tpu.memory_space<smem>>
    return
  }
  func.func @transform_0(%arg0: i32) -> (i32, i32) {
    %c0_i32 = arith.constant 0 : i32
    %c0_i32_0 = arith.constant 0 : i32
    %c0_i32_1 = arith.constant 0 : i32
    return %c0_i32, %c0_i32_0 : i32, i32
  }
  func.func @transform_1(%arg0: i32) -> (i32, i32) {
    %c0_i32 = arith.constant 0 : i32
    %c0_i32_0 = arith.constant 0 : i32
    %c0_i32_1 = arith.constant 0 : i32
    return %c0_i32, %c0_i32_0 : i32, i32
  }
  func.func @transform_2(%arg0: i32) -> (i32, i32) {
    %c0_i32 = arith.constant 0 : i32
    %c0_i32_0 = arith.constant 0 : i32
    %c0_i32_1 = arith.constant 0 : i32
    return %c0_i32, %c0_i32_0 : i32, i32
  }
  func.func @transform_3(%arg0: i32) -> (i32, i32) {
    %c0_i32 = arith.constant 0 : i32
    %c0_i32_0 = arith.constant 0 : i32
    %c0_i32_1 = arith.constant 0 : i32
    return %c0_i32, %c0_i32_0 : i32, i32
  }
  func.func @transform_4(%arg0: i32) -> i32 {
    %c0_i32 = arith.constant 0 : i32
    %c0_i32_0 = arith.constant 0 : i32
    return %c0_i32 : i32
  }
}

module attributes {stable_mosaic.version = 11 : i64} {
  func.func @_fused_forward_kernel(%arg0: i32, %arg1: memref<256x128xbf16, #tpu.memory_space<vmem>>, %arg2: memref<128x256xbf16, #tpu.memory_space<vmem>>, %arg3: memref<1x256xf32, #tpu.memory_space<vmem>>, %arg4: memref<256x128xbf16, #tpu.memory_space<vmem>>, %arg5: memref<1x128xf32, #tpu.memory_space<vmem>>, %arg6: memref<256x128xf32, #tpu.memory_space<vmem>>, %arg7: memref<8x256xf32, #tpu.memory_space<vmem>>) attributes {dimension_semantics = [#tpu.dimension_semantics<parallel>], iteration_bounds = array<i64: 2>, scalar_prefetch = 0 : i64, scratch_operands = 0 : i64, tpu.core_type = #tpu.core_type<tc>, window_params = [{transform_indices = @transform_0, window_bounds = array<i64: 256, 128>}, {pipeline_mode = #tpu.pipeline_mode<synchronous>, transform_indices = @transform_1, window_bounds = array<i64: 128, 256>}, {pipeline_mode = #tpu.pipeline_mode<synchronous>, transform_indices = @transform_2, window_bounds = array<i64: 1, 256>}, {pipeline_mode = #tpu.pipeline_mode<synchronous>, transform_indices = @transform_3, window_bounds = array<i64: 256, 128>}, {pipeline_mode = #tpu.pipeline_mode<synchronous>, transform_indices = @transform_4, window_bounds = array<i64: 1, 128>}, {transform_indices = @transform_5, window_bounds = array<i64: 256, 128>}, {transform_indices = @transform_6, window_bounds = array<i64: 8, 256>}]} {
    %c0 = arith.constant 0 : index
    %c0_0 = arith.constant 0 : index
    %0 = vector.load %arg1[%c0, %c0_0] : memref<256x128xbf16, #tpu.memory_space<vmem>>, vector<256x128xbf16>
    %c0_1 = arith.constant 0 : index
    %c0_2 = arith.constant 0 : index
    %1 = vector.load %arg2[%c0_1, %c0_2] : memref<128x256xbf16, #tpu.memory_space<vmem>>, vector<128x256xbf16>
    %cst = arith.constant dense<0.000000e+00> : vector<256x256xf32>
    %2 = tpu.matmul %0, %1, %cst {dimension_numbers = #tpu.dot_dimension_numbers<[1], [0], [0], [1], [0, 0, 1, 1], [], []>} : vector<256x128xbf16>, vector<128x256xbf16>, vector<256x256xf32> -> vector<256x256xf32>
    %c0_3 = arith.constant 0 : index
    %c0_4 = arith.constant 0 : index
    %3 = vector.load %arg3[%c0_3, %c0_4] : memref<1x256xf32, #tpu.memory_space<vmem>>, vector<1x256xf32>
    %4 = vector.broadcast %3 : vector<1x256xf32> to vector<256x256xf32>
    %5 = arith.addf %2, %4 : vector<256x256xf32>
    %cst_5 = arith.constant -13.8155098 : f32
    %cst_6 = arith.constant 13.8155098 : f32
    %6 = vector.broadcast %cst_5 : f32 to vector<256x256xf32>
    %7 = arith.maximumf %6, %5 : vector<256x256xf32>
    %8 = vector.broadcast %cst_6 : f32 to vector<256x256xf32>
    %9 = arith.minimumf %8, %7 : vector<256x256xf32>
    %cst_7 = arith.constant 0.000000e+00 : f32
    %10 = vector.broadcast %cst_7 : f32 to vector<256x256xf32>
    %11 = arith.subf %10, %9 : vector<256x256xf32>
    %12 = math.exp %11 : vector<256x256xf32>
    %cst_8 = arith.constant 1.000000e+00 : f32
    %13 = vector.broadcast %cst_8 : f32 to vector<256x256xf32>
    %14 = arith.addf %13, %12 : vector<256x256xf32>
    %cst_9 = arith.constant 1.000000e+00 : f32
    %15 = vector.broadcast %cst_9 : f32 to vector<256x256xf32>
    %16 = arith.divf %15, %14 : vector<256x256xf32>
    %17 = math.log %14 : vector<256x256xf32>
    %cst_10 = arith.constant 0.000000e+00 : f32
    %18 = vector.broadcast %cst_10 : f32 to vector<256x256xf32>
    %19 = arith.subf %18, %17 : vector<256x256xf32>
    %cst_11 = arith.constant -3.91202307 : f32
    %20 = vector.broadcast %cst_11 : f32 to vector<256x256xf32>
    %21 = arith.subf %19, %20 : vector<256x256xf32>
    %22 = arith.mulf %16, %21 : vector<256x256xf32>
    %cst_12 = arith.constant 1.000000e+00 : f32
    %23 = vector.broadcast %cst_12 : f32 to vector<256x256xf32>
    %24 = arith.subf %23, %16 : vector<256x256xf32>
    %cst_13 = arith.constant 0.000000e+00 : f32
    %25 = vector.broadcast %cst_13 : f32 to vector<256x256xf32>
    %26 = arith.subf %25, %9 : vector<256x256xf32>
    %27 = arith.subf %26, %17 : vector<256x256xf32>
    %cst_14 = arith.constant -0.0202027075 : f32
    %28 = vector.broadcast %cst_14 : f32 to vector<256x256xf32>
    %29 = arith.subf %27, %28 : vector<256x256xf32>
    %30 = arith.mulf %24, %29 : vector<256x256xf32>
    %31 = arith.addf %22, %30 : vector<256x256xf32>
    %c256_i32 = arith.constant 256 : i32
    %32 = arith.muli %arg0, %c256_i32 : i32
    %33 = tpu.iota {dimensions = array<i32: 0>} : vector<256x1xi32>
    %34 = vector.broadcast %32 : i32 to vector<256x1xi32>
    %35 = arith.addi %34, %33 : vector<256x1xi32>
    %c512_i32 = arith.constant 512 : i32
    %36 = vector.broadcast %c512_i32 : i32 to vector<256x1xi32>
    %37 = arith.cmpi slt, %35, %36 : vector<256x1xi32>
    %38 = arith.extui %37 : vector<256x1xi1> to vector<256x1xi32>
    %39 = arith.sitofp %38 : vector<256x1xi32> to vector<256x1xf32>
    %cst_15 = arith.constant 0.000000e+00 : f32
    %40 = vector.broadcast %cst_15 : f32 to vector<8x256xf32>
    %c0_16 = arith.constant 0 : index
    %c0_17 = arith.constant 0 : index
    %41 = vector.load %arg7[%c0_16, %c0_17] : memref<8x256xf32, #tpu.memory_space<vmem>>, vector<8x256xf32>
    tpu.vector_store %arg7[%c0_16, %c0_17], %40 {strides = array<i32>} : memref<8x256xf32, #tpu.memory_space<vmem>>, vector<8x256xf32>,
    %42 = vector.broadcast %39 : vector<256x1xf32> to vector<256x256xf32>
    %43 = arith.mulf %31, %42 : vector<256x256xf32>
    %cst_18 = arith.constant dense<0.000000e+00> : vector<256xf32>
    %44 = vector.multi_reduction <add>, %43, %cst_18 [0] : vector<256x256xf32> to vector<256xf32>
    %45 = vector.shape_cast %44 : vector<256xf32> to vector<1x256xf32>
    %c0_19 = arith.constant 0 : index
    %c0_20 = arith.constant 0 : index
    %46 = vector.load %arg7[%c0_19, %c0_20] : memref<8x256xf32, #tpu.memory_space<vmem>>, vector<1x256xf32>
    tpu.vector_store %arg7[%c0_19, %c0_20], %45 {strides = array<i32>} : memref<8x256xf32, #tpu.memory_space<vmem>>, vector<1x256xf32>,
    %47 = arith.truncf %16 : vector<256x256xf32> to vector<256x256xbf16>
    %c0_21 = arith.constant 0 : index
    %c0_22 = arith.constant 0 : index
    %48 = vector.load %arg4[%c0_21, %c0_22] : memref<256x128xbf16, #tpu.memory_space<vmem>>, vector<256x128xbf16>
    %cst_23 = arith.constant dense<0.000000e+00> : vector<256x128xf32>
    %49 = tpu.matmul %47, %48, %cst_23 {dimension_numbers = #tpu.dot_dimension_numbers<[1], [0], [0], [1], [0, 0, 1, 1], [], []>} : vector<256x256xbf16>, vector<256x128xbf16>, vector<256x128xf32> -> vector<256x128xf32>
    %c0_24 = arith.constant 0 : index
    %c0_25 = arith.constant 0 : index
    %50 = vector.load %arg5[%c0_24, %c0_25] : memref<1x128xf32, #tpu.memory_space<vmem>>, vector<1x128xf32>
    %51 = vector.broadcast %50 : vector<1x128xf32> to vector<256x128xf32>
    %52 = arith.addf %49, %51 : vector<256x128xf32>
    %cst_26 = arith.constant 5.000000e-01 : f32
    %53 = vector.broadcast %cst_26 : f32 to vector<256x128xf32>
    %54 = arith.mulf %53, %52 : vector<256x128xf32>
    %55 = math.tanh %54 : vector<256x128xf32>
    %cst_27 = arith.constant 5.000000e-01 : f32
    %56 = vector.broadcast %cst_27 : f32 to vector<256x128xf32>
    %57 = arith.mulf %56, %55 : vector<256x128xf32>
    %cst_28 = arith.constant 5.000000e-01 : f32
    %58 = vector.broadcast %cst_28 : f32 to vector<256x128xf32>
    %59 = arith.addf %57, %58 : vector<256x128xf32>
    %c0_29 = arith.constant 0 : index
    %c0_30 = arith.constant 0 : index
    %60 = vector.load %arg6[%c0_29, %c0_30] : memref<256x128xf32, #tpu.memory_space<vmem>>, vector<256x128xf32>
    tpu.vector_store %arg6[%c0_29, %c0_30], %59 {strides = array<i32>} : memref<256x128xf32, #tpu.memory_space<vmem>>, vector<256x128xf32>,
    return
  }
  func.func @transform_0(%arg0: i32) -> (i32, i32) {
    %c0_i32 = arith.constant 0 : i32
    %c0_i32_0 = arith.constant 0 : i32
    return %arg0, %c0_i32 : i32, i32
  }
  func.func @transform_1(%arg0: i32) -> (i32, i32) {
    %c0_i32 = arith.constant 0 : i32
    %c0_i32_0 = arith.constant 0 : i32
    %c0_i32_1 = arith.constant 0 : i32
    return %c0_i32, %c0_i32_0 : i32, i32
  }
  func.func @transform_2(%arg0: i32) -> (i32, i32) {
    %c0_i32 = arith.constant 0 : i32
    %c0_i32_0 = arith.constant 0 : i32
    %c0_i32_1 = arith.constant 0 : i32
    return %c0_i32, %c0_i32_0 : i32, i32
  }
  func.func @transform_3(%arg0: i32) -> (i32, i32) {
    %c0_i32 = arith.constant 0 : i32
    %c0_i32_0 = arith.constant 0 : i32
    %c0_i32_1 = arith.constant 0 : i32
    return %c0_i32, %c0_i32_0 : i32, i32
  }
  func.func @transform_4(%arg0: i32) -> (i32, i32) {
    %c0_i32 = arith.constant 0 : i32
    %c0_i32_0 = arith.constant 0 : i32
    %c0_i32_1 = arith.constant 0 : i32
    return %c0_i32, %c0_i32_0 : i32, i32
  }
  func.func @transform_5(%arg0: i32) -> (i32, i32) {
    %c0_i32 = arith.constant 0 : i32
    %c0_i32_0 = arith.constant 0 : i32
    return %arg0, %c0_i32 : i32, i32
  }
  func.func @transform_6(%arg0: i32) -> (i32, i32) {
    %c0_i32 = arith.constant 0 : i32
    %c0_i32_0 = arith.constant 0 : i32
    return %arg0, %c0_i32 : i32, i32
  }
}

</mosaic_0001>

<bundles_post_ra>
// kernel: kernel_net_autoencoder_forward.4
= control target key start
LH: loop header
LB: loop body
LE: loop exit
PB: predicated region body
PF: predicated region fallthrough
CT: control target
= control target key end

     0   :  { %vm97_vm0 = vcmask 64512   ;;  %s2674_s0 = inlined_call_operand.vmem [shape: f32[256,128], index: 0, kind: input, shape index: {}]   ;;  %s2675_s1 = inlined_call_operand.vmem [shape: f32[256,8], index: 1, kind: input, shape index: {}]   ;;  %s2676_s2 = inlined_call_operand.vmem [shape: f32[128,8], index: 2, kind: input, shape index: {}]   ;;  %s2677_s3 = inlined_call_operand.vmem [shape: bf16[256,128], index: 3, kind: output, shape index: {0}]   ;;  %s2678_s4 = inlined_call_operand.hbm [shape: f32[1], index: 4, kind: output, shape index: {1}]  }
   0x1   :  { %v49_v0 = vld [vmem:[%s2676_s2] sm:$0xff]  ;;  %v50_v1 = vld [vmem:[%s2676_s2 + $0x8] sm:$0xff]  ;;  %v51_v2 = vld [vmem:[%s2676_s2 + $0x10] sm:$0xff] }
   0x2   :  { %v1614_v3 = vpack.c.bf16 %v50_v1, %v49_v0  ;;  %vm1796_vm1 = vmpackc.low %vm97_vm0, %vm97_vm0  ;;  %v194_v5 = vmul.f32 %v49_v0, %v49_v0  ;;  %v52_v6 = vld [vmem:[%s2676_s2 + $0x18] sm:$0xff]  ;;  %v196_v7 = vmul.f32 %v51_v2, %v51_v2  ;;  %v195_v8 = vmul.f32 %v50_v1, %v50_v1  ;;  %v53_v13 = vld [vmem:[%s2676_s2 + $0x20] sm:$0xff] }
   0x3   :  { %v1620_v9 = vpack.c.bf16 %v52_v6, %v51_v2  ;;  %v197_v12 = vmul.f32 %v52_v6, %v52_v6  ;;  %v54_v15 = vld [vmem:[%s2676_s2 + $0x28] sm:$0xff]  ;;  %v1827_v16 = vld [vmem:[%s2675_s1] sm:$0xff]  ;;  %v198_v18 = vmul.f32 %v53_v13, %v53_v13  ;;  %v55_v21 = vld [vmem:[%s2676_s2 + $0x30] sm:$0xff] }
   0x4   :  { %1616 = vmatprep.subr.msk.bf16.mxu0 %vm1796_vm1, %v1614_v3  ;;  %1662 = vmatprep.subr.msk.bf16.mxu1 %vm1796_vm1, %v1614_v3  ;;  %v210_v10 = vsel %vm97_vm0, %v194_v5, 0.0  ;;  %v216_v11 = vsel %vm97_vm0, %v196_v7, 0.0  ;;  %v213_v14 = vsel %vm97_vm0, %v195_v8, 0.0  ;;  %v199_v19 = vmul.f32 %v54_v15, %v54_v15  ;;  %v1835_v20 = vld [vmem:[%s2675_s1 + $0x80] sm:$0xff]  ;;  %v56_v23 = vld [vmem:[%s2676_s2 + $0x38] sm:$0xff]  ;;  %v58_v29 = vld [vmem:[%s2676_s2 + $0x48] sm:$0xff] }
   0x5   :  { %1619 = vmatpush3.bf16.xpose.msk.msra.mxu0 %vm1796_vm1, %v1614_v3  ;;  %1670 = vmatpush3.bf16.xpose.msk.msra.mxu1 %vm1796_vm1, %v1614_v3  ;;  %v219_v17 = vsel %vm97_vm0, %v197_v12, 0.0  ;;  %v1626_v22 = vpack.c.bf16 %v54_v15, %v53_v13  ;;  %v222_v24 = vsel %vm97_vm0, %v198_v18, 0.0  ;;  %v200_v26 = vmul.f32 %v55_v21, %v55_v21  ;;  %v57_v28 = vld [vmem:[%s2676_s2 + $0x40] sm:$0xff]  ;;  %v59_v34 = vld [vmem:[%s2676_s2 + $0x50] sm:$0xff] }
   0x6   :  { %211 = vadd.xlane.f32.xlu0 %v210_v10  ;;  %1622 = vmatprep.subr.msk.bf16.mxu0 %vm1796_vm1, %v1620_v9  ;;  %v225_v25 = vsel %vm97_vm0, %v199_v19, 0.0  ;;  %v201_v27 = vmul.f32 %v56_v23, %v56_v23  ;;  %v202_v32 = vmul.f32 %v57_v28, %v57_v28  ;;  %v203_v33 = vmul.f32 %v58_v29, %v58_v29 }
   0x7   :  { %1663 = vmatprep.subr.msk.bf16.mxu1 %vm1796_vm1, %v1620_v9  ;;  %217 = vadd.xlane.f32.xlu1 %v216_v11  ;;  %v228_v30 = vsel %vm97_vm0, %v200_v26, 0.0 }
   0x8   :  { %1566 = vmatprep.mubr.msk.f32.mxu0 %vm97_vm0, %v1827_v16  ;;  %1590 = vmatprep.mubr.msk.f32.mxu1 %vm97_vm0, %v1835_v20  ;;  %v231_v31 = vsel %vm97_vm0, %v201_v27, 0.0 }
   0xa   :  { %214 = vadd.xlane.f32.xlu0 %v213_v14 }
   0xb   :  { %220 = vadd.xlane.f32.xlu1 %v219_v17 }
   0xd   :  { %1625 = vmatpush3.bf16.xpose.msk.msra.mxu0 %vm1796_vm1, %v1620_v9  ;;  %1671 = vmatpush3.bf16.xpose.msk.msra.mxu1 %vm1796_vm1, %v1620_v9 }
   0xe   :  { %1628 = vmatprep.subr.msk.bf16.mxu0 %vm1796_vm1, %v1626_v22  ;;  %1664 = vmatprep.subr.msk.bf16.mxu1 %vm1796_vm1, %v1626_v22 }
   0xf   :  { %223 = vadd.xlane.f32.xlu0 %v222_v24  ;;  %226 = vadd.xlane.f32.xlu1 %v225_v25 }
  0x10   :  { %10 = vsyncpa [#allocation3], 0  ;;  %v1632_v35 = vpack.c.bf16 %v56_v23, %v55_v21  ;;  %v60_v36 = vld [vmem:[%s2676_s2 + $0x58] sm:$0xff]  ;;  %v234_v37 = vsel %vm97_vm0, %v202_v32, 0.0  ;;  %v237_v38 = vsel %vm97_vm0, %v203_v33, 0.0  ;;  %v204_v39 = vmul.f32 %v59_v34, %v59_v34  ;;  %v61_v41 = vld [vmem:[%s2676_s2 + $0x60] sm:$0xff] }
  0x11   :  { %v205_v40 = vmul.f32 %v60_v36, %v60_v36  ;;  %v62_v42 = vld [vmem:[%s2676_s2 + $0x68] sm:$0xff]  ;;  %v206_v44 = vmul.f32 %v61_v41, %v61_v41  ;;  %v1890_v47 = vld [vmem:[%s2676_s2 + $0x70] sm:$0xff]  ;;  %v1895_v48 = vld [vmem:[%s2676_s2 + $0x78] sm:$0xff]  ;;  %v1638_v49 = vpack.c.bf16 %v58_v29, %v57_v28  ;;  %v65_v56 = vmul.f32 %v1827_v16, %v1827_v16  ;;  %s1747_s22 = scalar_lea.hbm %s2678_s4, 16 }
  0x12   :  { %v240_v43 = vsel %vm97_vm0, %v204_v39, 0.0  ;;  %v207_v46 = vmul.f32 %v62_v42, %v62_v42  ;;  %v208_v51 = vmul.f32 %v1890_v47, %v1890_v47  ;;  %v209_v53 = vmul.f32 %v1895_v48, %v1895_v48  ;;  %v1910_v54 = vld [vmem:[%s2675_s1 + $0x8] sm:$0xff]  ;;  %v1925_v59 = vld [vmem:[%s2675_s1 + $0x10] sm:$0xff]  ;;  %v1930_v60 = vld [vmem:[%s2675_s1 + $0x18] sm:$0xff]  ;;  %p1748_p0 = scmp.ne.s32.totalorder %s2678_s4, %s1747_s22  ;;  %p1751_p1 = scmp.lt.u32.totalorder %s1747_s22, %s2678_s4 }
  0x13   :  { %229 = vadd.xlane.f32.xlu0 %v228_v30  ;;  %232 = vadd.xlane.f32.xlu1 %v231_v31  ;;  %v243_v45 = vsel %vm97_vm0, %v205_v40, 0.0  ;;  %v246_v50 = vsel %vm97_vm0, %v206_v44, 0.0  ;;  %v66_v58 = vmul.f32 %v1910_v54, %v1910_v54  ;;  %v1644_v61 = vpack.c.bf16 %v60_v36, %v59_v34  ;;  %v1945_v2 = vld [vmem:[%s2675_s1 + $0x20] sm:$0xff]  ;;  %v1950_v3 = vld [vmem:[%s2675_s1 + $0x28] sm:$0xff]  ;;  %v1965_v9 = vld [vmem:[%s2675_s1 + $0x30] sm:$0xff] }
  0x14   :  { %v249_v52 = vsel %vm97_vm0, %v207_v46, 0.0  ;;  %v252_v55 = vsel %vm97_vm0, %v208_v51, 0.0  ;;  %v255_v57 = vsel %vm97_vm0, %v209_v53, 0.0  ;;  %v98_v62 = vsel %vm97_vm0, %v65_v56, 0.0  ;;  %v1970_v10 = vld [vmem:[%s2675_s1 + $0x38] sm:$0xff]  ;;  %v1985_v16 = vld [vmem:[%s2675_s1 + $0x40] sm:$0xff]  ;;  %p1753_p2 = pnand %p1751_p1, %p1748_p0 }
  0x15   :  { %1631 = vmatpush3.bf16.xpose.msk.msra.mxu0 %vm1796_vm1, %v1626_v22  ;;  %1672 = vmatpush3.bf16.xpose.msk.msra.mxu1 %vm1796_vm1, %v1626_v22  ;;  %v67_v63 = vmul.f32 %v1925_v59, %v1925_v59  ;;  %v101_v0 = vsel %vm97_vm0, %v66_v58, 0.0  ;;  %v68_v1 = vmul.f32 %v1930_v60, %v1930_v60  ;;  %v69_v6 = vmul.f32 %v1945_v2, %v1945_v2  ;;  %v1990_v17 = vld [vmem:[%s2675_s1 + $0x48] sm:$0xff]  ;;  %v2005_v23 = vld [vmem:[%s2675_s1 + $0x50] sm:$0xff]  ;;  %v2010_v24 = vld [vmem:[%s2675_s1 + $0x58] sm:$0xff] }
  0x16   :  { %1634 = vmatprep.subr.msk.bf16.mxu0 %vm1796_vm1, %v1632_v35  ;;  %1665 = vmatprep.subr.msk.bf16.mxu1 %vm1796_vm1, %v1632_v35  ;;  %v70_v8 = vmul.f32 %v1950_v3, %v1950_v3  ;;  %v1650_v11 = vpack.c.bf16 %v62_v42, %v61_v41  ;;  %v71_v13 = vmul.f32 %v1965_v9, %v1965_v9  ;;  %v2027_v30 = vld [vmem:[%s2675_s1 + $0x60] sm:$0xff]  ;;  %v2032_v31 = vld [vmem:[%s2675_s1 + $0x68] sm:$0xff]  ;;  %v2047_v36 = vld [vmem:[%s2675_s1 + $0x70] sm:$0xff] }
  0x17   :  { %235 = vadd.xlane.f32.xlu0 %v234_v37  ;;  %238 = vadd.xlane.f32.xlu1 %v237_v38  ;;  %v104_v5 = vsel %vm97_vm0, %v67_v63, 0.0  ;;  %v107_v7 = vsel %vm97_vm0, %v68_v1, 0.0  ;;  %v110_v12 = vsel %vm97_vm0, %v69_v6, 0.0  ;;  %v72_v15 = vmul.f32 %v1970_v10, %v1970_v10  ;;  %v2052_v37 = vld [vmem:[%s2675_s1 + $0x78] sm:$0xff]  ;;  %v34_v42 = vld [vmem:[%s2675_s1 + $0x88] sm:$0xff]  ;;  %v41_v58 = vld [vmem:[%s2675_s1 + $0xc0] sm:$0xff] }
  0x18   :  { %v113_v14 = vsel %vm97_vm0, %v70_v8, 0.0  ;;  %v116_v18 = vsel %vm97_vm0, %v71_v13, 0.0  ;;  %v73_v19 = vmul.f32 %v1985_v16, %v1985_v16  ;;  %v74_v22 = vmul.f32 %v1990_v17, %v1990_v17  ;;  %v38_v53 = vld [vmem:[%s2675_s1 + $0xa8] sm:$0xff]  ;;  %v44_v1 = vld [vmem:[%s2675_s1 + $0xd8] sm:$0xff] }
  0x19   :  { %v119_v21 = vsel %vm97_vm0, %v72_v15, 0.0  ;;  %v1656_v25 = vpack.c.bf16 %v1895_v48, %v1890_v47  ;;  %v75_v27 = vmul.f32 %v2005_v23, %v2005_v23  ;;  %v76_v29 = vmul.f32 %v2010_v24, %v2010_v24  ;;  %v35_v47 = vld [vmem:[%s2675_s1 + $0x90] sm:$0xff]  ;;  %v46_v6 = vld [vmem:[%s2675_s1 + $0xe8] sm:$0xff] }
  0x1a   :  { %v122_v26 = vsel %vm97_vm0, %v73_v19, 0.0  ;;  %v125_v28 = vsel %vm97_vm0, %v74_v22, 0.0  ;;  %v77_v33 = vmul.f32 %v2027_v30, %v2027_v30  ;;  %v79_v39 = vmul.f32 %v2047_v36, %v2047_v36 }
  0x1b   :  { %241 = vadd.xlane.f32.xlu0 %v240_v43  ;;  %244 = vadd.xlane.f32.xlu1 %v243_v45  ;;  %v128_v32 = vsel %vm97_vm0, %v75_v27, 0.0  ;;  %v131_v34 = vsel %vm97_vm0, %v76_v29, 0.0  ;;  %v80_v41 = vmul.f32 %v2052_v37, %v2052_v37  ;;  %v81_v43 = vmul.f32 %v1835_v20, %v1835_v20 }
  0x1c   :  { %v134_v38 = vsel %vm97_vm0, %v77_v33, 0.0  ;;  %v140_v44 = vsel %vm97_vm0, %v79_v39, 0.0  ;;  %v82_v46 = vmul.f32 %v34_v42, %v34_v42  ;;  %v83_v48 = vmul.f32 %v35_v47, %v35_v47 }
  0x1d   :  { %1637 = vmatpush3.bf16.xpose.msk.msra.mxu0 %vm1796_vm1, %v1632_v35  ;;  %1673 = vmatpush3.bf16.xpose.msk.msra.mxu1 %vm1796_vm1, %v1632_v35  ;;  %v78_v35 = vmul.f32 %v2032_v31, %v2032_v31  ;;  %v143_v45 = vsel %vm97_vm0, %v80_v41, 0.0  ;;  %v146_v4 = vsel %vm97_vm0, %v81_v43, 0.0 }
  0x1e   :  { %1640 = vmatprep.subr.msk.bf16.mxu0 %vm1796_vm1, %v1638_v49  ;;  %1666 = vmatprep.subr.msk.bf16.mxu1 %vm1796_vm1, %v1638_v49  ;;  %v149_v20 = vsel %vm97_vm0, %v82_v46, 0.0  ;;  %v152_v51 = vsel %vm97_vm0, %v83_v48, 0.0 }
  0x1f   :  { %247 = vadd.xlane.f32.xlu0 %v246_v50  ;;  %250 = vadd.xlane.f32.xlu1 %v249_v52  ;;  %v137_v40 = vsel %vm97_vm0, %v78_v35, 0.0  ;;  %v37_v50 = vld [vmem:[%s2675_s1 + $0xa0] sm:$0xff] }
  0x20   :  { %v85_v56 = vmul.f32 %v37_v50, %v37_v50 }
  0x23   :  { %253 = vadd.xlane.f32.xlu0 %v252_v55  ;;  %256 = vadd.xlane.f32.xlu1 %v255_v57  ;;  %v40_v57 = vld [vmem:[%s2675_s1 + $0xb8] sm:$0xff] }
  0x25   :  { %1643 = vmatpush3.bf16.xpose.msk.msra.mxu0 %vm1796_vm1, %v1638_v49  ;;  %1674 = vmatpush3.bf16.xpose.msk.msra.mxu1 %vm1796_vm1, %v1638_v49  ;;  %v36_v49 = vld [vmem:[%s2675_s1 + $0x98] sm:$0xff] }
  0x26   :  { %1646 = vmatprep.subr.msk.bf16.mxu0 %vm1796_vm1, %v1644_v61  ;;  %1667 = vmatprep.subr.msk.bf16.mxu1 %vm1796_vm1, %v1644_v61  ;;  %v84_v52 = vmul.f32 %v36_v49, %v36_v49 }
  0x27   :  { %99 = vadd.xlane.f32.xlu0 %v98_v62  ;;  %102 = vadd.xlane.f32.xlu1 %v101_v0  ;;  %v43_v62 = vld [vmem:[%s2675_s1 + $0xd0] sm:$0xff] }
  0x28   :  { %v155_v55 = vsel %vm97_vm0, %v84_v52, 0.0 }
  0x2b   :  { %105 = vadd.xlane.f32.xlu0 %v104_v5  ;;  %108 = vadd.xlane.f32.xlu1 %v107_v7  ;;  %v88_v5 = vmul.f32 %v40_v57, %v40_v57  ;;  %v47_v7 = vld [vmem:[%s2675_s1 + $0xf0] sm:$0xff] }
  0x2d   :  { %1649 = vmatpush3.bf16.xpose.msk.msra.mxu0 %vm1796_vm1, %v1644_v61  ;;  %1675 = vmatpush3.bf16.xpose.msk.msra.mxu1 %vm1796_vm1, %v1644_v61  ;;  %v42_v61 = vld [vmem:[%s2675_s1 + $0xc8] sm:$0xff]  ;;  %v167_v8 = vsel %vm97_vm0, %v88_v5, 0.0 }
  0x2e   :  { %1652 = vmatprep.subr.msk.bf16.mxu0 %vm1796_vm1, %v1650_v11  ;;  %1668 = vmatprep.subr.msk.bf16.mxu1 %vm1796_vm1, %v1650_v11 }
  0x2f   :  { %111 = vadd.xlane.f32.xlu0 %v110_v12  ;;  %114 = vadd.xlane.f32.xlu1 %v113_v14  ;;  %v90_v12 = vmul.f32 %v42_v61, %v42_v61  ;;  %v91_v14 = vmul.f32 %v43_v62, %v43_v62 }
  0x31   :  { %v173_v13 = vsel %vm97_vm0, %v90_v12, 0.0  ;;  %v176_v15 = vsel %vm97_vm0, %v91_v14, 0.0 }
  0x33   :  { %117 = vadd.xlane.f32.xlu0 %v116_v18  ;;  %120 = vadd.xlane.f32.xlu1 %v119_v21  ;;  %v94_v21 = vmul.f32 %v46_v6, %v46_v6 }
  0x35   :  { %1655 = vmatpush3.bf16.xpose.msk.msra.mxu0 %vm1796_vm1, %v1650_v11  ;;  %1676 = vmatpush3.bf16.xpose.msk.msra.mxu1 %vm1796_vm1, %v1650_v11  ;;  %v185_v22 = vsel %vm97_vm0, %v94_v21, 0.0 }
  0x36   :  { %1658 = vmatprep.subr.msk.bf16.mxu0 %vm1796_vm1, %v1656_v25  ;;  %1669 = vmatprep.subr.msk.bf16.mxu1 %vm1796_vm1, %v1656_v25 }
  0x37   :  { %123 = vadd.xlane.f32.xlu0 %v122_v26  ;;  %126 = vadd.xlane.f32.xlu1 %v125_v28 }
  0x3b   :  { %129 = vadd.xlane.f32.xlu0 %v128_v32  ;;  %132 = vadd.xlane.f32.xlu1 %v131_v34 }
  0x3d   :  { %1661 = vmatpush3.bf16.xpose.msk.msra.mxu0 %vm1796_vm1, %v1656_v25  ;;  %1677 = vmatpush3.bf16.xpose.msk.msra.mxu1 %vm1796_vm1, %v1656_v25 }
  0x3f   :  { %135 = vadd.xlane.f32.xlu0 %v134_v38  ;;  %138 = vadd.xlane.f32.xlu1 %v137_v40 }
  0x43   :  { %141 = vadd.xlane.f32.xlu0 %v140_v44  ;;  %144 = vadd.xlane.f32.xlu1 %v143_v45 }
  0x44   :  { %1591 = vmatmul.mubr.msk.f32.vlgmr.msra.gmra.mrb[0].mxu1 %vm97_vm0, %v34_v42  ;;  %1567 = vmatmul.mubr.msk.f32.vlgmr.msra.gmra.mrb[0].mxu0 %vm97_vm0, %v1910_v54  ;;  %v39_v54 = vld [vmem:[%s2675_s1 + $0xb0] sm:$0xff] }
  0x45   :  { %1569 = vmatprep.mubr.msk.f32.mxu0 %vm97_vm0, %v1925_v59  ;;  %1593 = vmatprep.mubr.msk.f32.mxu1 %vm97_vm0, %v35_v47  ;;  %v158_v59 = vsel %vm97_vm0, %v85_v56, 0.0  ;;  %v87_v0 = vmul.f32 %v39_v54, %v39_v54 }
  0x47   :  { %147 = vadd.xlane.f32.xlu0 %v146_v4  ;;  %150 = vadd.xlane.f32.xlu1 %v149_v20 }
  0x48   :  { %1594 = vmatmul.mubr.msk.f32.gmra.mrb[2].mxu1 %vm97_vm0, %v36_v49  ;;  %1570 = vmatmul.mubr.msk.f32.gmra.mrb[2].mxu0 %vm97_vm0, %v1930_v60  ;;  %v86_v60 = vmul.f32 %v38_v53, %v38_v53 }
  0x49   :  { %1572 = vmatprep.mubr.msk.f32.mxu0 %vm97_vm0, %v1945_v2  ;;  %1596 = vmatprep.mubr.msk.f32.mxu1 %vm97_vm0, %v37_v50  ;;  %v45_v2 = vld [vmem:[%s2675_s1 + $0xe0] sm:$0xff] }
  0x4a   :  { %v161_v63 = vsel %vm97_vm0, %v86_v60, 0.0  ;;  %v93_v18 = vmul.f32 %v45_v2, %v45_v2 }
  0x4b   :  { %153 = vadd.xlane.f32.xlu0 %v152_v51 }
  0x4c   :  { %1597 = vmatmul.mubr.msk.f32.gmra.mrb[4].mxu1 %vm97_vm0, %v38_v53  ;;  %1573 = vmatmul.mubr.msk.f32.gmra.mrb[4].mxu0 %vm97_vm0, %v1950_v3  ;;  %v164_v3 = vsel %vm97_vm0, %v87_v0, 0.0  ;;  %v182_v19 = vsel %vm97_vm0, %v93_v18, 0.0 }
  0x4d   :  { %1575 = vmatprep.mubr.msk.f32.mxu0 %vm97_vm0, %v1965_v9  ;;  %1599 = vmatprep.mubr.msk.f32.mxu1 %vm97_vm0, %v39_v54  ;;  %v89_v9 = vmul.f32 %v41_v58, %v41_v58 }
  0x4f   :  { %156 = vadd.xlane.f32.xlu0 %v155_v55  ;;  %v170_v11 = vsel %vm97_vm0, %v89_v9, 0.0 }
  0x50   :  { %1600 = vmatmul.mubr.msk.f32.gmra.mrb[6].mxu1 %vm97_vm0, %v40_v57  ;;  %1576 = vmatmul.mubr.msk.f32.gmra.mrb[6].mxu0 %vm97_vm0, %v1970_v10  ;;  %v48_v10 = vld [vmem:[%s2675_s1 + $0xf8] sm:$0xff] }
  0x51   :  { %1578 = vmatprep.mubr.msk.f32.mxu0 %vm97_vm0, %v1985_v16  ;;  %1602 = vmatprep.mubr.msk.f32.mxu1 %vm97_vm0, %v41_v58  ;;  %v92_v16 = vmul.f32 %v44_v1, %v44_v1  ;;  %v96_v25 = vmul.f32 %v48_v10, %v48_v10 }
  0x53   :  { %159 = vadd.xlane.f32.xlu0 %v158_v59  ;;  %v191_v26 = vsel %vm97_vm0, %v96_v25, 0.0 }
  0x54   :  { %1603 = vmatmul.mubr.msk.f32.gmra.mrb[8].mxu1 %vm97_vm0, %v42_v61  ;;  %1579 = vmatmul.mubr.msk.f32.gmra.mrb[8].mxu0 %vm97_vm0, %v1990_v17  ;;  %v179_v17 = vsel %vm97_vm0, %v92_v16, 0.0  ;;  %v659_v61 = vlaneseq }
  0x55   :  { %1581 = vmatprep.mubr.msk.f32.mxu0 %vm97_vm0, %v2005_v23  ;;  %1605 = vmatprep.mubr.msk.f32.mxu1 %vm97_vm0, %v43_v62  ;;  %v95_v23 = vmul.f32 %v47_v7, %v47_v7 }
  0x57   :  { %162 = vadd.xlane.f32.xlu0 %v161_v63  ;;  %v660_v63 = vshrl.u32 %v659_v61, 7 }
  0x58   :  { %1606 = vmatmul.mubr.msk.f32.gmra.mrb[10].mxu1 %vm97_vm0, %v44_v1  ;;  %1582 = vmatmul.mubr.msk.f32.gmra.mrb[10].mxu0 %vm97_vm0, %v2010_v24  ;;  %v188_v24 = vsel %vm97_vm0, %v95_v23, 0.0 }
  0x59   :  { %1584 = vmatprep.mubr.msk.f32.mxu0 %vm97_vm0, %v2027_v30  ;;  %1608 = vmatprep.mubr.msk.f32.mxu1 %vm97_vm0, %v45_v2  ;;  %v661_v1 = vsub.s32 0, %v660_v63 }
  0x5b   :  { %165 = vadd.xlane.f32.xlu0 %v164_v3 }
  0x5c   :  { %1609 = vmatmul.mubr.msk.f32.gmra.mrb[12].mxu1 %vm97_vm0, %v46_v6  ;;  %1585 = vmatmul.mubr.msk.f32.gmra.mrb[12].mxu0 %vm97_vm0, %v2032_v31 }
  0x5d   :  { %1587 = vmatprep.mubr.msk.f32.mxu0 %vm97_vm0, %v2047_v36  ;;  %1611 = vmatprep.mubr.msk.f32.mxu1 %vm97_vm0, %v47_v7 }
  0x5f   :  { %168 = vadd.xlane.f32.xlu0 %v167_v8 }
  0x60   :  { %1612 = vmatmul.mubr.msk.f32.gmra.mrb[14].mxu1 %vm97_vm0, %v48_v10  ;;  %1588 = vmatmul.mubr.msk.f32.gmra.mrb[14].mxu0 %vm97_vm0, %v2052_v37 }
  0x63   :  { %171 = vadd.xlane.f32.xlu0 %v170_v11 }
  0x67   :  { %174 = vadd.xlane.f32.xlu0 %v173_v13 }
  0x6b   :  { %177 = vadd.xlane.f32.xlu0 %v176_v15 }
  0x6f   :  { %180 = vadd.xlane.f32.xlu0 %v179_v17 }
  0x73   :  { %183 = vadd.xlane.f32.xlu0 %v182_v19 }
  0x77   :  { %186 = vadd.xlane.f32.xlu0 %v185_v22 }
  0x7b   :  { %189 = vadd.xlane.f32.xlu0 %v188_v24 }
  0x7f   :  { %192 = vadd.xlane.f32.xlu0 %v191_v26 }
  0x93   :  { %v212_v27 = vpop.xlane.xlu0 %211 }
  0x94   :  { %258 = vxpose.xlu1.b32.start [1/16] (narrow) %v212_v27, 8  ;;  %v218_v29 = vpop.xlane.xlu1 %217 }
  0x97   :  { %v215_v28 = vpop.xlane.xlu0 %214 }
  0x98   :  { %259 = vxpose.xlu1.b32.cont [2/16] (narrow) %v215_v28, 8  ;;  %v221_v30 = vpop.xlane.xlu1 %220 }
  0x9c   :  { %260 = vxpose.xlu1.b32.cont [3/16] (narrow) %v218_v29, 8  ;;  %v224_v31 = vpop.xlane.xlu0 %223  ;;  %v227_v32 = vpop.xlane.xlu1 %226 }
  0xa0   :  { %261 = vxpose.xlu1.b32.cont [4/16] (narrow) %v221_v30, 8  ;;  %v230_v33 = vpop.xlane.xlu0 %229  ;;  %v233_v34 = vpop.xlane.xlu1 %232 }
  0xa4   :  { %262 = vxpose.xlu1.b32.cont [5/16] (narrow) %v224_v31, 8  ;;  %v236_v35 = vpop.xlane.xlu0 %235  ;;  %v239_v37 = vpop.xlane.xlu1 %238 }
  0xa8   :  { %263 = vxpose.xlu1.b32.cont [6/16] (narrow) %v227_v32, 8  ;;  %v242_v36 = vpop.xlane.xlu0 %241  ;;  %v245_v39 = vpop.xlane.xlu1 %244 }
  0xac   :  { %264 = vxpose.xlu1.b32.cont [7/16] (narrow) %v230_v33, 8  ;;  %v248_v38 = vpop.xlane.xlu0 %247  ;;  %v251_v41 = vpop.xlane.xlu1 %250 }
  0xb0   :  { %265 = vxpose.xlu1.b32.cont [8/16] (narrow) %v233_v34, 8  ;;  %v254_v40 = vpop.xlane.xlu0 %253  ;;  %v257_v44 = vpop.xlane.xlu1 %256 }
  0xb4   :  { %266 = vxpose.xlu1.b32.cont [9/16] (narrow) %v236_v35, 8  ;;  %v100_v42 = vpop.xlane.xlu0 %99  ;;  %v103_v4 = vpop.xlane.xlu1 %102 }
  0xb8   :  { %267 = vxpose.xlu1.b32.cont [10/16] (narrow) %v239_v37, 8  ;;  %v106_v43 = vpop.xlane.xlu0 %105  ;;  %v109_v20 = vpop.xlane.xlu1 %108 }
  0xbc   :  { %268 = vxpose.xlu1.b32.cont [11/16] (narrow) %v242_v36, 8  ;;  %v112_v45 = vpop.xlane.xlu0 %111  ;;  %v115_v50 = vpop.xlane.xlu1 %114 }
  0xc0   :  { %269 = vxpose.xlu1.b32.cont [12/16] (narrow) %v245_v39, 8  ;;  %v2174_v46 = vpop.xlane.xlu0 %117  ;;  %v121_v52 = vpop.xlane.xlu1 %120 }
  0xc4   :  { %270 = vxpose.xlu1.b32.cont [13/16] (narrow) %v248_v38, 8  ;;  %v2176_v47 = vpop.xlane.xlu0 %123  ;;  %v2184_v54 = vpop.xlane.xlu1 %126 }
  0xc8   :  { %271 = vxpose.xlu1.b32.cont [14/16] (narrow) %v251_v41, 8  ;;  %v2178_v48 = vpop.xlane.xlu0 %129  ;;  %v2186_v56 = vpop.xlane.xlu1 %132 }
  0xcc   :  { %272 = vxpose.xlu1.b32.cont [15/16] (narrow) %v254_v40, 8  ;;  %v2180_v49 = vpop.xlane.xlu0 %135  ;;  %v2188_v58 = vpop.xlane.xlu1 %138 }
  0xd0   :  { %273 = vxpose.xlu1.b32.end [16/16] (narrow) %v257_v44, 8  ;;  %v2182_v51 = vpop.xlane.xlu0 %141  ;;  %v2190_v60 = vpop.xlane.xlu1 %144 }
  0xd4   :  { %v148_v53 = vpop.xlane.xlu0 %147  ;;  %v151_v0 = vpop.xlane.xlu1 %150 }
  0xd8   :  { %v154_v55 = vpop.xlane.xlu0 %153 }
  0xdc   :  { %v157_v57 = vpop.xlane.xlu0 %156 }
  0xe0   :  { %v160_v59 = vpop.xlane.xlu0 %159 }
  0xe4   :  { %v163_v62 = vpop.xlane.xlu0 %162 }
  0xe8   :  { %v2192_v2 = vpop.xlane.xlu0 %165 }
  0xec   :  { %v169_v10 = vpop.xlane.xlu0 %168 }
 0x114   :  { %v274_v3 = vpop.trf.xlu1 }
 0x115   :  { %v2194_v5 = vrot.slane %v274_v3, %v661_v1 }
 0x117   :  { %v1568_v6 = vpop.f32.mrb[0].mxu0  ;;  %v1592_v7 = vpop.f32.mrb[0].mxu1  ;;  %v663_v11 = vadd.f32 %v2194_v5, %v100_v42  ;;  %v664_v14 = vadd.f32 %v2194_v5, %v103_v4  ;;  %v665_v15 = vadd.f32 %v2194_v5, %v106_v43  ;;  %v666_v16 = vadd.f32 %v2194_v5, %v109_v20 }
 0x118   :  { %v500_v8 = vpop.f32.mrb[1].mxu0  ;;  %v580_v9 = vpop.f32.mrb[1].mxu1  ;;  %v2201_v17 = vadd.f32 %v2194_v5, %v112_v45  ;;  %v2204_v21 = vadd.f32 %v2194_v5, %v115_v50  ;;  %v2207_v22 = vadd.f32 %v2194_v5, %v121_v52  ;;  %v679_v23 = vadd.f32 %v2194_v5, %v148_v53 }
 0x119   :  { %v680_v24 = vadd.f32 %v2194_v5, %v151_v0  ;;  %v681_v25 = vadd.f32 %v2194_v5, %v154_v55  ;;  %v682_v26 = vadd.f32 %v2194_v5, %v157_v57  ;;  %v2214_v27 = vadd.f32 %v2194_v5, %v160_v59  ;;  %v2219_v45 = vpop.xlane.xlu0 %171 }
 0x11a   :  { %v696_v28 = vmul.f32 2.0, %v1568_v6  ;;  %v2217_v29 = vadd.f32 %v2194_v5, %v163_v62  ;;  %v712_v30 = vmul.f32 2.0, %v1592_v7  ;;  %v695_v31 = vmul.f32 2.0, %v500_v8 }
 0x11b   :  { %v1571_v12 = vpop.f32.mrb[2].mxu0  ;;  %v1595_v13 = vpop.f32.mrb[2].mxu1  ;;  %v711_v32 = vmul.f32 2.0, %v580_v9 }
 0x11c   :  { %v510_v18 = vpop.f32.mrb[3].mxu0  ;;  %v590_v19 = vpop.f32.mrb[3].mxu1  ;;  %v728_v35 = vsub.f32 %v664_v14, %v696_v28  ;;  %v698_v36 = vmul.f32 2.0, %v1571_v12  ;;  %v714_v37 = vmul.f32 2.0, %v1595_v13  ;;  %v744_v41 = vsub.f32 %v680_v24, %v712_v30 }
 0x11d   :  { %v697_v38 = vmul.f32 2.0, %v510_v18  ;;  %v727_v42 = vsub.f32 %v663_v11, %v695_v31  ;;  %v743_v43 = vsub.f32 %v679_v23, %v711_v32  ;;  %v713_v44 = vmul.f32 2.0, %v590_v19 }
 0x11e   :  { %v760_v4 = vmax.f32 %v728_v35, 0.0  ;;  %v730_v20 = vsub.f32 %v666_v16, %v698_v36  ;;  %v746_v50 = vsub.f32 %v682_v26, %v714_v37  ;;  %v776_v53 = vmax.f32 %v744_v41, 0.0 }
 0x11f   :  { %v1574_v33 = vpop.f32.mrb[4].mxu0  ;;  %v1598_v34 = vpop.f32.mrb[4].mxu1  ;;  %v729_v52 = vsub.f32 %v665_v15, %v697_v38  ;;  %v759_v55 = vmax.f32 %v727_v42, 0.0  ;;  %v775_v57 = vmax.f32 %v743_v43, 0.0  ;;  %v745_v59 = vsub.f32 %v681_v25, %v713_v44 }
 0x120   :  { %v520_v39 = vpop.f32.mrb[5].mxu0  ;;  %v600_v40 = vpop.f32.mrb[5].mxu1  ;;  %v792_v63 = vsub.f32 0.0, %v760_v4  ;;  %v762_v0 = vmax.f32 %v730_v20, 0.0  ;;  %v778_v1 = vmax.f32 %v746_v50, 0.0  ;;  %v808_v8 = vsub.f32 0.0, %v776_v53 }
 0x121   :  { %v761_v3 = vmax.f32 %v729_v52, 0.0  ;;  %v791_v9 = vsub.f32 0.0, %v759_v55  ;;  %v807_v11 = vsub.f32 0.0, %v775_v57  ;;  %v777_v12 = vmax.f32 %v745_v59, 0.0  ;;  %v2226_v25 = vpop.xlane.xlu0 %174 }
 0x122   :  { %v825_v13 = vmul.f32 1.442695, %v792_v63  ;;  %v794_v14 = vsub.f32 0.0, %v762_v0  ;;  %v810_v15 = vsub.f32 0.0, %v778_v1  ;;  %v2224_v18 = vadd.f32 %v2194_v5, %v169_v10 }
 0x123   :  { %v1577_v61 = vpop.f32.mrb[6].mxu0  ;;  %v1601_v62 = vpop.f32.mrb[6].mxu1  ;;  %v793_v16 = vsub.f32 0.0, %v761_v3  ;;  %v857_v19 = vmul.f32 1.442695, %v808_v8  ;;  %v809_v31 = vsub.f32 0.0, %v777_v12  ;;  %v669_v12 = vadd.f32 %v2194_v5, %v2174_v46 }
 0x124   :  { %v530_v6 = vpop.f32.mrb[7].mxu0  ;;  %v2221_v7 = vpop.f32.mrb[7].mxu1  ;;  %v823_v23 = vmul.f32 1.442695, %v791_v9  ;;  %v855_v24 = vmul.f32 1.442695, %v807_v11  ;;  %1683 = vpow2.f32 %v825_v13 }
 0x125   :  { %v829_v26 = vmul.f32 1.442695, %v794_v14  ;;  %v861_v28 = vmul.f32 1.442695, %v810_v15  ;;  %v827_v30 = vmul.f32 1.442695, %v793_v16  ;;  %1685 = vpow2.f32 %v857_v19  ;;  %v2266_v19 = vpop.xlane.xlu0 %177 }
 0x126   :  { %v700_v32 = vmul.f32 2.0, %v1574_v33  ;;  %v716_v35 = vmul.f32 2.0, %v1598_v34  ;;  %1687 = vpow2.f32 %v823_v23  ;;  %v699_v10 = vmul.f32 2.0, %v520_v39  ;;  %v904_v13 = vld [vmem:[%s2674_s0 + $0x88] sm:$0xff] }
 0x127   :  { %v2228_v36 = vpop.f32.mrb[8].mxu0  ;;  %v2230_v37 = vpop.f32.mrb[8].mxu1  ;;  %v715_v38 = vmul.f32 2.0, %v600_v40  ;;  %v702_v41 = vmul.f32 2.0, %v1577_v61  ;;  %1689 = vpow2.f32 %v855_v24  ;;  %v859_v44 = vmul.f32 1.442695, %v809_v31 }
 0x128   :  { %v2232_v42 = vpop.f32.mrb[9].mxu0  ;;  %v2234_v43 = vpop.f32.mrb[9].mxu1  ;;  %v732_v4 = vsub.f32 %v2204_v21, %v700_v32  ;;  %v748_v20 = vsub.f32 %v2217_v29, %v716_v35  ;;  %1691 = vpow2.f32 %v829_v26  ;;  %v731_v50 = vsub.f32 %v2201_v17, %v699_v10 }
 0x129   :  { %v747_v39 = vsub.f32 %v2214_v27, %v715_v38  ;;  %v734_v40 = vsub.f32 %v2207_v22, %v702_v41  ;;  %1693 = vpow2.f32 %v861_v28  ;;  %v718_v57 = vmul.f32 2.0, %v1601_v62  ;;  %v888_v22 = vld [vmem:[%s2674_s0 + $0x8] sm:$0xff] }
 0x12a   :  { %v764_v55 = vmax.f32 %v732_v4, 0.0  ;;  %v780_v21 = vmax.f32 %v748_v20, 0.0  ;;  %1695 = vpow2.f32 %v827_v30  ;;  %v763_v29 = vmax.f32 %v731_v50, 0.0 }
 0x12b   :  { %v2238_v33 = vpop.f32.mrb[10].mxu0  ;;  %v2240_v34 = vpop.f32.mrb[10].mxu1  ;;  %v779_v59 = vmax.f32 %v747_v39, 0.0  ;;  %v766_v61 = vmax.f32 %v734_v40, 0.0  ;;  %1697 = vpow2.f32 %v859_v44  ;;  %v750_v8 = vsub.f32 %v2224_v18, %v718_v57 }
 0x12c   :  { %v2245_v52 = vpop.f32.mrb[11].mxu0  ;;  %v2247_v53 = vpop.f32.mrb[11].mxu1  ;;  %v796_v63 = vsub.f32 0.0, %v764_v55  ;;  %v812_v0 = vsub.f32 0.0, %v780_v21  ;;  %v795_v1 = vsub.f32 0.0, %v763_v29  ;;  %v701_v62 = vmul.f32 2.0, %v530_v6 }
 0x12d   :  { %v811_v3 = vsub.f32 0.0, %v779_v59  ;;  %v2270_v18 = vadd.f32 %v2194_v5, %v2176_v47  ;;  %v887_v6 = vld [vmem:[%s2674_s0] sm:$0xff]  ;;  %v798_v46 = vsub.f32 0.0, %v766_v61  ;;  %v2279_v28 = vadd.f32 %v2194_v5, %v2184_v54  ;;  %v890_v54 = vld [vmem:[%s2674_s0 + $0x18] sm:$0xff]  ;;  %v889_v61 = vld [vmem:[%s2674_s0 + $0x10] sm:$0xff] }
 0x12e   :  { %v833_v14 = vmul.f32 1.442695, %v796_v63  ;;  %v865_v15 = vmul.f32 1.442695, %v812_v0  ;;  %v1684_v16 = vpop.eup %1683  ;;  %v831_v23 = vmul.f32 1.442695, %v795_v1  ;;  %v733_v44 = vsub.f32 %v669_v12, %v701_v62 }
 0x12f   :  { %v2249_v17 = vpop.f32.mrb[12].mxu0  ;;  %v2251_v27 = vpop.f32.mrb[12].mxu1  ;;  %v863_v24 = vmul.f32 1.442695, %v811_v3  ;;  %v920_v30 = vmul.f32 %v1684_v16, %v888_v22  ;;  %v1112_v31 = vmul.f32 %v1684_v16, %v1684_v16  ;;  %v903_v47 = vld [vmem:[%s2674_s0 + $0x80] sm:$0xff]  ;;  %v782_v41 = vmax.f32 %v750_v8, 0.0 }
 0x130   :  { %v2257_v9 = vpop.f32.mrb[13].mxu0  ;;  %v2259_v11 = vpop.f32.mrb[13].mxu1  ;;  %1699 = vpow2.f32 %v833_v14  ;;  %v906_v21 = vld [vmem:[%s2674_s0 + $0x98] sm:$0xff]  ;;  %v2305_v29 = vadd.f32 %v2194_v5, %v2178_v48  ;;  %v837_v63 = vmul.f32 1.442695, %v798_v46  ;;  %v905_v48 = vld [vmem:[%s2674_s0 + $0x90] sm:$0xff]  ;;  %v2320_v12 = vadd.f32 %v2194_v5, %v2186_v56 }
 0x131   :  { %v2275_v26 = vpop.eup %1685  ;;  %1701 = vpow2.f32 %v865_v15  ;;  %v1185_v39 = vmul.f32 %v920_v30, %v920_v30  ;;  %v765_v15 = vmax.f32 %v733_v44, 0.0  ;;  %v717_v46 = vmul.f32 2.0, %v2221_v7  ;;  %v2333_v56 = vpop.xlane.xlu0 %180 }
 0x132   :  { %v1688_v10 = vpop.eup %1687  ;;  %v2289_v38 = vmul.f32 %v2275_v26, %v904_v13  ;;  %1703 = vpow2.f32 %v831_v23  ;;  %v685_v7 = vadd.f32 %v2194_v5, %v2192_v2 }
 0x133   :  { %v2284_v32 = vpop.f32.mrb[14].mxu0  ;;  %v2286_v35 = vpop.f32.mrb[14].mxu1  ;;  %v919_v40 = vmul.f32 %v1688_v10, %v887_v6  ;;  %v1111_v55 = vmul.f32 %v1688_v10, %v1688_v10  ;;  %1705 = vpow2.f32 %v863_v24  ;;  %v814_v24 = vsub.f32 0.0, %v782_v41 }
 0x134   :  { %v2294_v4 = vpop.f32.mrb[15].mxu0  ;;  %v2296_v20 = vpop.f32.mrb[15].mxu1  ;;  %1707 = vpow2.f32 %v837_v63 }
 0x135   :  { %v2298_v50 = vpop.eup %1689  ;;  %v1394_v22 = vpack.c.bf16 %v920_v30, %v919_v40  ;;  %v1143_v1 = vadd.f32 %v1112_v31, %v1111_v55  ;;  %v1184_v3 = vmul.f32 %v919_v40, %v919_v40  ;;  %v2337_v30 = vadd.f32 %v2194_v5, %v2180_v49  ;;  %v892_v49 = vld [vmem:[%s2674_s0 + $0x28] sm:$0xff] }
 0x136   :  { %v1692_v57 = vpop.eup %1691  ;;  %v2308_v59 = vmul.f32 %v2298_v50, %v903_v47  ;;  %v2341_v31 = vadd.f32 %v2194_v5, %v2188_v58  ;;  %v908_v40 = vld [vmem:[%s2674_s0 + $0xa8] sm:$0xff]  ;;  %v797_v55 = vsub.f32 0.0, %v765_v15  ;;  %v869_v63 = vmul.f32 1.442695, %v814_v24 }
 0x137   :  { %v2313_v0 = vpop.eup %1693  ;;  %v922_v8 = vmul.f32 %v1692_v57, %v890_v54  ;;  %1395 = vst [vmem:[%s2677_s3] sm:$0xff] %v1394_v22   ;;  %v1216_v6 = vadd.f32 %v1185_v39, %v1184_v3  ;;  %v1114_v58 = vmul.f32 %v1692_v57, %v1692_v57  ;;  %v891_v57 = vld [vmem:[%s2674_s0 + $0x20] sm:$0xff]  ;;  %v749_v22 = vsub.f32 %v685_v7, %v717_v46  ;;  %v2381_v7 = vpop.xlane.xlu0 %183 }
 0x138   :  { %v1696_v62 = vpop.eup %1695  ;;  %v1434_v13 = vpack.c.bf16 %v2289_v38, %v2308_v59  ;;  %v2325_v14 = vmul.f32 %v2313_v0, %v906_v21 }
 0x139   :  { %v2327_v16 = vpop.eup %1697  ;;  %v921_v23 = vmul.f32 %v1696_v62, %v889_v61  ;;  %v1113_v47 = vmul.f32 %v1696_v62, %v1696_v62  ;;  %v1187_v61 = vmul.f32 %v922_v8, %v922_v8  ;;  %v835_v62 = vmul.f32 1.442695, %v797_v55 }
 0x13a   :  { %1478 = vst [vmem:[%s2677_s3 + $0x40] sm:$0xff] %v1434_v13   ;;  %v2347_v10 = vmul.f32 %v2327_v16, %v905_v48  ;;  %v1700_v21 = vpop.eup %1699  ;;  %v704_v13 = vmul.f32 2.0, %v2228_v36  ;;  %v781_v46 = vmax.f32 %v749_v22, 0.0 }
 0x13b   :  { %v1399_v54 = vpack.c.bf16 %v922_v8, %v921_v23  ;;  %v1186_v41 = vmul.f32 %v921_v23, %v921_v23  ;;  %v1144_v44 = vadd.f32 %v1143_v1, %v1113_v47  ;;  %v2365_v1 = vpop.eup %1701  ;;  %v924_v3 = vmul.f32 %v1700_v21, %v892_v49  ;;  %v907_v8 = vld [vmem:[%s2674_s0 + $0xa0] sm:$0xff] }
 0x13c   :  { %v1439_v39 = vpack.c.bf16 %v2325_v14, %v2347_v10  ;;  %v1704_v15 = vpop.eup %1703  ;;  %v2377_v23 = vmul.f32 %v2365_v1, %v908_v40  ;;  %1709 = vpow2.f32 %v835_v62  ;;  %v1116_v36 = vmul.f32 %v1700_v21, %v1700_v21 }
 0x13d   :  { %1471 = vst [vmem:[%s2677_s3 + $0x8] sm:$0xff] %v1399_v54   ;;  %v1217_v2 = vadd.f32 %v1216_v6, %v1186_v41  ;;  %v1145_v48 = vadd.f32 %v1144_v44, %v1114_v58  ;;  %v687_v6 = vadd.f32 %v2194_v5, %v2219_v45  ;;  %v2379_v47 = vpop.eup %1705  ;;  %v688_v54 = vadd.f32 %v2194_v5, %v2226_v25  ;;  %v894_v25 = vld [vmem:[%s2674_s0 + $0x38] sm:$0xff] }
 0x13e   :  { %1479 = vst [vmem:[%s2677_s3 + $0x48] sm:$0xff] %v1439_v39   ;;  %v923_v41 = vmul.f32 %v1704_v15, %v891_v57  ;;  %v1115_v49 = vmul.f32 %v1704_v15, %v1704_v15  ;;  %v2386_v58 = vmul.f32 %v2379_v47, %v907_v8  ;;  %1711 = vpow2.f32 %v869_v63 }
 0x13f   :  { %v1218_v24 = vadd.f32 %v1217_v2, %v1187_v61  ;;  %v813_v45 = vsub.f32 0.0, %v781_v46  ;;  %v736_v55 = vsub.f32 %v2279_v28, %v704_v13  ;;  %v1189_v61 = vmul.f32 %v924_v3, %v924_v3  ;;  %v187_v13 = vpop.xlane.xlu0 %186 }
 0x140   :  { %v1404_v44 = vpack.c.bf16 %v924_v3, %v923_v41  ;;  %v1146_v39 = vadd.f32 %v1145_v48, %v1115_v49  ;;  %v1188_v40 = vmul.f32 %v923_v41, %v923_v41  ;;  %v1444_v2 = vpack.c.bf16 %v2377_v23, %v2386_v58  ;;  %v1708_v3 = vpop.eup %1707 }
 0x141   :  { %v867_v57 = vmul.f32 1.442695, %v813_v45  ;;  %v720_v21 = vmul.f32 2.0, %v2230_v37  ;;  %v768_v48 = vmax.f32 %v736_v55, 0.0  ;;  %v703_v28 = vmul.f32 2.0, %v2232_v42 }
 0x142   :  { %1472 = vst [vmem:[%s2677_s3 + $0x10] sm:$0xff] %v1404_v44   ;;  %v1219_v63 = vadd.f32 %v1218_v24, %v1188_v40  ;;  %v1147_v22 = vadd.f32 %v1146_v39, %v1116_v36  ;;  %1480 = vst [vmem:[%s2677_s3 + $0x50] sm:$0xff] %v1444_v2   ;;  %v719_v62 = vmul.f32 2.0, %v2234_v43  ;;  %v706_v37 = vmul.f32 2.0, %v2238_v33 }
 0x143   :  { %1713 = vpow2.f32 %v867_v57  ;;  %v752_v8 = vsub.f32 %v688_v54, %v720_v21  ;;  %v2406_v15 = vadd.f32 %v2194_v5, %v2182_v51  ;;  %v926_v24 = vmul.f32 %v1708_v3, %v894_v25  ;;  %v893_v51 = vld [vmem:[%s2674_s0 + $0x30] sm:$0xff] }
 0x144   :  { %v1220_v46 = vadd.f32 %v1219_v63, %v1189_v61  ;;  %v800_v41 = vsub.f32 0.0, %v768_v48  ;;  %v735_v49 = vsub.f32 %v2270_v18, %v703_v28  ;;  %v751_v36 = vsub.f32 %v687_v6, %v719_v62  ;;  %v190_v48 = vpop.xlane.xlu0 %189 }
 0x145   :  { %v784_v42 = vmax.f32 %v752_v8, 0.0  ;;  %v738_v45 = vsub.f32 %v2320_v12, %v706_v37  ;;  %v2412_v54 = vadd.f32 %v2194_v5, %v2190_v60  ;;  %v690_v43 = vadd.f32 %v2194_v5, %v2333_v56  ;;  %v910_v56 = vld [vmem:[%s2674_s0 + $0xb8] sm:$0xff] }
 0x146   :  { %v1118_v33 = vmul.f32 %v1708_v3, %v1708_v3  ;;  %v841_v44 = vmul.f32 1.442695, %v800_v41  ;;  %v767_v40 = vmax.f32 %v735_v49, 0.0  ;;  %v783_v55 = vmax.f32 %v751_v36, 0.0  ;;  %v1710_v6 = vpop.eup %1709 }
 0x147   :  { %v816_v39 = vsub.f32 0.0, %v784_v42  ;;  %v770_v18 = vmax.f32 %v738_v45, 0.0  ;;  %v1191_v61 = vmul.f32 %v926_v24, %v926_v24  ;;  %v722_v12 = vmul.f32 2.0, %v2240_v34 }
 0x148   :  { %1715 = vpow2.f32 %v841_v44  ;;  %v705_v60 = vmul.f32 2.0, %v2245_v52  ;;  %v2421_v2 = vpop.eup %1711  ;;  %v925_v25 = vmul.f32 %v1710_v6, %v893_v51  ;;  %v1117_v57 = vmul.f32 %v1710_v6, %v1710_v6  ;;  %v909_v52 = vld [vmem:[%s2674_s0 + $0xb0] sm:$0xff] }
 0x149   :  { %v873_v21 = vmul.f32 1.442695, %v816_v39  ;;  %v799_v63 = vsub.f32 0.0, %v767_v40  ;;  %v815_v28 = vsub.f32 0.0, %v783_v55  ;;  %v802_v3 = vsub.f32 0.0, %v770_v18 }
 0x14a   :  { %v754_v8 = vsub.f32 %v690_v43, %v722_v12  ;;  %v737_v62 = vsub.f32 %v2305_v29, %v705_v60  ;;  %v1409_v37 = vpack.c.bf16 %v926_v24, %v925_v25  ;;  %v1148_v34 = vadd.f32 %v1147_v22, %v1117_v57 }
 0x14b   :  { %v1190_v41 = vmul.f32 %v925_v25, %v925_v25  ;;  %1717 = vpow2.f32 %v873_v21  ;;  %v2431_v42 = vmul.f32 %v2421_v2, %v910_v56  ;;  %v839_v49 = vmul.f32 1.442695, %v799_v63 }
 0x14c   :  { %v871_v36 = vmul.f32 1.442695, %v815_v28  ;;  %v845_v45 = vmul.f32 1.442695, %v802_v3  ;;  %1473 = vst [vmem:[%s2677_s3 + $0x18] sm:$0xff] %v1409_v37   ;;  %v2438_v22 = vadd.f32 %v1148_v34, %v1118_v33  ;;  %v786_v24 = vmax.f32 %v754_v8, 0.0  ;;  %v193_v33 = vpop.xlane.xlu0 %192 }
 0x14d   :  { %v2433_v51 = vpop.eup %1713  ;;  %v1221_v29 = vadd.f32 %v1220_v46, %v1190_v41  ;;  %v769_v43 = vmax.f32 %v737_v62, 0.0  ;;  %v689_v44 = vadd.f32 %v2194_v5, %v2266_v19  ;;  %1719 = vpow2.f32 %v839_v49  ;;  %v912_v62 = vld [vmem:[%s2674_s0 + $0xc8] sm:$0xff] }
 0x14e   :  { %v2443_v39 = vmul.f32 %v2433_v51, %v909_v52  ;;  %v721_v40 = vmul.f32 2.0, %v2247_v53  ;;  %1721 = vpow2.f32 %v871_v36  ;;  %v818_v18 = vsub.f32 0.0, %v786_v24 }
 0x14f   :  { %v2446_v55 = vadd.f32 %v1221_v29, %v1191_v61  ;;  %v801_v6 = vsub.f32 0.0, %v769_v43  ;;  %v692_v46 = vadd.f32 %v2194_v5, %v187_v13  ;;  %1723 = vpow2.f32 %v845_v45  ;;  %v896_v13 = vld [vmem:[%s2674_s0 + $0x48] sm:$0xff] }
 0x150   :  { %v1449_v12 = vpack.c.bf16 %v2431_v42, %v2443_v39  ;;  %v753_v60 = vsub.f32 %v689_v44, %v721_v40  ;;  %v877_v19 = vmul.f32 1.442695, %v818_v18  ;;  %v708_v25 = vmul.f32 2.0, %v2249_v17 }
 0x151   :  { %v843_v56 = vmul.f32 1.442695, %v801_v6  ;;  %v724_v57 = vmul.f32 2.0, %v2251_v27  ;;  %v707_v21 = vmul.f32 2.0, %v2257_v9  ;;  %v723_v63 = vmul.f32 2.0, %v2259_v11 }
 0x152   :  { %v1716_v53 = vpop.eup %1715  ;;  %1481 = vst [vmem:[%s2677_s3 + $0x58] sm:$0xff] %v1449_v12   ;;  %v785_v61 = vmax.f32 %v753_v60, 0.0  ;;  %v710_v28 = vmul.f32 2.0, %v2284_v32  ;;  %v691_v17 = vadd.f32 %v2194_v5, %v2381_v7  ;;  %v2465_v27 = vadd.f32 %v2194_v5, %v190_v48 }
 0x153   :  { %v2468_v3 = vadd.f32 %v2194_v5, %v193_v33  ;;  %v740_v8 = vsub.f32 %v2341_v31, %v708_v25  ;;  %1725 = vpow2.f32 %v843_v56  ;;  %v756_v11 = vsub.f32 %v692_v46, %v724_v57  ;;  %v895_v5 = vld [vmem:[%s2674_s0 + $0x40] sm:$0xff]  ;;  %v898_v56 = vld [vmem:[%s2674_s0 + $0x58] sm:$0xff] }
 0x154   :  { %v817_v9 = vsub.f32 0.0, %v785_v61  ;;  %v739_v32 = vsub.f32 %v2337_v30, %v707_v21  ;;  %v928_v7 = vmul.f32 %v1716_v53, %v896_v13  ;;  %v755_v48 = vsub.f32 %v691_v17, %v723_v63  ;;  %v911_v30 = vld [vmem:[%s2674_s0 + $0xc0] sm:$0xff] }
 0x155   :  { %v2475_v37 = vpop.eup %1717  ;;  %v772_v34 = vmax.f32 %v740_v8, 0.0  ;;  %v742_v41 = vsub.f32 %v2412_v54, %v710_v28  ;;  %1727 = vpow2.f32 %v877_v19  ;;  %v788_v52 = vmax.f32 %v756_v11, 0.0  ;;  %v897_v8 = vld [vmem:[%s2674_s0 + $0x50] sm:$0xff] }
 0x156   :  { %v875_v31 = vmul.f32 1.442695, %v817_v9  ;;  %v771_v49 = vmax.f32 %v739_v32, 0.0  ;;  %v2482_v36 = vmul.f32 %v2475_v37, %v912_v62  ;;  %v787_v29 = vmax.f32 %v755_v48, 0.0 }
 0x157   :  { %v804_v45 = vsub.f32 0.0, %v772_v34  ;;  %v774_v24 = vmax.f32 %v742_v41, 0.0  ;;  %v1720_v43 = vpop.eup %1719  ;;  %v820_v54 = vsub.f32 0.0, %v788_v52  ;;  %v726_v40 = vmul.f32 2.0, %v2286_v35 }
 0x158   :  { %1729 = vpow2.f32 %v875_v31  ;;  %v803_v44 = vsub.f32 0.0, %v771_v49  ;;  %v2488_v18 = vpop.eup %1721  ;;  %v927_v6 = vmul.f32 %v1720_v43, %v895_v5  ;;  %v1119_v46 = vmul.f32 %v1720_v43, %v1720_v43 }
 0x159   :  { %v849_v33 = vmul.f32 1.442695, %v804_v45  ;;  %v819_v12 = vsub.f32 0.0, %v787_v29  ;;  %v1724_v60 = vpop.eup %1723  ;;  %v2491_v19 = vmul.f32 %v2488_v18, %v911_v30  ;;  %v881_v25 = vmul.f32 1.442695, %v820_v54 }
 0x15a   :  { %v847_v57 = vmul.f32 1.442695, %v803_v44  ;;  %v709_v13 = vmul.f32 2.0, %v2294_v4  ;;  %v1120_v61 = vmul.f32 %v1716_v53, %v1716_v53  ;;  %v1414_v35 = vpack.c.bf16 %v928_v7, %v927_v6 }
 0x15b   :  { %v1150_v21 = vadd.f32 %v2438_v22, %v1119_v46  ;;  %v1192_v63 = vmul.f32 %v927_v6, %v927_v6  ;;  %v1193_v28 = vmul.f32 %v928_v7, %v928_v7  ;;  %v1454_v17 = vpack.c.bf16 %v2482_v36, %v2491_v19 }
 0x15c   :  { %1731 = vpow2.f32 %v849_v33  ;;  %v879_v62 = vmul.f32 1.442695, %v819_v12  ;;  %1474 = vst [vmem:[%s2677_s3 + $0x20] sm:$0xff] %v1414_v35   ;;  %v930_v53 = vmul.f32 %v1724_v60, %v898_v56  ;;  %v806_v11 = vsub.f32 0.0, %v774_v24  ;;  %v900_v33 = vld [vmem:[%s2674_s0 + $0x68] sm:$0xff]  ;;  %v899_v35 = vld [vmem:[%s2674_s0 + $0x60] sm:$0xff] }
 0x15d   :  { %v1223_v4 = vadd.f32 %v2446_v55, %v1192_v63  ;;  %v1151_v9 = vadd.f32 %v1150_v21, %v1120_v61  ;;  %1733 = vpow2.f32 %v881_v25  ;;  %v1726_v22 = vpop.eup %1725  ;;  %1482 = vst [vmem:[%s2677_s3 + $0x60] sm:$0xff] %v1454_v17   ;;  %v758_v32 = vsub.f32 %v2468_v3, %v726_v40  ;;  %v913_v3 = vld [vmem:[%s2674_s0 + $0xd0] sm:$0xff]  ;;  %v914_v40 = vld [vmem:[%s2674_s0 + $0xd8] sm:$0xff]  ;;  %v915_v17 = vld [vmem:[%s2674_s0 + $0xe0] sm:$0xff] }
 0x15e   :  { %1735 = vpow2.f32 %v847_v57  ;;  %v741_v7 = vsub.f32 %v2406_v15, %v709_v13  ;;  %v929_v34 = vmul.f32 %v1726_v22, %v897_v8  ;;  %v1121_v48 = vmul.f32 %v1726_v22, %v1726_v22  ;;  %v916_v57 = vld [vmem:[%s2674_s0 + $0xe8] sm:$0xff] }
 0x15f   :  { %v1224_v41 = vadd.f32 %v1223_v4, %v1193_v28  ;;  %1737 = vpow2.f32 %v879_v62  ;;  %v2512_v5 = vpop.eup %1727  ;;  %v853_v55 = vmul.f32 1.442695, %v806_v11  ;;  %v790_v31 = vmax.f32 %v758_v32, 0.0 }
 0x160   :  { %v773_v52 = vmax.f32 %v741_v7, 0.0  ;;  %v725_v49 = vmul.f32 2.0, %v2296_v20  ;;  %v1122_v30 = vmul.f32 %v1724_v60, %v1724_v60  ;;  %v1419_v45 = vpack.c.bf16 %v930_v53, %v929_v34 }
 0x161   :  { %v1152_v29 = vadd.f32 %v1151_v9, %v1121_v48  ;;  %v1194_v43 = vmul.f32 %v929_v34, %v929_v34  ;;  %v822_v24 = vsub.f32 0.0, %v790_v31  ;;  %v1195_v6 = vmul.f32 %v930_v53, %v930_v53 }
 0x162   :  { %v2518_v15 = vpop.eup %1729  ;;  %v805_v54 = vsub.f32 0.0, %v773_v52  ;;  %v757_v44 = vsub.f32 %v2465_v27, %v725_v49  ;;  %1475 = vst [vmem:[%s2677_s3 + $0x28] sm:$0xff] %v1419_v45   ;;  %1739 = vpow2.f32 %v853_v55  ;;  %v2537_v13 = vmul.f32 %v2512_v5, %v914_v40 }
 0x163   :  { %v1225_v20 = vadd.f32 %v1224_v41, %v1194_v43  ;;  %v1153_v46 = vadd.f32 %v1152_v29, %v1122_v30  ;;  %v885_v12 = vmul.f32 1.442695, %v822_v24  ;;  %v2531_v27 = vmul.f32 %v2518_v15, %v913_v3  ;;  %v902_v30 = vld [vmem:[%s2674_s0 + $0x78] sm:$0xff]  ;;  %v901_v29 = vld [vmem:[%s2674_s0 + $0x70] sm:$0xff] }
 0x164   :  { %v851_v60 = vmul.f32 1.442695, %v805_v54  ;;  %v789_v56 = vmax.f32 %v757_v44, 0.0  ;;  %v918_v54 = vld [vmem:[%s2674_s0 + $0xf8] sm:$0xff] }
 0x165   :  { %v1226_v25 = vadd.f32 %v1225_v20, %v1195_v6  ;;  %1741 = vpow2.f32 %v885_v12  ;;  %v1459_v8 = vpack.c.bf16 %v2537_v13, %v2531_v27  ;;  %v917_v20 = vld [vmem:[%s2674_s0 + $0xf0] sm:$0xff] }
 0x166   :  { %v1732_v61 = vpop.eup %1731  ;;  %v821_v21 = vsub.f32 0.0, %v789_v56  ;;  %1743 = vpow2.f32 %v851_v60 }
 0x167   :  { %v2542_v63 = vpop.eup %1733  ;;  %v932_v28 = vmul.f32 %v1732_v61, %v900_v33  ;;  %1483 = vst [vmem:[%s2677_s3 + $0x68] sm:$0xff] %v1459_v8   ;;  %v1124_v7 = vmul.f32 %v1732_v61, %v1732_v61  ;;  %v1127_v61 = vmul.f32 %v2298_v50, %v2298_v50  ;;  %v1128_v8 = vmul.f32 %v2275_v26, %v2275_v26 }
 0x168   :  { %v1736_v62 = vpop.eup %1735  ;;  %v883_v4 = vmul.f32 1.442695, %v821_v21  ;;  %v2550_v53 = vmul.f32 %v2542_v63, %v916_v57  ;;  %v1201_v50 = vmul.f32 %v2289_v38, %v2289_v38  ;;  %v1130_v26 = vmul.f32 %v2313_v0, %v2313_v0 }
 0x169   :  { %v2552_v9 = vpop.eup %1737  ;;  %v931_v22 = vmul.f32 %v1736_v62, %v899_v35  ;;  %v1123_v11 = vmul.f32 %v1736_v62, %v1736_v62  ;;  %v1197_v52 = vmul.f32 %v932_v28, %v932_v28  ;;  %v1200_v62 = vmul.f32 %v2308_v59, %v2308_v59 }
 0x16a   :  { %1745 = vpow2.f32 %v883_v4  ;;  %v2558_v32 = vmul.f32 %v2552_v9, %v915_v17  ;;  %v1202_v59 = vmul.f32 %v2347_v10, %v2347_v10  ;;  %v1205_v10 = vmul.f32 %v2377_v23, %v2377_v23 }
 0x16b   :  { %v1424_v34 = vpack.c.bf16 %v932_v28, %v931_v22  ;;  %v1154_v48 = vadd.f32 %v1153_v46, %v1123_v11  ;;  %v1196_v41 = vmul.f32 %v931_v22, %v931_v22  ;;  %v1129_v11 = vmul.f32 %v2327_v16, %v2327_v16 }
 0x16c   :  { %v1464_v55 = vpack.c.bf16 %v2550_v53, %v2558_v32  ;;  %v1740_v31 = vpop.eup %1739  ;;  %v1132_v16 = vmul.f32 %v2365_v1, %v2365_v1 }
 0x16d   :  { %1476 = vst [vmem:[%s2677_s3 + $0x30] sm:$0xff] %v1424_v34   ;;  %v1227_v49 = vadd.f32 %v1226_v25, %v1196_v41  ;;  %v1155_v45 = vadd.f32 %v1154_v48, %v1124_v7  ;;  %v934_v24 = vmul.f32 %v1740_v31, %v902_v30  ;;  %v1126_v12 = vmul.f32 %v1740_v31, %v1740_v31 }
 0x16e   :  { %1484 = vst [vmem:[%s2677_s3 + $0x70] sm:$0xff] %v1464_v55   ;;  %v1203_v55 = vmul.f32 %v2325_v14, %v2325_v14  ;;  %v1131_v31 = vmul.f32 %v2379_v47, %v2379_v47  ;;  %v1134_v47 = vmul.f32 %v2421_v2, %v2421_v2  ;;  %v1208_v2 = vmul.f32 %v2491_v19, %v2491_v19 }
 0x16f   :  { %v1228_v43 = vadd.f32 %v1227_v49, %v1197_v52  ;;  %v2574_v3 = vpop.eup %1741  ;;  %v1199_v35 = vmul.f32 %v934_v24, %v934_v24  ;;  %v1204_v49 = vmul.f32 %v2386_v58, %v2386_v58  ;;  %v1207_v58 = vmul.f32 %v2431_v42, %v2431_v42 }
 0x170   :  { %v1744_v44 = vpop.eup %1743  ;;  %v2583_v46 = vmul.f32 %v2574_v3, %v918_v54  ;;  %v1135_v54 = vmul.f32 %v2488_v18, %v2488_v18  ;;  %v1209_v42 = vmul.f32 %v2482_v36, %v2482_v36  ;;  %v1138_v18 = vmul.f32 %v2512_v5, %v2512_v5 }
 0x171   :  { %v933_v40 = vmul.f32 %v1744_v44, %v901_v29  ;;  %v1125_v6 = vmul.f32 %v1744_v44, %v1744_v44  ;;  %v1139_v19 = vmul.f32 %v2552_v9, %v2552_v9  ;;  %v1140_v36 = vmul.f32 %v2542_v63, %v2542_v63 }
 0x172   :  { %v1212_v5 = vmul.f32 %v2558_v32, %v2558_v32  ;;  %v1213_v9 = vmul.f32 %v2550_v53, %v2550_v53  ;;  %v1215_v32 = vmul.f32 %v2583_v46, %v2583_v46 }
 0x173   :  { %v1429_v60 = vpack.c.bf16 %v934_v24, %v933_v40  ;;  %v1156_v56 = vadd.f32 %v1155_v45, %v1125_v6  ;;  %v1198_v25 = vmul.f32 %v933_v40, %v933_v40  ;;  %v1133_v45 = vmul.f32 %v2433_v51, %v2433_v51 }
 0x174   :  { %v2585_v33 = vpop.eup %1745  ;;  %v1136_v51 = vmul.f32 %v2475_v37, %v2475_v37  ;;  %v1210_v37 = vmul.f32 %v2531_v27, %v2531_v27 }
 0x175   :  { %v2588_v57 = vmul.f32 %v2585_v33, %v917_v20  ;;  %1477 = vst [vmem:[%s2677_s3 + $0x38] sm:$0xff] %v1429_v60   ;;  %v1157_v21 = vadd.f32 %v1156_v56, %v1126_v12  ;;  %v1229_v28 = vadd.f32 %v1228_v43, %v1198_v25  ;;  %v1206_v43 = vmul.f32 %v2443_v39, %v2443_v39 }
 0x176   :  { %v1137_v39 = vmul.f32 %v2518_v15, %v2518_v15  ;;  %v1211_v15 = vmul.f32 %v2537_v13, %v2537_v13  ;;  %v1141_v27 = vmul.f32 %v2585_v33, %v2585_v33  ;;  %v1142_v13 = vmul.f32 %v2574_v3, %v2574_v3 }
 0x177   :  { %v1469_v17 = vpack.c.bf16 %v2583_v46, %v2588_v57  ;;  %v1158_v4 = vadd.f32 %v1157_v21, %v1127_v61  ;;  %v1230_v22 = vadd.f32 %v1229_v28, %v1199_v35  ;;  %v1214_v63 = vmul.f32 %v2588_v57, %v2588_v57 }
 0x179   :  { %1485 = vst [vmem:[%s2677_s3 + $0x78] sm:$0xff] %v1469_v17   ;;  %v1159_v7 = vadd.f32 %v1158_v4, %v1128_v8  ;;  %v1231_v34 = vadd.f32 %v1230_v22, %v1200_v62 }
 0x17b   :  { %v1160_v48 = vadd.f32 %v1159_v7, %v1129_v11  ;;  %v1232_v41 = vadd.f32 %v1231_v34, %v1201_v50 }
 0x17d   :  { %v1233_v38 = vadd.f32 %v1232_v41, %v1202_v59  ;;  %v1161_v52 = vadd.f32 %v1160_v48, %v1130_v26 }
 0x17f   :  { %v1162_v0 = vadd.f32 %v1161_v52, %v1131_v31  ;;  %v1234_v30 = vadd.f32 %v1233_v38, %v1203_v55 }
 0x181   :  { %v1163_v14 = vadd.f32 %v1162_v0, %v1132_v16  ;;  %v1235_v29 = vadd.f32 %v1234_v30, %v1204_v49 }
 0x183   :  { %v1164_v1 = vadd.f32 %v1163_v14, %v1133_v45  ;;  %v1236_v24 = vadd.f32 %v1235_v29, %v1205_v10 }
 0x185   :  { %v1165_v23 = vadd.f32 %v1164_v1, %v1134_v47  ;;  %v1237_v44 = vadd.f32 %v1236_v24, %v1206_v43 }
 0x187   :  { %v1166_v40 = vadd.f32 %v1165_v23, %v1135_v54  ;;  %v1238_v6 = vadd.f32 %v1237_v44, %v1207_v58 }
 0x189   :  { %v1167_v20 = vadd.f32 %v1166_v40, %v1136_v51  ;;  %v1239_v12 = vadd.f32 %v1238_v6, %v1208_v2 }
 0x18b   :  { %v1168_v60 = vadd.f32 %v1167_v20, %v1137_v39  ;;  %v1240_v56 = vadd.f32 %v1239_v12, %v1209_v42 }
 0x18d   :  { %v1169_v25 = vadd.f32 %v1168_v60, %v1138_v18  ;;  %v1241_v61 = vadd.f32 %v1240_v56, %v1210_v37 }
 0x18f   :  { %v1170_v35 = vadd.f32 %v1169_v25, %v1139_v19  ;;  %v1242_v21 = vadd.f32 %v1241_v61, %v1211_v15 }
 0x191   :  { %v1171_v28 = vadd.f32 %v1170_v35, %v1140_v36  ;;  %v1243_v17 = vadd.f32 %v1242_v21, %v1212_v5 }
 0x193   :  { %v1172_v8 = vadd.f32 %v1171_v28, %v1141_v27  ;;  %v1244_v62 = vadd.f32 %v1243_v17, %v1213_v9 }
 0x195   :  { %v1173_v4 = vadd.f32 %v1172_v8, %v1142_v13  ;;  %v1245_v22 = vadd.f32 %v1244_v62, %v1214_v63 }
 0x197   :  { %1174 = vadd.xlane.f32.xlu0 %v1173_v4  ;;  %v1246_v33 = vadd.f32 %v1245_v22, %v1215_v32 }
 0x19b   :  { %1247 = vadd.xlane.f32.xlu0 %v1246_v33 }
 0x224   :  { %v1175_v50 = vpop.xlane.xlu0 %1174 }
 0x225   :  { %v1176_v11 = vrot.slane %v1175_v50, 4 }
 0x227   :  { %v1177_v53 = vadd.f32 %v1176_v11, %v1175_v50 }
 0x228   :  { %v1248_v7 = vpop.xlane.xlu0 %1247 }
 0x229   :  { %v1178_v34 = vrot.slane %v1177_v53, 2  ;;  %v1249_v26 = vrot.slane %v1248_v7, 4 }
 0x22b   :  { %v1250_v3 = vadd.f32 %v1249_v26, %v1248_v7  ;;  %v1179_v59 = vadd.f32 %v1178_v34, %v1177_v53 }
 0x22d   :  { %v1251_v48 = vrot.slane %v1250_v3, 2  ;;  %v1180_v41 = vrot.slane %v1179_v59, 1 }
 0x22f   :  { %v1252_v57 = vadd.f32 %v1251_v48, %v1250_v3  ;;  %v1181_v55 = vadd.f32 %v1180_v41, %v1179_v59 }
 0x231   :  { %1678 = vpush %v1181_v55  ;;  %v1253_v31 = vrot.slane %v1252_v57, 1 }
 0x233   :  { %v1254_v38 = vadd.f32 %v1253_v31, %v1252_v57 }
 0x235   :  { %1680 = vpush %v1254_v38 }
 0x262   :  { %s1679_s3 = spop %1678 }
 0x263   :  { %s1183_s14 = smul.f32 3.0517578e-05, %s1679_s3 }
 0x265   :  { %s1257_s17 = smul.f32 0.013, %s1183_s14 }
 0x266   :  { %s1681_s15 = spop %1680 }
 0x267   :  { %s1256_s16 = smul.f32 3.0517578e-05, %s1681_s15 }
 0x269   :  { %s1258_s18 = smul.f32 60.0, %s1256_s16 }
 0x26b   :  { %s1259_s19 = sadd.f32 %s1258_s18, %s1257_s17 }
 0x26d   :  { %1261 = sst [smem:[#allocation2]] %s1259_s19 }
 0x26e   :  { %1756 = shalt.err (!%p1753_p2)
}
 0x26f   :  { %s1759_s26 = smov [#allocation2]  }
 0x270   :  { %1271 = dma.smem_to_hbm %s1759_s26, 16, %s2678_s4, [#allocation3]  }
 0x271   :  { %1757 = dma.done.wait [#allocation3], 16  }
 0x272   :  { %1758 = vsyncadd [#allocation3], 4294967280 }
 0x273   :  { %1277 = sfence }
 0x274   :  { %1278 = vsyncpa [#allocation3], 1 }

// kernel: kernel_net_autoencoder_forward.3
= control target key start
LH: loop header
LB: loop body
LE: loop exit
PB: predicated region body
PF: predicated region fallthrough
CT: control target
= control target key end

     0   :  { %vm81_vm0 = vcmask 64512   ;;  %s2197_s0 = inlined_call_operand.vmem [shape: f32[128,256], index: 0, kind: input, shape index: {}]   ;;  %s2198_s1 = inlined_call_operand.vmem [shape: f32[128,8], index: 1, kind: input, shape index: {}]   ;;  %s2199_s2 = inlined_call_operand.vmem [shape: f32[256,8], index: 2, kind: input, shape index: {}]   ;;  %s2200_s3 = inlined_call_operand.vmem [shape: bf16[128,256], index: 3, kind: output, shape index: {0}]   ;;  %s2201_s4 = inlined_call_operand.hbm [shape: f32[1], index: 4, kind: output, shape index: {1}]  }
   0x1   :  { %v49_v0 = vld [vmem:[%s2199_s2 + $0x80] sm:$0xff]  ;;  %v50_v1 = vld [vmem:[%s2199_s2 + $0x88] sm:$0xff]  ;;  %vm1529_vm1 = vmpackc.low %vm81_vm0, %vm81_vm0 }
   0x2   :  { %v33_v2 = vld [vmem:[%s2199_s2] sm:$0xff]  ;;  %v1347_v3 = vpack.c.bf16 %v50_v1, %v49_v0  ;;  %v34_v5 = vld [vmem:[%s2199_s2 + $0x8] sm:$0xff]  ;;  %v51_v7 = vld [vmem:[%s2199_s2 + $0x90] sm:$0xff]  ;;  %v146_v10 = vmul.f32 %v49_v0, %v49_v0  ;;  %v147_v12 = vmul.f32 %v50_v1, %v50_v1 }
   0x3   :  { %v130_v6 = vmul.f32 %v33_v2, %v33_v2  ;;  %v1350_v8 = vpack.c.bf16 %v34_v5, %v33_v2  ;;  %v131_v9 = vmul.f32 %v34_v5, %v34_v5  ;;  %v52_v11 = vld [vmem:[%s2199_s2 + $0x98] sm:$0xff]  ;;  %v35_v15 = vld [vmem:[%s2199_s2 + $0x10] sm:$0xff]  ;;  %v148_v18 = vmul.f32 %v51_v7, %v51_v7  ;;  %v53_v22 = vld [vmem:[%s2199_s2 + $0xa0] sm:$0xff] }
   0x4   :  { %1349 = vmatprep.subr.msk.bf16.mxu0 %vm1529_vm1, %v1347_v3  ;;  %1395 = vmatprep.subr.msk.bf16.mxu1 %vm1529_vm1, %v1347_v3  ;;  %v1353_v14 = vpack.c.bf16 %v52_v11, %v51_v7  ;;  %v36_v17 = vld [vmem:[%s2199_s2 + $0x18] sm:$0xff]  ;;  %v210_v19 = vsel %vm81_vm0, %v146_v10, 0.0  ;;  %v213_v20 = vsel %vm81_vm0, %v147_v12, 0.0  ;;  %v132_v21 = vmul.f32 %v35_v15, %v35_v15  ;;  %v54_v23 = vld [vmem:[%s2199_s2 + $0xa8] sm:$0xff]  ;;  %v37_v30 = vld [vmem:[%s2199_s2 + $0x20] sm:$0xff] }
   0x5   :  { %v162_v13 = vsel %vm81_vm0, %v130_v6, 0.0  ;;  %1352 = vmatpush3.bf16.xpose.msk.msra.mxu0 %vm1529_vm1, %v1350_v8  ;;  %1403 = vmatpush3.bf16.xpose.msk.msra.mxu1 %vm1529_vm1, %v1350_v8  ;;  %v165_v16 = vsel %vm81_vm0, %v131_v9, 0.0  ;;  %v1356_v24 = vpack.c.bf16 %v36_v17, %v35_v15  ;;  %v216_v25 = vsel %vm81_vm0, %v148_v18, 0.0  ;;  %v1582_v31 = vld [vmem:[%s2198_s1] sm:$0xff]  ;;  %v38_v33 = vld [vmem:[%s2199_s2 + $0x28] sm:$0xff] }
   0x6   :  { %163 = vadd.xlane.f32.xlu0 %v162_v13  ;;  %166 = vadd.xlane.f32.xlu1 %v165_v16  ;;  %v168_v26 = vsel %vm81_vm0, %v132_v21, 0.0  ;;  %v133_v27 = vmul.f32 %v36_v17, %v36_v17  ;;  %v1359_v28 = vpack.c.bf16 %v54_v23, %v53_v22  ;;  %v149_v29 = vmul.f32 %v52_v11, %v52_v11  ;;  %v1587_v32 = vld [vmem:[%s2198_s1 + $0x40] sm:$0xff] }
   0x7   :  { %1355 = vmatprep.subr.msk.bf16.mxu0 %vm1529_vm1, %v1353_v14  ;;  %1396 = vmatprep.subr.msk.bf16.mxu1 %vm1529_vm1, %v1353_v14  ;;  %v134_v36 = vmul.f32 %v37_v30, %v37_v30  ;;  %v150_v37 = vmul.f32 %v53_v22, %v53_v22 }
   0x8   :  { %v171_v34 = vsel %vm81_vm0, %v133_v27, 0.0  ;;  %v219_v35 = vsel %vm81_vm0, %v149_v29, 0.0 }
   0xa   :  { %211 = vadd.xlane.f32.xlu0 %v210_v19  ;;  %214 = vadd.xlane.f32.xlu1 %v213_v20 }
   0xd   :  { %1358 = vmatpush3.bf16.xpose.msk.msra.mxu0 %vm1529_vm1, %v1356_v24  ;;  %1404 = vmatpush3.bf16.xpose.msk.msra.mxu1 %vm1529_vm1, %v1356_v24 }
   0xe   :  { %169 = vadd.xlane.f32.xlu0 %v168_v26  ;;  %217 = vadd.xlane.f32.xlu1 %v216_v25 }
   0xf   :  { %1361 = vmatprep.subr.msk.bf16.mxu0 %vm1529_vm1, %v1359_v28  ;;  %1397 = vmatprep.subr.msk.bf16.mxu1 %vm1529_vm1, %v1359_v28 }
  0x10   :  { %10 = vsyncpa [#allocation3], 0  ;;  %v55_v38 = vld [vmem:[%s2199_s2 + $0xb0] sm:$0xff]  ;;  %v56_v39 = vld [vmem:[%s2199_s2 + $0xb8] sm:$0xff]  ;;  %1315 = vmatprep.mubr.msk.f32.mxu0 %vm81_vm0, %v1582_v31  ;;  %1331 = vmatprep.mubr.msk.f32.mxu1 %vm81_vm0, %v1587_v32  ;;  %v1362_v40 = vpack.c.bf16 %v38_v33, %v37_v30  ;;  %v135_v41 = vmul.f32 %v38_v33, %v38_v33  ;;  %v174_v42 = vsel %vm81_vm0, %v134_v36, 0.0  ;;  %v222_v43 = vsel %vm81_vm0, %v150_v37, 0.0 }
  0x11   :  { %v1365_v44 = vpack.c.bf16 %v56_v39, %v55_v38  ;;  %v151_v45 = vmul.f32 %v54_v23, %v54_v23  ;;  %v39_v46 = vld [vmem:[%s2199_s2 + $0x30] sm:$0xff]  ;;  %v40_v47 = vld [vmem:[%s2199_s2 + $0x38] sm:$0xff]  ;;  %v152_v51 = vmul.f32 %v55_v38, %v55_v38  ;;  %v57_v52 = vld [vmem:[%s2199_s2 + $0xc0] sm:$0xff]  ;;  %v153_v59 = vmul.f32 %v56_v39, %v56_v39  ;;  %s1480_s23 = scalar_lea.hbm %s2201_s4, 16 }
  0x12   :  { %172 = vadd.xlane.f32.xlu0 %v171_v34  ;;  %220 = vadd.xlane.f32.xlu1 %v219_v35  ;;  %v177_v48 = vsel %vm81_vm0, %v135_v41, 0.0  ;;  %v136_v50 = vmul.f32 %v39_v46, %v39_v46  ;;  %v58_v53 = vld [vmem:[%s2199_s2 + $0xc8] sm:$0xff]  ;;  %v1368_v54 = vpack.c.bf16 %v40_v47, %v39_v46  ;;  %v137_v55 = vmul.f32 %v40_v47, %v40_v47  ;;  %v41_v60 = vld [vmem:[%s2199_s2 + $0x40] sm:$0xff]  ;;  %v59_v2 = vld [vmem:[%s2199_s2 + $0xd0] sm:$0xff]  ;;  %p1481_p0 = scmp.ne.s32.totalorder %s2201_s4, %s1480_s23  ;;  %p1484_p1 = scmp.lt.u32.totalorder %s1480_s23, %s2201_s4 }
  0x13   :  { %v225_v49 = vsel %vm81_vm0, %v151_v45, 0.0  ;;  %v228_v57 = vsel %vm81_vm0, %v152_v51, 0.0  ;;  %v1371_v58 = vpack.c.bf16 %v58_v53, %v57_v52  ;;  %v42_v61 = vld [vmem:[%s2199_s2 + $0x48] sm:$0xff]  ;;  %v231_v63 = vsel %vm81_vm0, %v153_v59, 0.0  ;;  %v60_v3 = vld [vmem:[%s2199_s2 + $0xd8] sm:$0xff]  ;;  %v43_v11 = vld [vmem:[%s2199_s2 + $0x50] sm:$0xff] }
  0x14   :  { %v180_v56 = vsel %vm81_vm0, %v136_v50, 0.0  ;;  %v183_v62 = vsel %vm81_vm0, %v137_v55, 0.0  ;;  %v138_v0 = vmul.f32 %v41_v60, %v41_v60  ;;  %v154_v1 = vmul.f32 %v57_v52, %v57_v52  ;;  %v44_v12 = vld [vmem:[%s2199_s2 + $0x58] sm:$0xff]  ;;  %v61_v17 = vld [vmem:[%s2199_s2 + $0xe0] sm:$0xff]  ;;  %v62_v18 = vld [vmem:[%s2199_s2 + $0xe8] sm:$0xff]  ;;  %p1486_p2 = pnand %p1484_p1, %p1481_p0 }
  0x15   :  { %1364 = vmatpush3.bf16.xpose.msk.msra.mxu0 %vm1529_vm1, %v1362_v40  ;;  %1405 = vmatpush3.bf16.xpose.msk.msra.mxu1 %vm1529_vm1, %v1362_v40  ;;  %v1374_v5 = vpack.c.bf16 %v42_v61, %v41_v60  ;;  %v139_v6 = vmul.f32 %v42_v61, %v42_v61  ;;  %v1377_v9 = vpack.c.bf16 %v60_v3, %v59_v2  ;;  %v45_v25 = vld [vmem:[%s2199_s2 + $0x60] sm:$0xff]  ;;  %v46_v26 = vld [vmem:[%s2199_s2 + $0x68] sm:$0xff]  ;;  %v63_v33 = vld [vmem:[%s2199_s2 + $0xf0] sm:$0xff] }
  0x16   :  { %175 = vadd.xlane.f32.xlu0 %v174_v42  ;;  %223 = vadd.xlane.f32.xlu1 %v222_v43  ;;  %v186_v7 = vsel %vm81_vm0, %v138_v0, 0.0  ;;  %v234_v8 = vsel %vm81_vm0, %v154_v1, 0.0  ;;  %v155_v10 = vmul.f32 %v58_v53, %v58_v53  ;;  %v140_v15 = vmul.f32 %v43_v11, %v43_v11  ;;  %v64_v34 = vld [vmem:[%s2199_s2 + $0xf8] sm:$0xff]  ;;  %v47_v41 = vld [vmem:[%s2199_s2 + $0x70] sm:$0xff]  ;;  %v18_v52 = vld [vmem:[%s2198_s1 + $0x8] sm:$0xff] }
  0x17   :  { %1367 = vmatprep.subr.msk.bf16.mxu0 %vm1529_vm1, %v1365_v44  ;;  %1398 = vmatprep.subr.msk.bf16.mxu1 %vm1529_vm1, %v1365_v44  ;;  %v189_v13 = vsel %vm81_vm0, %v139_v6, 0.0  ;;  %v156_v16 = vmul.f32 %v59_v2, %v59_v2  ;;  %v1380_v19 = vpack.c.bf16 %v44_v12, %v43_v11  ;;  %v141_v20 = vmul.f32 %v44_v12, %v44_v12  ;;  %v48_v42 = vld [vmem:[%s2199_s2 + $0x78] sm:$0xff]  ;;  %v26_v4 = vld [vmem:[%s2198_s1 + $0x48] sm:$0xff] }
  0x18   :  { %v237_v14 = vsel %vm81_vm0, %v155_v10, 0.0  ;;  %v192_v21 = vsel %vm81_vm0, %v140_v15, 0.0  ;;  %v1383_v23 = vpack.c.bf16 %v62_v18, %v61_v17  ;;  %v157_v24 = vmul.f32 %v60_v3, %v60_v3  ;;  %v22_v0 = vld [vmem:[%s2198_s1 + $0x28] sm:$0xff]  ;;  %v24_v6 = vld [vmem:[%s2198_s1 + $0x38] sm:$0xff] }
  0x19   :  { %v240_v22 = vsel %vm81_vm0, %v156_v16, 0.0  ;;  %v195_v27 = vsel %vm81_vm0, %v141_v20, 0.0  ;;  %v142_v29 = vmul.f32 %v45_v25, %v45_v25  ;;  %v158_v30 = vmul.f32 %v61_v17, %v61_v17  ;;  %v1820_v20 = vld [vmem:[%s2198_s1 + $0x70] sm:$0xff] }
  0x1a   :  { %178 = vadd.xlane.f32.xlu0 %v177_v48  ;;  %226 = vadd.xlane.f32.xlu1 %v225_v49  ;;  %v243_v28 = vsel %vm81_vm0, %v157_v24, 0.0  ;;  %v1386_v35 = vpack.c.bf16 %v46_v26, %v45_v25  ;;  %v143_v36 = vmul.f32 %v46_v26, %v46_v26  ;;  %v1389_v39 = vpack.c.bf16 %v64_v34, %v63_v33 }
  0x1b   :  { %v198_v37 = vsel %vm81_vm0, %v142_v29, 0.0  ;;  %v246_v38 = vsel %vm81_vm0, %v158_v30, 0.0  ;;  %v159_v40 = vmul.f32 %v62_v18, %v62_v18  ;;  %v144_v45 = vmul.f32 %v47_v41, %v47_v41  ;;  %v1807_v18 = vld [vmem:[%s2198_s1 + $0x68] sm:$0xff] }
  0x1c   :  { %v201_v43 = vsel %vm81_vm0, %v143_v36, 0.0  ;;  %v160_v46 = vmul.f32 %v63_v33, %v63_v33  ;;  %v1392_v47 = vpack.c.bf16 %v48_v42, %v47_v41  ;;  %v145_v50 = vmul.f32 %v48_v42, %v48_v42 }
  0x1d   :  { %1370 = vmatpush3.bf16.xpose.msk.msra.mxu0 %vm1529_vm1, %v1368_v54  ;;  %1406 = vmatpush3.bf16.xpose.msk.msra.mxu1 %vm1529_vm1, %v1368_v54  ;;  %v249_v44 = vsel %vm81_vm0, %v159_v40, 0.0  ;;  %v204_v48 = vsel %vm81_vm0, %v144_v45, 0.0  ;;  %v161_v51 = vmul.f32 %v64_v34, %v64_v34  ;;  %v66_v55 = vmul.f32 %v18_v52, %v18_v52 }
  0x1e   :  { %181 = vadd.xlane.f32.xlu0 %v180_v56  ;;  %229 = vadd.xlane.f32.xlu1 %v228_v57  ;;  %v252_v49 = vsel %vm81_vm0, %v160_v46, 0.0  ;;  %v207_v53 = vsel %vm81_vm0, %v145_v50, 0.0  ;;  %v65_v56 = vmul.f32 %v1582_v31, %v1582_v31  ;;  %v19_v57 = vld [vmem:[%s2198_s1 + $0x10] sm:$0xff]  ;;  %v70_v3 = vmul.f32 %v22_v0, %v22_v0 }
  0x1f   :  { %1373 = vmatprep.subr.msk.bf16.mxu0 %vm1529_vm1, %v1371_v58  ;;  %1399 = vmatprep.subr.msk.bf16.mxu1 %vm1529_vm1, %v1371_v58  ;;  %v255_v54 = vsel %vm81_vm0, %v161_v51, 0.0  ;;  %v20_v58 = vld [vmem:[%s2198_s1 + $0x18] sm:$0xff]  ;;  %v85_v59 = vsel %vm81_vm0, %v66_v55, 0.0  ;;  %v72_v11 = vmul.f32 %v24_v6, %v24_v6  ;;  %v74_v16 = vmul.f32 %v26_v4, %v26_v4 }
  0x20   :  { %v82_v60 = vsel %vm81_vm0, %v65_v56, 0.0  ;;  %v68_v61 = vmul.f32 %v20_v58, %v20_v58  ;;  %v73_v17 = vmul.f32 %v1587_v32, %v1587_v32 }
  0x22   :  { %184 = vadd.xlane.f32.xlu0 %v183_v62  ;;  %232 = vadd.xlane.f32.xlu1 %v231_v63  ;;  %v67_v62 = vmul.f32 %v19_v57, %v19_v57  ;;  %v21_v63 = vld [vmem:[%s2198_s1 + $0x20] sm:$0xff]  ;;  %v91_v1 = vsel %vm81_vm0, %v68_v61, 0.0 }
  0x24   :  { %v88_v2 = vsel %vm81_vm0, %v67_v62, 0.0 }
  0x25   :  { %1376 = vmatpush3.bf16.xpose.msk.msra.mxu0 %vm1529_vm1, %v1374_v5  ;;  %1407 = vmatpush3.bf16.xpose.msk.msra.mxu1 %vm1529_vm1, %v1374_v5  ;;  %v69_v5 = vmul.f32 %v21_v63, %v21_v63 }
  0x26   :  { %187 = vadd.xlane.f32.xlu0 %v186_v7  ;;  %235 = vadd.xlane.f32.xlu1 %v234_v8  ;;  %v23_v7 = vld [vmem:[%s2198_s1 + $0x30] sm:$0xff]  ;;  %v1779_v8 = vld [vmem:[%s2198_s1 + $0x58] sm:$0xff] }
  0x27   :  { %1379 = vmatprep.subr.msk.bf16.mxu0 %vm1529_vm1, %v1377_v9  ;;  %1400 = vmatprep.subr.msk.bf16.mxu1 %vm1529_vm1, %v1377_v9  ;;  %v97_v9 = vsel %vm81_vm0, %v70_v3, 0.0  ;;  %v94_v10 = vsel %vm81_vm0, %v69_v5, 0.0  ;;  %v71_v12 = vmul.f32 %v23_v7, %v23_v7  ;;  %v76_v56 = vmul.f32 %v1779_v8, %v1779_v8 }
  0x29   :  { %v100_v15 = vsel %vm81_vm0, %v71_v12, 0.0 }
  0x2a   :  { %190 = vadd.xlane.f32.xlu0 %v189_v13  ;;  %238 = vadd.xlane.f32.xlu1 %v237_v14  ;;  %v1792_v13 = vld [vmem:[%s2198_s1 + $0x60] sm:$0xff]  ;;  %v103_v14 = vsel %vm81_vm0, %v72_v11, 0.0 }
  0x2b   :  { %v77_v61 = vmul.f32 %v1792_v13, %v1792_v13 }
  0x2d   :  { %1382 = vmatpush3.bf16.xpose.msk.msra.mxu0 %vm1529_vm1, %v1380_v19  ;;  %1408 = vmatpush3.bf16.xpose.msk.msra.mxu1 %vm1529_vm1, %v1380_v19  ;;  %v109_v19 = vsel %vm81_vm0, %v74_v16, 0.0 }
  0x2e   :  { %193 = vadd.xlane.f32.xlu0 %v192_v21  ;;  %241 = vadd.xlane.f32.xlu1 %v240_v22  ;;  %v1831_v21 = vld [vmem:[%s2198_s1 + $0x78] sm:$0xff] }
  0x2f   :  { %1385 = vmatprep.subr.msk.bf16.mxu0 %vm1529_vm1, %v1383_v23  ;;  %1401 = vmatprep.subr.msk.bf16.mxu1 %vm1529_vm1, %v1383_v23 }
  0x32   :  { %196 = vadd.xlane.f32.xlu0 %v195_v27  ;;  %244 = vadd.xlane.f32.xlu1 %v243_v28 }
  0x35   :  { %1388 = vmatpush3.bf16.xpose.msk.msra.mxu0 %vm1529_vm1, %v1386_v35  ;;  %1409 = vmatpush3.bf16.xpose.msk.msra.mxu1 %vm1529_vm1, %v1386_v35 }
  0x36   :  { %199 = vadd.xlane.f32.xlu0 %v198_v37  ;;  %247 = vadd.xlane.f32.xlu1 %v246_v38 }
  0x37   :  { %1391 = vmatprep.subr.msk.bf16.mxu0 %vm1529_vm1, %v1389_v39  ;;  %1402 = vmatprep.subr.msk.bf16.mxu1 %vm1529_vm1, %v1389_v39 }
  0x3a   :  { %202 = vadd.xlane.f32.xlu0 %v201_v43  ;;  %250 = vadd.xlane.f32.xlu1 %v249_v44 }
  0x3d   :  { %1394 = vmatpush3.bf16.xpose.msk.msra.mxu0 %vm1529_vm1, %v1392_v47  ;;  %1410 = vmatpush3.bf16.xpose.msk.msra.mxu1 %vm1529_vm1, %v1392_v47 }
  0x3e   :  { %205 = vadd.xlane.f32.xlu0 %v204_v48  ;;  %253 = vadd.xlane.f32.xlu1 %v252_v49 }
  0x42   :  { %208 = vadd.xlane.f32.xlu0 %v207_v53  ;;  %256 = vadd.xlane.f32.xlu1 %v255_v54 }
  0x44   :  { %1316 = vmatmul.mubr.msk.f32.vlgmr.msra.gmra.mrb[0].mxu0 %vm81_vm0, %v1582_v31  ;;  %1332 = vmatmul.mubr.msk.f32.vlgmr.msra.gmra.mrb[0].mxu1 %vm81_vm0, %v1587_v32  ;;  %v1761_v31 = vld [vmem:[%s2198_s1 + $0x50] sm:$0xff]  ;;  %v106_v32 = vsel %vm81_vm0, %v73_v17, 0.0 }
  0x45   :  { %1317 = vmatprep.mubr.msk.f32.mxu0 %vm81_vm0, %v18_v52  ;;  %1333 = vmatprep.mubr.msk.f32.mxu1 %vm81_vm0, %v26_v4 }
  0x46   :  { %86 = vadd.xlane.f32.xlu1 %v85_v59  ;;  %83 = vadd.xlane.f32.xlu0 %v82_v60  ;;  %v78_v59 = vmul.f32 %v1807_v18, %v1807_v18 }
  0x48   :  { %1318 = vmatmul.mubr.msk.f32.gmra.mrb[2].mxu0 %vm81_vm0, %v18_v52  ;;  %1334 = vmatmul.mubr.msk.f32.gmra.mrb[2].mxu1 %vm81_vm0, %v26_v4  ;;  %v75_v4 = vmul.f32 %v1761_v31, %v1761_v31 }
  0x49   :  { %1319 = vmatprep.mubr.msk.f32.mxu0 %vm81_vm0, %v19_v57  ;;  %1335 = vmatprep.mubr.msk.f32.mxu1 %vm81_vm0, %v1761_v31 }
  0x4a   :  { %92 = vadd.xlane.f32.xlu1 %v91_v1  ;;  %89 = vadd.xlane.f32.xlu0 %v88_v2  ;;  %v112_v60 = vsel %vm81_vm0, %v75_v4, 0.0  ;;  %v118_v1 = vsel %vm81_vm0, %v77_v61, 0.0  ;;  %v79_v2 = vmul.f32 %v1820_v20, %v1820_v20 }
  0x4c   :  { %1320 = vmatmul.mubr.msk.f32.gmra.mrb[4].mxu0 %vm81_vm0, %v19_v57  ;;  %1336 = vmatmul.mubr.msk.f32.gmra.mrb[4].mxu1 %vm81_vm0, %v1761_v31 }
  0x4d   :  { %1321 = vmatprep.mubr.msk.f32.mxu0 %vm81_vm0, %v20_v58  ;;  %1337 = vmatprep.mubr.msk.f32.mxu1 %vm81_vm0, %v1779_v8 }
  0x4e   :  { %98 = vadd.xlane.f32.xlu1 %v97_v9  ;;  %95 = vadd.xlane.f32.xlu0 %v94_v10  ;;  %v627_v9 = vlaneseq }
  0x50   :  { %1322 = vmatmul.mubr.msk.f32.gmra.mrb[6].mxu0 %vm81_vm0, %v20_v58  ;;  %1338 = vmatmul.mubr.msk.f32.gmra.mrb[6].mxu1 %vm81_vm0, %v1779_v8  ;;  %v115_v58 = vsel %vm81_vm0, %v76_v56, 0.0  ;;  %v628_v11 = vshrl.u32 %v627_v9, 7 }
  0x51   :  { %1323 = vmatprep.mubr.msk.f32.mxu0 %vm81_vm0, %v21_v63  ;;  %1339 = vmatprep.mubr.msk.f32.mxu1 %vm81_vm0, %v1792_v13 }
  0x52   :  { %104 = vadd.xlane.f32.xlu1 %v103_v14  ;;  %101 = vadd.xlane.f32.xlu0 %v100_v15  ;;  %v629_v14 = vsub.s32 0, %v628_v11 }
  0x54   :  { %1324 = vmatmul.mubr.msk.f32.gmra.mrb[8].mxu0 %vm81_vm0, %v21_v63  ;;  %1340 = vmatmul.mubr.msk.f32.gmra.mrb[8].mxu1 %vm81_vm0, %v1792_v13  ;;  %v121_v63 = vsel %vm81_vm0, %v78_v59, 0.0 }
  0x55   :  { %1325 = vmatprep.mubr.msk.f32.mxu0 %vm81_vm0, %v22_v0  ;;  %1341 = vmatprep.mubr.msk.f32.mxu1 %vm81_vm0, %v1807_v18 }
  0x56   :  { %110 = vadd.xlane.f32.xlu1 %v109_v19  ;;  %107 = vadd.xlane.f32.xlu0 %v106_v32 }
  0x58   :  { %1326 = vmatmul.mubr.msk.f32.gmra.mrb[10].mxu0 %vm81_vm0, %v22_v0  ;;  %1342 = vmatmul.mubr.msk.f32.gmra.mrb[10].mxu1 %vm81_vm0, %v1807_v18  ;;  %v80_v0 = vmul.f32 %v1831_v21, %v1831_v21 }
  0x59   :  { %1327 = vmatprep.mubr.msk.f32.mxu0 %vm81_vm0, %v23_v7  ;;  %1343 = vmatprep.mubr.msk.f32.mxu1 %vm81_vm0, %v1820_v20 }
  0x5a   :  { %v127_v3 = vsel %vm81_vm0, %v80_v0, 0.0 }
  0x5c   :  { %1328 = vmatmul.mubr.msk.f32.gmra.mrb[12].mxu0 %vm81_vm0, %v23_v7  ;;  %1344 = vmatmul.mubr.msk.f32.gmra.mrb[12].mxu1 %vm81_vm0, %v1820_v20 }
  0x5d   :  { %1329 = vmatprep.mubr.msk.f32.mxu0 %vm81_vm0, %v24_v6  ;;  %1345 = vmatprep.mubr.msk.f32.mxu1 %vm81_vm0, %v1831_v21 }
  0x60   :  { %1330 = vmatmul.mubr.msk.f32.gmra.mrb[14].mxu0 %vm81_vm0, %v24_v6  ;;  %1346 = vmatmul.mubr.msk.f32.gmra.mrb[14].mxu1 %vm81_vm0, %v1831_v21  ;;  %v124_v6 = vsel %vm81_vm0, %v79_v2, 0.0 }
  0x93   :  { %v164_v22 = vpop.xlane.xlu0 %163  ;;  %v167_v23 = vpop.xlane.xlu1 %166 }
  0x94   :  { %258 = vxpose.xlu0.b32.start [1/16] (narrow) %v164_v22, 8 }
  0x97   :  { %v212_v24 = vpop.xlane.xlu0 %211  ;;  %v215_v25 = vpop.xlane.xlu1 %214 }
  0x98   :  { %290 = vxpose.xlu1.b32.start [1/16] (narrow) %v212_v24, 8  ;;  %259 = vxpose.xlu0.b32.cont [2/16] (narrow) %v167_v23, 8 }
  0x9b   :  { %v170_v26 = vpop.xlane.xlu0 %169  ;;  %v218_v27 = vpop.xlane.xlu1 %217 }
  0x9c   :  { %291 = vxpose.xlu1.b32.cont [2/16] (narrow) %v215_v25, 8  ;;  %260 = vxpose.xlu0.b32.cont [3/16] (narrow) %v170_v26, 8 }
  0x9f   :  { %v173_v28 = vpop.xlane.xlu0 %172  ;;  %v221_v29 = vpop.xlane.xlu1 %220 }
  0xa0   :  { %292 = vxpose.xlu1.b32.cont [3/16] (narrow) %v218_v27, 8  ;;  %261 = vxpose.xlu0.b32.cont [4/16] (narrow) %v173_v28, 8 }
  0xa3   :  { %v176_v30 = vpop.xlane.xlu0 %175  ;;  %v224_v33 = vpop.xlane.xlu1 %223 }
  0xa4   :  { %293 = vxpose.xlu1.b32.cont [4/16] (narrow) %v221_v29, 8  ;;  %262 = vxpose.xlu0.b32.cont [5/16] (narrow) %v176_v30, 8 }
  0xa7   :  { %v179_v34 = vpop.xlane.xlu0 %178  ;;  %v227_v35 = vpop.xlane.xlu1 %226 }
  0xa8   :  { %294 = vxpose.xlu1.b32.cont [5/16] (narrow) %v224_v33, 8  ;;  %263 = vxpose.xlu0.b32.cont [6/16] (narrow) %v179_v34, 8 }
  0xab   :  { %v182_v36 = vpop.xlane.xlu0 %181  ;;  %v230_v37 = vpop.xlane.xlu1 %229 }
  0xac   :  { %295 = vxpose.xlu1.b32.cont [6/16] (narrow) %v227_v35, 8  ;;  %264 = vxpose.xlu0.b32.cont [7/16] (narrow) %v182_v36, 8 }
  0xaf   :  { %v185_v38 = vpop.xlane.xlu0 %184  ;;  %v233_v39 = vpop.xlane.xlu1 %232 }
  0xb0   :  { %296 = vxpose.xlu1.b32.cont [7/16] (narrow) %v230_v37, 8  ;;  %265 = vxpose.xlu0.b32.cont [8/16] (narrow) %v185_v38, 8 }
  0xb3   :  { %v188_v40 = vpop.xlane.xlu0 %187  ;;  %v236_v41 = vpop.xlane.xlu1 %235 }
  0xb4   :  { %297 = vxpose.xlu1.b32.cont [8/16] (narrow) %v233_v39, 8  ;;  %266 = vxpose.xlu0.b32.cont [9/16] (narrow) %v188_v40, 8 }
  0xb7   :  { %v191_v42 = vpop.xlane.xlu0 %190  ;;  %v239_v43 = vpop.xlane.xlu1 %238 }
  0xb8   :  { %298 = vxpose.xlu1.b32.cont [9/16] (narrow) %v236_v41, 8  ;;  %267 = vxpose.xlu0.b32.cont [10/16] (narrow) %v191_v42, 8 }
  0xbb   :  { %v194_v44 = vpop.xlane.xlu0 %193  ;;  %v242_v45 = vpop.xlane.xlu1 %241 }
  0xbc   :  { %299 = vxpose.xlu1.b32.cont [10/16] (narrow) %v239_v43, 8  ;;  %268 = vxpose.xlu0.b32.cont [11/16] (narrow) %v194_v44, 8 }
  0xbf   :  { %v197_v46 = vpop.xlane.xlu0 %196  ;;  %v245_v47 = vpop.xlane.xlu1 %244 }
  0xc0   :  { %300 = vxpose.xlu1.b32.cont [11/16] (narrow) %v242_v45, 8  ;;  %269 = vxpose.xlu0.b32.cont [12/16] (narrow) %v197_v46, 8 }
  0xc3   :  { %v200_v48 = vpop.xlane.xlu0 %199  ;;  %v248_v49 = vpop.xlane.xlu1 %247 }
  0xc4   :  { %301 = vxpose.xlu1.b32.cont [12/16] (narrow) %v245_v47, 8  ;;  %270 = vxpose.xlu0.b32.cont [13/16] (narrow) %v200_v48, 8 }
  0xc7   :  { %v203_v50 = vpop.xlane.xlu0 %202  ;;  %v251_v51 = vpop.xlane.xlu1 %250 }
  0xc8   :  { %302 = vxpose.xlu1.b32.cont [13/16] (narrow) %v248_v49, 8  ;;  %271 = vxpose.xlu0.b32.cont [14/16] (narrow) %v203_v50, 8 }
  0xcb   :  { %v206_v52 = vpop.xlane.xlu0 %205  ;;  %v254_v53 = vpop.xlane.xlu1 %253 }
  0xcc   :  { %303 = vxpose.xlu1.b32.cont [14/16] (narrow) %v251_v51, 8  ;;  %272 = vxpose.xlu0.b32.cont [15/16] (narrow) %v206_v52, 8 }
  0xcf   :  { %v209_v54 = vpop.xlane.xlu0 %208  ;;  %v257_v55 = vpop.xlane.xlu1 %256 }
  0xd0   :  { %304 = vxpose.xlu1.b32.cont [15/16] (narrow) %v254_v53, 8  ;;  %273 = vxpose.xlu0.b32.end [16/16] (narrow) %v209_v54, 8 }
  0xd3   :  { %v84_v57 = vpop.xlane.xlu0 %83  ;;  %v87_v62 = vpop.xlane.xlu1 %86 }
  0xd4   :  { %305 = vxpose.xlu1.b32.end [16/16] (narrow) %v257_v55, 8 }
  0xd7   :  { %v1855_v31 = vpop.xlane.xlu0 %89  ;;  %v1861_v5 = vpop.xlane.xlu1 %92 }
  0xdb   :  { %v1864_v7 = vpop.xlane.xlu0 %95  ;;  %v1866_v8 = vpop.xlane.xlu1 %98 }
  0xdf   :  { %v1868_v10 = vpop.xlane.xlu0 %101  ;;  %v1870_v12 = vpop.xlane.xlu1 %104 }
  0xe3   :  { %v108_v13 = vpop.xlane.xlu0 %107  ;;  %v111_v15 = vpop.xlane.xlu1 %110 }
  0xfb   :  { %116 = vadd.xlane.f32.xlu1 %v115_v58 }
  0xfd   :  { %113 = vadd.xlane.f32.xlu0 %v112_v60 }
  0xff   :  { %122 = vadd.xlane.f32.xlu1 %v121_v63 }
 0x101   :  { %119 = vadd.xlane.f32.xlu0 %v118_v1 }
 0x103   :  { %128 = vadd.xlane.f32.xlu1 %v127_v3 }
 0x105   :  { %125 = vadd.xlane.f32.xlu0 %v124_v6 }
 0x114   :  { %v274_v16 = vpop.trf.xlu0 }
 0x115   :  { %v1872_v17 = vrot.slane %v274_v16, %v629_v14 }
 0x117   :  { %v580_v18 = vpop.f32.mrb[0].mxu1  ;;  %v651_v19 = vadd.f32 %v1872_v17, %v108_v13  ;;  %v532_v32 = vpop.f32.mrb[0].mxu0  ;;  %v635_v20 = vadd.f32 %v1872_v17, %v84_v57  ;;  %v637_v25 = vadd.f32 %v1872_v17, %v87_v62  ;;  %v653_v26 = vadd.f32 %v1872_v17, %v111_v15 }
 0x118   :  { %v683_v21 = vmul.f32 2.0, %v580_v18  ;;  %v306_v22 = vpop.trf.xlu1  ;;  %v667_v23 = vmul.f32 2.0, %v532_v32  ;;  %v534_v24 = vpop.f32.mrb[1].mxu0  ;;  %v1882_v30 = vadd.f32 %v1872_v17, %v1855_v31  ;;  %v1886_v33 = vadd.f32 %v1872_v17, %v1861_v5 }
 0x119   :  { %v1878_v27 = vrot.slane %v306_v22, %v629_v14  ;;  %v668_v28 = vmul.f32 2.0, %v534_v24  ;;  %v582_v29 = vpop.f32.mrb[1].mxu1  ;;  %v1890_v37 = vadd.f32 %v1872_v17, %v1864_v7 }
 0x11a   :  { %v715_v34 = vsub.f32 %v651_v19, %v683_v21  ;;  %v699_v35 = vsub.f32 %v635_v20, %v667_v23  ;;  %v684_v36 = vmul.f32 2.0, %v582_v29 }
 0x11b   :  { %v636_v38 = vadd.f32 %v1878_v27, %v84_v57  ;;  %v652_v39 = vadd.f32 %v1878_v27, %v108_v13  ;;  %v538_v40 = vpop.f32.mrb[2].mxu0  ;;  %v586_v41 = vpop.f32.mrb[2].mxu1  ;;  %v638_v42 = vadd.f32 %v1878_v27, %v87_v62  ;;  %v654_v43 = vadd.f32 %v1878_v27, %v111_v15 }
 0x11c   :  { %v747_v44 = vmax.f32 %v715_v34, 0.0  ;;  %v731_v45 = vmax.f32 %v699_v35, 0.0  ;;  %v669_v46 = vmul.f32 2.0, %v538_v40  ;;  %v685_v47 = vmul.f32 2.0, %v586_v41  ;;  %v540_v48 = vpop.f32.mrb[3].mxu0  ;;  %v588_v49 = vpop.f32.mrb[3].mxu1 }
 0x11d   :  { %v700_v50 = vsub.f32 %v636_v38, %v668_v28  ;;  %v716_v51 = vsub.f32 %v652_v39, %v684_v36  ;;  %v670_v52 = vmul.f32 2.0, %v540_v48  ;;  %v686_v53 = vmul.f32 2.0, %v588_v49 }
 0x11e   :  { %v779_v54 = vsub.f32 0.0, %v747_v44  ;;  %v763_v55 = vsub.f32 0.0, %v731_v45  ;;  %v701_v56 = vsub.f32 %v637_v25, %v669_v46  ;;  %v717_v4 = vsub.f32 %v653_v26, %v685_v47 }
 0x11f   :  { %v732_v57 = vmax.f32 %v700_v50, 0.0  ;;  %v748_v58 = vmax.f32 %v716_v51, 0.0  ;;  %v702_v59 = vsub.f32 %v638_v42, %v670_v52  ;;  %v718_v60 = vsub.f32 %v654_v43, %v686_v53  ;;  %v544_v61 = vpop.f32.mrb[4].mxu0  ;;  %v1896_v62 = vpop.f32.mrb[4].mxu1  ;;  %v859_v53 = vld [vmem:[%s2197_s0] sm:$0xff] }
 0x120   :  { %v827_v63 = vmul.f32 1.442695, %v779_v54  ;;  %v795_v0 = vmul.f32 1.442695, %v763_v55  ;;  %v733_v1 = vmax.f32 %v701_v56, 0.0  ;;  %v749_v2 = vmax.f32 %v717_v4, 0.0 }
 0x121   :  { %v764_v3 = vsub.f32 0.0, %v732_v57  ;;  %v780_v6 = vsub.f32 0.0, %v748_v58  ;;  %v734_v9 = vmax.f32 %v702_v59, 0.0  ;;  %v750_v11 = vmax.f32 %v718_v60, 0.0  ;;  %v546_v13 = vpop.f32.mrb[5].mxu0  ;;  %v1898_v14 = vpop.f32.mrb[5].mxu1 }
 0x122   :  { %1416 = vpow2.f32 %v827_v63  ;;  %v765_v15 = vsub.f32 0.0, %v733_v1  ;;  %v781_v16 = vsub.f32 0.0, %v749_v2  ;;  %v671_v18 = vmul.f32 2.0, %v544_v61  ;;  %v860_v61 = vld [vmem:[%s2197_s0 + $0x8] sm:$0xff]  ;;  %v875_v1 = vld [vmem:[%s2197_s0 + $0x80] sm:$0xff] }
 0x123   :  { %1418 = vpow2.f32 %v795_v0  ;;  %v797_v19 = vmul.f32 1.442695, %v764_v3  ;;  %v829_v32 = vmul.f32 1.442695, %v780_v6  ;;  %v766_v20 = vsub.f32 0.0, %v734_v9  ;;  %v550_v21 = vpop.f32.mrb[6].mxu0 }
 0x124   :  { %v799_v22 = vmul.f32 1.442695, %v765_v15  ;;  %v831_v23 = vmul.f32 1.442695, %v781_v16  ;;  %v782_v24 = vsub.f32 0.0, %v750_v11  ;;  %v703_v25 = vsub.f32 %v1882_v30, %v671_v18  ;;  %v552_v26 = vpop.f32.mrb[7].mxu0 }
 0x125   :  { %1420 = vpow2.f32 %v797_v19  ;;  %v801_v28 = vmul.f32 1.442695, %v766_v20  ;;  %v640_v29 = vadd.f32 %v1878_v27, %v1855_v31  ;;  %v672_v34 = vmul.f32 2.0, %v546_v13  ;;  %v1903_v35 = vpop.f32.mrb[6].mxu1  ;;  %v876_v3 = vld [vmem:[%s2197_s0 + $0x88] sm:$0xff]  ;;  %v861_v16 = vld [vmem:[%s2197_s0 + $0x10] sm:$0xff] }
 0x126   :  { %1422 = vpow2.f32 %v829_v32  ;;  %v833_v36 = vmul.f32 1.442695, %v782_v24  ;;  %v735_v38 = vmax.f32 %v703_v25, 0.0  ;;  %v673_v39 = vmul.f32 2.0, %v550_v21  ;;  %v1905_v40 = vpop.f32.mrb[7].mxu1 }
 0x127   :  { %1424 = vpow2.f32 %v799_v22  ;;  %v704_v41 = vsub.f32 %v640_v29, %v672_v34  ;;  %v642_v30 = vadd.f32 %v1878_v27, %v1861_v5  ;;  %v674_v42 = vmul.f32 2.0, %v552_v26  ;;  %v556_v43 = vpop.f32.mrb[8].mxu0  ;;  %v1909_v44 = vpop.f32.mrb[8].mxu1 }
 0x128   :  { %1426 = vpow2.f32 %v831_v23  ;;  %v767_v31 = vsub.f32 0.0, %v735_v38  ;;  %v705_v45 = vsub.f32 %v1886_v33, %v673_v39  ;;  %v675_v46 = vmul.f32 2.0, %v556_v43  ;;  %v558_v47 = vpop.f32.mrb[9].mxu0  ;;  %v1912_v48 = vpop.f32.mrb[9].mxu1  ;;  %v877_v23 = vld [vmem:[%s2197_s0 + $0x90] sm:$0xff]  ;;  %v862_v38 = vld [vmem:[%s2197_s0 + $0x18] sm:$0xff] }
 0x129   :  { %1428 = vpow2.f32 %v801_v28  ;;  %v736_v49 = vmax.f32 %v704_v41, 0.0  ;;  %v706_v50 = vsub.f32 %v642_v30, %v674_v42  ;;  %v1939_v9 = vadd.f32 %v1878_v27, %v1864_v7 }
 0x12a   :  { %1430 = vpow2.f32 %v833_v36  ;;  %v803_v51 = vmul.f32 1.442695, %v767_v31  ;;  %v737_v52 = vmax.f32 %v705_v45, 0.0  ;;  %v707_v5 = vsub.f32 %v1890_v37, %v675_v46  ;;  %v878_v31 = vld [vmem:[%s2197_s0 + $0x98] sm:$0xff] }
 0x12b   :  { %v768_v54 = vsub.f32 0.0, %v736_v49  ;;  %v738_v55 = vmax.f32 %v706_v50, 0.0  ;;  %v1918_v56 = vpop.f32.mrb[10].mxu0  ;;  %v1920_v33 = vpop.f32.mrb[10].mxu1  ;;  %v1943_v11 = vadd.f32 %v1872_v17, %v1866_v8  ;;  %v676_v19 = vmul.f32 2.0, %v558_v47 }
 0x12c   :  { %v1922_v4 = vpop.eup %1416  ;;  %1432 = vpow2.f32 %v803_v51  ;;  %v769_v57 = vsub.f32 0.0, %v737_v52  ;;  %v739_v58 = vmax.f32 %v707_v5, 0.0  ;;  %v1924_v59 = vpop.f32.mrb[11].mxu0 }
 0x12d   :  { %v1926_v60 = vpop.f32.mrb[11].mxu1  ;;  %v1419_v37 = vpop.eup %1418  ;;  %v805_v63 = vmul.f32 1.442695, %v768_v54  ;;  %v770_v0 = vsub.f32 0.0, %v738_v55  ;;  %v1962_v29 = vmul.f32 %v1922_v4, %v875_v1  ;;  %v708_v50 = vsub.f32 %v1939_v9, %v676_v19 }
 0x12e   :  { %v891_v2 = vmul.f32 %v1419_v37, %v859_v53  ;;  %v807_v6 = vmul.f32 1.442695, %v769_v57  ;;  %v1035_v15 = vmul.f32 %v1419_v37, %v1419_v37  ;;  %v771_v24 = vsub.f32 0.0, %v739_v58  ;;  %v863_v57 = vld [vmem:[%s2197_s0 + $0x20] sm:$0xff] }
 0x12f   :  { %v1421_v13 = vpop.eup %1420  ;;  %1434 = vpow2.f32 %v805_v63  ;;  %v809_v18 = vmul.f32 1.442695, %v770_v0  ;;  %v1948_v32 = vpop.f32.mrb[12].mxu0 }
 0x130   :  { %v1950_v20 = vpop.f32.mrb[12].mxu1  ;;  %v1952_v21 = vpop.eup %1422  ;;  %v892_v7 = vmul.f32 %v1421_v13, %v860_v61  ;;  %v1036_v22 = vmul.f32 %v1421_v13, %v1421_v13  ;;  %1436 = vpow2.f32 %v807_v6  ;;  %v1108_v34 = vmul.f32 %v891_v2, %v891_v2 }
 0x131   :  { %v1957_v25 = vpop.f32.mrb[13].mxu0  ;;  %v1959_v26 = vpop.f32.mrb[13].mxu1  ;;  %v1965_v36 = vmul.f32 %v1952_v21, %v876_v3  ;;  %1438 = vpow2.f32 %v809_v18  ;;  %v811_v58 = vmul.f32 1.442695, %v771_v24  ;;  %v865_v24 = vld [vmem:[%s2197_s0 + $0x30] sm:$0xff] }
 0x132   :  { %v1425_v28 = vpop.eup %1424  ;;  %v1267_v41 = vpack.c.bf16 %v892_v7, %v891_v2  ;;  %v1067_v30 = vadd.f32 %v1036_v22, %v1035_v15  ;;  %v1109_v42 = vmul.f32 %v892_v7, %v892_v7  ;;  %v677_v2 = vmul.f32 2.0, %v1918_v56  ;;  %v864_v7 = vld [vmem:[%s2197_s0 + $0x28] sm:$0xff] }
 0x133   :  { %v1970_v39 = vpop.eup %1426  ;;  %v893_v43 = vmul.f32 %v1425_v28, %v861_v16  ;;  %v1275_v46 = vpack.c.bf16 %v1965_v36, %v1962_v29  ;;  %v1037_v47 = vmul.f32 %v1425_v28, %v1425_v28  ;;  %v1981_v51 = vpop.f32.mrb[14].mxu0  ;;  %v647_v15 = vadd.f32 %v1872_v17, %v1868_v10 }
 0x134   :  { %v1429_v45 = vpop.eup %1428  ;;  %v1978_v49 = vmul.f32 %v1970_v39, %v877_v23  ;;  %v1983_v52 = vpop.f32.mrb[14].mxu1  ;;  %1019 = vst [vmem:[%s2200_s3] sm:$0xff] %v1267_v41  ;;  %v1140_v53 = vadd.f32 %v1109_v42, %v1108_v34  ;;  %v646_v22 = vadd.f32 %v1878_v27, %v1866_v8  ;;  %1440 = vpow2.f32 %v811_v58  ;;  %v866_v8 = vld [vmem:[%s2197_s0 + $0x38] sm:$0xff] }
 0x135   :  { %v1985_v5 = vpop.eup %1430  ;;  %v1110_v54 = vmul.f32 %v893_v43, %v893_v43  ;;  %v894_v55 = vmul.f32 %v1429_v45, %v862_v38  ;;  %v1993_v37 = vpop.f32.mrb[15].mxu0  ;;  %1027 = vst [vmem:[%s2200_s3 + $0x40] sm:$0xff] %v1275_v46  ;;  %v1068_v63 = vadd.f32 %v1067_v30, %v1037_v47  ;;  %v1038_v0 = vmul.f32 %v1429_v45, %v1429_v45 }
 0x136   :  { %v1995_v61 = vpop.f32.mrb[15].mxu1  ;;  %v2001_v1 = vmul.f32 %v1985_v5, %v878_v31  ;;  %v1433_v3 = vpop.eup %1432  ;;  %v740_v28 = vmax.f32 %v708_v50, 0.0  ;;  %v709_v41 = vsub.f32 %v1943_v11, %v677_v2  ;;  %v678_v30 = vmul.f32 2.0, %v1924_v59 }
 0x137   :  { %v1141_v6 = vadd.f32 %v1140_v53, %v1110_v54  ;;  %v1268_v9 = vpack.c.bf16 %v894_v55, %v893_v43  ;;  %v1111_v13 = vmul.f32 %v894_v55, %v894_v55  ;;  %v1069_v16 = vadd.f32 %v1068_v63, %v1038_v0 }
 0x138   :  { %v1276_v18 = vpack.c.bf16 %v2001_v1, %v1978_v49  ;;  %v895_v19 = vmul.f32 %v1433_v3, %v863_v57  ;;  %v1039_v23 = vmul.f32 %v1433_v3, %v1433_v3  ;;  %v679_v42 = vmul.f32 2.0, %v1948_v32 }
 0x139   :  { %1020 = vst [vmem:[%s2200_s3 + $0x8] sm:$0xff] %v1268_v9  ;;  %v1142_v56 = vadd.f32 %v1141_v6, %v1111_v13  ;;  %v1435_v34 = vpop.eup %1434  ;;  %v772_v47 = vsub.f32 0.0, %v740_v28  ;;  %v741_v57 = vmax.f32 %v709_v41, 0.0  ;;  %v648_v28 = vadd.f32 %v1878_v27, %v1868_v10 }
 0x13a   :  { %1028 = vst [vmem:[%s2200_s3 + $0x48] sm:$0xff] %v1276_v18  ;;  %v1112_v38 = vmul.f32 %v895_v19, %v895_v19  ;;  %v1437_v43 = vpop.eup %1436  ;;  %v1070_v31 = vadd.f32 %v1069_v16, %v1039_v23  ;;  %v896_v45 = vmul.f32 %v1435_v34, %v864_v7  ;;  %v1040_v46 = vmul.f32 %v1435_v34, %v1435_v34 }
 0x13b   :  { %v1439_v50 = vpop.eup %1438  ;;  %v897_v54 = vmul.f32 %v1437_v43, %v865_v24  ;;  %v1041_v55 = vmul.f32 %v1437_v43, %v1437_v43  ;;  %v813_v2 = vmul.f32 1.442695, %v772_v47  ;;  %v773_v59 = vsub.f32 0.0, %v741_v57  ;;  %v867_v24 = vld [vmem:[%s2197_s0 + $0x40] sm:$0xff] }
 0x13c   :  { %v1143_v53 = vadd.f32 %v1142_v56, %v1112_v38  ;;  %v1269_v58 = vpack.c.bf16 %v896_v45, %v895_v19  ;;  %v1071_v63 = vadd.f32 %v1070_v31, %v1040_v46  ;;  %v1113_v0 = vmul.f32 %v896_v45, %v896_v45 }
 0x13d   :  { %v898_v3 = vmul.f32 %v1439_v50, %v866_v8  ;;  %v1114_v6 = vmul.f32 %v897_v54, %v897_v54  ;;  %v1042_v11 = vmul.f32 %v1439_v50, %v1439_v50  ;;  %1442 = vpow2.f32 %v813_v2 }
 0x13e   :  { %1021 = vst [vmem:[%s2200_s3 + $0x10] sm:$0xff] %v1269_v58  ;;  %v1144_v32 = vadd.f32 %v1143_v53, %v1113_v0  ;;  %v1072_v9 = vadd.f32 %v1071_v63, %v1041_v55  ;;  %v815_v18 = vmul.f32 1.442695, %v773_v59  ;;  %v710_v7 = vsub.f32 %v646_v22, %v678_v30  ;;  %v1441_v22 = vpop.eup %1440 }
 0x13f   :  { %v1270_v13 = vpack.c.bf16 %v898_v3, %v897_v54  ;;  %v1115_v16 = vmul.f32 %v898_v3, %v898_v3  ;;  %v711_v56 = vsub.f32 %v647_v15, %v679_v42  ;;  %v680_v34 = vmul.f32 2.0, %v1957_v25 }
 0x140   :  { %v1145_v19 = vadd.f32 %v1144_v32, %v1114_v6  ;;  %v1073_v23 = vadd.f32 %v1072_v9, %v1042_v11  ;;  %1444 = vpow2.f32 %v815_v18  ;;  %v742_v38 = vmax.f32 %v710_v7, 0.0 }
 0x141   :  { %1022 = vst [vmem:[%s2200_s3 + $0x18] sm:$0xff] %v1270_v13  ;;  %v743_v8 = vmax.f32 %v711_v56, 0.0  ;;  %v712_v41 = vsub.f32 %v648_v28, %v680_v34  ;;  %v649_v30 = vadd.f32 %v1872_v17, %v1870_v12  ;;  %v681_v42 = vmul.f32 2.0, %v1981_v51  ;;  %v868_v51 = vld [vmem:[%s2197_s0 + $0x48] sm:$0xff] }
 0x142   :  { %v1146_v15 = vadd.f32 %v1145_v19, %v1115_v16  ;;  %v899_v43 = vmul.f32 %v1441_v22, %v867_v24  ;;  %v1043_v31 = vmul.f32 %v1441_v22, %v1441_v22  ;;  %v774_v45 = vsub.f32 0.0, %v742_v38 }
 0x143   :  { %v775_v46 = vsub.f32 0.0, %v743_v8  ;;  %v744_v47 = vmax.f32 %v712_v41, 0.0  ;;  %v713_v50 = vsub.f32 %v649_v30, %v681_v42  ;;  %v650_v10 = vadd.f32 %v1878_v27, %v1870_v12  ;;  %v870_v8 = vld [vmem:[%s2197_s0 + $0x58] sm:$0xff] }
 0x144   :  { %v682_v25 = vmul.f32 2.0, %v1993_v37  ;;  %v1074_v53 = vadd.f32 %v1073_v23, %v1043_v31  ;;  %v1116_v54 = vmul.f32 %v899_v43, %v899_v43  ;;  %v817_v55 = vmul.f32 1.442695, %v774_v45  ;;  %v869_v37 = vld [vmem:[%s2197_s0 + $0x50] sm:$0xff]  ;;  %v872_v31 = vld [vmem:[%s2197_s0 + $0x68] sm:$0xff] }
 0x145   :  { %v819_v57 = vmul.f32 1.442695, %v775_v46  ;;  %v776_v58 = vsub.f32 0.0, %v744_v47  ;;  %v745_v63 = vmax.f32 %v713_v50, 0.0 }
 0x146   :  { %v714_v0 = vsub.f32 %v650_v10, %v682_v25  ;;  %v1147_v3 = vadd.f32 %v1146_v15, %v1116_v54  ;;  %1446 = vpow2.f32 %v817_v55  ;;  %v871_v15 = vld [vmem:[%s2197_s0 + $0x60] sm:$0xff] }
 0x147   :  { %1448 = vpow2.f32 %v819_v57  ;;  %v821_v6 = vmul.f32 1.442695, %v776_v58  ;;  %v777_v11 = vsub.f32 0.0, %v745_v63  ;;  %v1443_v12 = vpop.eup %1442  ;;  %v873_v57 = vld [vmem:[%s2197_s0 + $0x70] sm:$0xff] }
 0x148   :  { %v746_v2 = vmax.f32 %v714_v0, 0.0  ;;  %v900_v59 = vmul.f32 %v1443_v12, %v868_v51  ;;  %v1044_v32 = vmul.f32 %v1443_v12, %v1443_v12 }
 0x149   :  { %1450 = vpow2.f32 %v821_v6  ;;  %v823_v9 = vmul.f32 1.442695, %v777_v11  ;;  %v874_v6 = vld [vmem:[%s2197_s0 + $0x78] sm:$0xff] }
 0x14a   :  { %v1445_v13 = vpop.eup %1444  ;;  %v778_v16 = vsub.f32 0.0, %v746_v2  ;;  %v1271_v18 = vpack.c.bf16 %v900_v59, %v899_v43  ;;  %v1075_v7 = vadd.f32 %v1074_v53, %v1044_v32  ;;  %v1117_v56 = vmul.f32 %v900_v59, %v900_v59 }
 0x14b   :  { %v901_v19 = vmul.f32 %v1445_v13, %v869_v37  ;;  %v1045_v23 = vmul.f32 %v1445_v13, %v1445_v13  ;;  %1452 = vpow2.f32 %v823_v9 }
 0x14c   :  { %v825_v24 = vmul.f32 1.442695, %v778_v16  ;;  %1023 = vst [vmem:[%s2200_s3 + $0x20] sm:$0xff] %v1271_v18  ;;  %v1148_v28 = vadd.f32 %v1147_v3, %v1117_v56 }
 0x14d   :  { %v1118_v34 = vmul.f32 %v901_v19, %v901_v19  ;;  %v1076_v38 = vadd.f32 %v1075_v7, %v1045_v23  ;;  %v1051_v23 = vmul.f32 %v1922_v4, %v1922_v4  ;;  %v1053_v4 = vmul.f32 %v1970_v39, %v1970_v39 }
 0x14e   :  { %1454 = vpow2.f32 %v825_v24  ;;  %v690_v39 = vmul.f32 2.0, %v1905_v40 }
 0x14f   :  { %v1149_v22 = vadd.f32 %v1148_v28, %v1118_v34  ;;  %v1124_v28 = vmul.f32 %v1962_v29, %v1962_v29  ;;  %v1126_v29 = vmul.f32 %v1978_v49, %v1978_v49  ;;  %v687_v49 = vmul.f32 2.0, %v1896_v62 }
 0x150   :  { %v1447_v41 = vpop.eup %1446  ;;  %v694_v62 = vmul.f32 2.0, %v1926_v60  ;;  %v698_v60 = vmul.f32 2.0, %v1995_v61 }
 0x151   :  { %v1449_v30 = vpop.eup %1448  ;;  %v902_v42 = vmul.f32 %v1447_v41, %v870_v8  ;;  %v1046_v43 = vmul.f32 %v1447_v41, %v1447_v41 }
 0x152   :  { %v903_v45 = vmul.f32 %v1449_v30, %v871_v15  ;;  %v1047_v46 = vmul.f32 %v1449_v30, %v1449_v30 }
 0x153   :  { %v1451_v47 = vpop.eup %1450  ;;  %v1272_v50 = vpack.c.bf16 %v902_v42, %v901_v19  ;;  %v1077_v10 = vadd.f32 %v1076_v38, %v1046_v43  ;;  %v1119_v25 = vmul.f32 %v902_v42, %v902_v42  ;;  %v1052_v38 = vmul.f32 %v1952_v21, %v1952_v21 }
 0x154   :  { %v1120_v53 = vmul.f32 %v903_v45, %v903_v45  ;;  %v904_v54 = vmul.f32 %v1451_v47, %v872_v31  ;;  %v1048_v55 = vmul.f32 %v1451_v47, %v1451_v47  ;;  %v1054_v42 = vmul.f32 %v1985_v5, %v1985_v5 }
 0x155   :  { %1024 = vst [vmem:[%s2200_s3 + $0x28] sm:$0xff] %v1272_v50  ;;  %v1150_v58 = vadd.f32 %v1149_v22, %v1119_v25  ;;  %v1078_v63 = vadd.f32 %v1077_v10, %v1047_v46  ;;  %v1453_v0 = vpop.eup %1452  ;;  %v1125_v22 = vmul.f32 %v1965_v36, %v1965_v36  ;;  %v1127_v21 = vmul.f32 %v2001_v1, %v2001_v1 }
 0x156   :  { %v1273_v3 = vpack.c.bf16 %v904_v54, %v903_v45  ;;  %v1121_v51 = vmul.f32 %v904_v54, %v904_v54  ;;  %v905_v12 = vmul.f32 %v1453_v0, %v873_v57  ;;  %v1049_v37 = vmul.f32 %v1453_v0, %v1453_v0 }
 0x157   :  { %v1151_v11 = vadd.f32 %v1150_v58, %v1120_v53  ;;  %v1079_v2 = vadd.f32 %v1078_v63, %v1048_v55  ;;  %v689_v46 = vmul.f32 2.0, %v1903_v35  ;;  %v688_v50 = vmul.f32 2.0, %v1898_v14 }
 0x158   :  { %v1455_v59 = vpop.eup %1454  ;;  %1025 = vst [vmem:[%s2200_s3 + $0x30] sm:$0xff] %v1273_v3  ;;  %v1122_v13 = vmul.f32 %v905_v12, %v905_v12  ;;  %v691_v1 = vmul.f32 2.0, %v1909_v44  ;;  %v692_v25 = vmul.f32 2.0, %v1912_v48  ;;  %v693_v57 = vmul.f32 2.0, %v1920_v33 }
 0x159   :  { %v1152_v32 = vadd.f32 %v1151_v11, %v1121_v51  ;;  %v1080_v9 = vadd.f32 %v1079_v2, %v1049_v37  ;;  %v906_v16 = vmul.f32 %v1455_v59, %v874_v6  ;;  %v1050_v18 = vmul.f32 %v1455_v59, %v1455_v59 }
 0x15a   :  { %v2112_v58 = vmul.f32 2.0, %v1950_v20  ;;  %v2115_v63 = vmul.f32 2.0, %v1959_v26  ;;  %v697_v33 = vmul.f32 2.0, %v1983_v52 }
 0x15b   :  { %v1153_v7 = vadd.f32 %v1152_v32, %v1122_v13  ;;  %v1274_v56 = vpack.c.bf16 %v906_v16, %v905_v12  ;;  %v1123_v19 = vmul.f32 %v906_v16, %v906_v16  ;;  %v1081_v24 = vadd.f32 %v1080_v9, %v1050_v18 }
 0x15d   :  { %1026 = vst [vmem:[%s2200_s3 + $0x38] sm:$0xff] %v1274_v56  ;;  %v1154_v34 = vadd.f32 %v1153_v7, %v1123_v19  ;;  %v1082_v8 = vadd.f32 %v1081_v24, %v1051_v23 }
 0x15f   :  { %v1155_v15 = vadd.f32 %v1154_v34, %v1124_v28  ;;  %v1083_v41 = vadd.f32 %v1082_v8, %v1052_v38 }
 0x161   :  { %v1156_v30 = vadd.f32 %v1155_v15, %v1125_v22  ;;  %v1084_v43 = vadd.f32 %v1083_v41, %v1053_v4 }
 0x163   :  { %v1157_v31 = vadd.f32 %v1156_v30, %v1126_v29  ;;  %v2095_v45 = vadd.f32 %v1084_v43, %v1054_v42 }
 0x165   :  { %v2097_v36 = vadd.f32 %v1157_v31, %v1127_v21 }
 0x188   :  { %v117_v47 = vpop.xlane.xlu1 %116 }
 0x189   :  { %v657_v5 = vadd.f32 %v1872_v17, %v117_v47  ;;  %v658_v10 = vadd.f32 %v1878_v27, %v117_v47 }
 0x18a   :  { %v114_v53 = vpop.xlane.xlu0 %113 }
 0x18b   :  { %v721_v54 = vsub.f32 %v657_v5, %v689_v46  ;;  %v722_v55 = vsub.f32 %v658_v10, %v690_v39  ;;  %v655_v35 = vadd.f32 %v1872_v17, %v114_v53  ;;  %v656_v40 = vadd.f32 %v1878_v27, %v114_v53  ;;  %v881_v53 = vld [vmem:[%s2197_s0 + $0xb0] sm:$0xff] }
 0x18c   :  { %v123_v14 = vpop.xlane.xlu1 %122 }
 0x18d   :  { %v753_v44 = vmax.f32 %v721_v54, 0.0  ;;  %v754_v48 = vmax.f32 %v722_v55, 0.0  ;;  %v719_v0 = vsub.f32 %v655_v35, %v687_v49  ;;  %v720_v3 = vsub.f32 %v656_v40, %v688_v50 }
 0x18e   :  { %v661_v51 = vadd.f32 %v1872_v17, %v123_v14  ;;  %v662_v6 = vadd.f32 %v1878_v27, %v123_v14  ;;  %v120_v11 = vpop.xlane.xlu0 %119 }
 0x18f   :  { %v785_v2 = vsub.f32 0.0, %v753_v44  ;;  %v786_v12 = vsub.f32 0.0, %v754_v48  ;;  %v751_v20 = vmax.f32 %v719_v0, 0.0  ;;  %v752_v37 = vmax.f32 %v720_v3, 0.0 }
 0x190   :  { %v725_v59 = vsub.f32 %v661_v51, %v693_v57  ;;  %v726_v26 = vsub.f32 %v662_v6, %v694_v62  ;;  %v659_v32 = vadd.f32 %v1872_v17, %v120_v11  ;;  %v660_v9 = vadd.f32 %v1878_v27, %v120_v11  ;;  %v129_v13 = vpop.xlane.xlu1 %128  ;;  %v879_v57 = vld [vmem:[%s2197_s0 + $0xa0] sm:$0xff] }
 0x191   :  { %v839_v16 = vmul.f32 1.442695, %v785_v2  ;;  %v841_v18 = vmul.f32 1.442695, %v786_v12  ;;  %v783_v7 = vsub.f32 0.0, %v751_v20  ;;  %v784_v56 = vsub.f32 0.0, %v752_v37 }
 0x192   :  { %v757_v19 = vmax.f32 %v725_v59, 0.0  ;;  %v758_v23 = vmax.f32 %v726_v26, 0.0  ;;  %v723_v52 = vsub.f32 %v659_v32, %v691_v1  ;;  %v724_v24 = vsub.f32 %v660_v9, %v692_v25  ;;  %v126_v15 = vpop.xlane.xlu0 %125  ;;  %v883_v32 = vld [vmem:[%s2197_s0 + $0xc0] sm:$0xff] }
 0x193   :  { %1456 = vpow2.f32 %v839_v16  ;;  %v835_v61 = vmul.f32 1.442695, %v783_v7  ;;  %v837_v28 = vmul.f32 1.442695, %v784_v56  ;;  %v665_v34 = vadd.f32 %v1872_v17, %v129_v13 }
 0x194   :  { %1458 = vpow2.f32 %v841_v18  ;;  %v789_v38 = vsub.f32 0.0, %v757_v19  ;;  %v790_v8 = vsub.f32 0.0, %v758_v23  ;;  %v755_v22 = vmax.f32 %v723_v52, 0.0 }
 0x195   :  { %1460 = vpow2.f32 %v835_v61  ;;  %v756_v4 = vmax.f32 %v724_v24, 0.0  ;;  %v666_v41 = vadd.f32 %v1878_v27, %v129_v13  ;;  %v729_v29 = vsub.f32 %v665_v34, %v697_v33  ;;  %v886_v13 = vld [vmem:[%s2197_s0 + $0xd8] sm:$0xff]  ;;  %v889_v34 = vld [vmem:[%s2197_s0 + $0xf0] sm:$0xff] }
 0x196   :  { %1462 = vpow2.f32 %v837_v28  ;;  %v847_v30 = vmul.f32 1.442695, %v789_v38  ;;  %v849_v42 = vmul.f32 1.442695, %v790_v8  ;;  %v787_v43 = vsub.f32 0.0, %v755_v22 }
 0x197   :  { %v788_v21 = vsub.f32 0.0, %v756_v4  ;;  %v730_v31 = vsub.f32 %v666_v41, %v698_v60  ;;  %v761_v46 = vmax.f32 %v729_v29, 0.0  ;;  %v663_v39 = vadd.f32 %v1872_v17, %v126_v15  ;;  %v885_v60 = vld [vmem:[%s2197_s0 + $0xd0] sm:$0xff] }
 0x198   :  { %1464 = vpow2.f32 %v847_v30  ;;  %v843_v47 = vmul.f32 1.442695, %v787_v43  ;;  %v664_v49 = vadd.f32 %v1878_v27, %v126_v15  ;;  %v882_v27 = vld [vmem:[%s2197_s0 + $0xb8] sm:$0xff] }
 0x199   :  { %1466 = vpow2.f32 %v849_v42  ;;  %v845_v50 = vmul.f32 1.442695, %v788_v21  ;;  %v762_v5 = vmax.f32 %v730_v31, 0.0  ;;  %v793_v10 = vsub.f32 0.0, %v761_v46 }
 0x19a   :  { %1468 = vpow2.f32 %v843_v47  ;;  %v727_v1 = vsub.f32 %v663_v39, %v2112_v58  ;;  %v728_v25 = vsub.f32 %v664_v49, %v2115_v63  ;;  %v880_v63 = vld [vmem:[%s2197_s0 + $0xa8] sm:$0xff] }
 0x19b   :  { %1470 = vpow2.f32 %v845_v50  ;;  %v794_v54 = vsub.f32 0.0, %v762_v5  ;;  %v855_v17 = vmul.f32 1.442695, %v793_v10  ;;  %v887_v5 = vld [vmem:[%s2197_s0 + $0xe0] sm:$0xff] }
 0x19c   :  { %v759_v55 = vmax.f32 %v727_v1, 0.0  ;;  %v760_v35 = vmax.f32 %v728_v25, 0.0 }
 0x19d   :  { %v1457_v40 = vpop.eup %1456  ;;  %1472 = vpow2.f32 %v855_v17  ;;  %v857_v62 = vmul.f32 1.442695, %v794_v54 }
 0x19e   :  { %v1459_v14 = vpop.eup %1458  ;;  %v913_v58 = vmul.f32 %v1457_v40, %v881_v53  ;;  %v791_v44 = vsub.f32 0.0, %v759_v55  ;;  %v792_v48 = vsub.f32 0.0, %v760_v35  ;;  %v1057_v18 = vmul.f32 %v1457_v40, %v1457_v40 }
 0x19f   :  { %v1461_v0 = vpop.eup %1460  ;;  %v914_v3 = vmul.f32 %v1459_v14, %v882_v27  ;;  %1474 = vpow2.f32 %v857_v62  ;;  %v1058_v8 = vmul.f32 %v1459_v14, %v1459_v14  ;;  %v888_v27 = vld [vmem:[%s2197_s0 + $0xe8] sm:$0xff] }
 0x1a0   :  { %v1463_v51 = vpop.eup %1462  ;;  %v911_v6 = vmul.f32 %v1461_v0, %v879_v57  ;;  %v1055_v11 = vmul.f32 %v1461_v0, %v1461_v0  ;;  %v851_v33 = vmul.f32 1.442695, %v791_v44  ;;  %v853_v9 = vmul.f32 1.442695, %v792_v48 }
 0x1a1   :  { %v1278_v2 = vpack.c.bf16 %v914_v3, %v913_v58  ;;  %v912_v12 = vmul.f32 %v1463_v51, %v880_v63  ;;  %v1056_v20 = vmul.f32 %v1463_v51, %v1463_v51  ;;  %v1130_v29 = vmul.f32 %v913_v58, %v913_v58 }
 0x1a2   :  { %v1465_v37 = vpop.eup %1464  ;;  %v1086_v59 = vadd.f32 %v2095_v45, %v1055_v11  ;;  %v1128_v26 = vmul.f32 %v911_v6, %v911_v6  ;;  %1476 = vpow2.f32 %v851_v33  ;;  %v884_v45 = vld [vmem:[%s2197_s0 + $0xc8] sm:$0xff]  ;;  %v1131_v39 = vmul.f32 %v914_v3, %v914_v3 }
 0x1a3   :  { %v1467_v16 = vpop.eup %1466  ;;  %1030 = vst [vmem:[%s2200_s3 + $0x58] sm:$0xff] %v1278_v2  ;;  %v1277_v7 = vpack.c.bf16 %v912_v12, %v911_v6  ;;  %v917_v56 = vmul.f32 %v1465_v37, %v885_v60  ;;  %v1129_v52 = vmul.f32 %v912_v12, %v912_v12  ;;  %1478 = vpow2.f32 %v853_v9 }
 0x1a4   :  { %v1469_v19 = vpop.eup %1468  ;;  %v1087_v23 = vadd.f32 %v1086_v59, %v1056_v20  ;;  %v1159_v24 = vadd.f32 %v2097_v36, %v1128_v26  ;;  %v918_v38 = vmul.f32 %v1467_v16, %v886_v13  ;;  %v890_v36 = vld [vmem:[%s2197_s0 + $0xf8] sm:$0xff]  ;;  %v1061_v54 = vmul.f32 %v1465_v37, %v1465_v37 }
 0x1a5   :  { %v1471_v61 = vpop.eup %1470  ;;  %1029 = vst [vmem:[%s2200_s3 + $0x50] sm:$0xff] %v1277_v7  ;;  %v915_v28 = vmul.f32 %v1469_v19, %v883_v32  ;;  %v1059_v43 = vmul.f32 %v1469_v19, %v1469_v19  ;;  %v1062_v14 = vmul.f32 %v1467_v16, %v1467_v16  ;;  %v1134_v44 = vmul.f32 %v917_v56, %v917_v56 }
 0x1a6   :  { %v1160_v22 = vadd.f32 %v1159_v24, %v1129_v52  ;;  %v916_v15 = vmul.f32 %v1471_v61, %v884_v45  ;;  %v1088_v4 = vadd.f32 %v1087_v23, %v1057_v18  ;;  %v1280_v30 = vpack.c.bf16 %v918_v38, %v917_v56 }
 0x1a7   :  { %v1473_v41 = vpop.eup %1472  ;;  %v1060_v49 = vmul.f32 %v1471_v61, %v1471_v61  ;;  %v1132_v1 = vmul.f32 %v915_v28, %v915_v28  ;;  %v1135_v51 = vmul.f32 %v918_v38, %v918_v38 }
 0x1a8   :  { %v1279_v42 = vpack.c.bf16 %v916_v15, %v915_v28  ;;  %v1089_v21 = vadd.f32 %v1088_v4, %v1058_v8  ;;  %v921_v31 = vmul.f32 %v1473_v41, %v889_v34  ;;  %1032 = vst [vmem:[%s2200_s3 + $0x68] sm:$0xff] %v1280_v30  ;;  %v1161_v47 = vadd.f32 %v1160_v22, %v1130_v29 }
 0x1a9   :  { %v1475_v46 = vpop.eup %1474  ;;  %v1133_v40 = vmul.f32 %v916_v15, %v916_v15  ;;  %v1065_v20 = vmul.f32 %v1473_v41, %v1473_v41 }
 0x1aa   :  { %1031 = vst [vmem:[%s2200_s3 + $0x60] sm:$0xff] %v1279_v42  ;;  %v1090_v50 = vadd.f32 %v1089_v21, %v1059_v43  ;;  %v922_v10 = vmul.f32 %v1475_v46, %v890_v36  ;;  %v1162_v25 = vadd.f32 %v1161_v47, %v1131_v39  ;;  %v1066_v32 = vmul.f32 %v1475_v46, %v1475_v46 }
 0x1ab   :  { %v1138_v13 = vmul.f32 %v921_v31, %v921_v31 }
 0x1ac   :  { %v1477_v53 = vpop.eup %1476  ;;  %v1091_v17 = vadd.f32 %v1090_v50, %v1060_v49  ;;  %v1282_v55 = vpack.c.bf16 %v922_v10, %v921_v31  ;;  %v1163_v57 = vadd.f32 %v1162_v25, %v1132_v1  ;;  %v1139_v7 = vmul.f32 %v922_v10, %v922_v10 }
 0x1ad   :  { %v919_v35 = vmul.f32 %v1477_v53, %v887_v5  ;;  %v1479_v62 = vpop.eup %1478  ;;  %v1063_v0 = vmul.f32 %v1477_v53, %v1477_v53 }
 0x1ae   :  { %v1092_v58 = vadd.f32 %v1091_v17, %v1061_v54  ;;  %1034 = vst [vmem:[%s2200_s3 + $0x78] sm:$0xff] %v1282_v55  ;;  %v920_v63 = vmul.f32 %v1479_v62, %v888_v27  ;;  %v1164_v48 = vadd.f32 %v1163_v57, %v1133_v40  ;;  %v1064_v33 = vmul.f32 %v1479_v62, %v1479_v62 }
 0x1af   :  { %v1136_v2 = vmul.f32 %v919_v35, %v919_v35 }
 0x1b0   :  { %v1093_v3 = vadd.f32 %v1092_v58, %v1062_v14  ;;  %v1165_v6 = vadd.f32 %v1164_v48, %v1134_v44  ;;  %v1281_v11 = vpack.c.bf16 %v920_v63, %v919_v35  ;;  %v1137_v59 = vmul.f32 %v920_v63, %v920_v63 }
 0x1b2   :  { %v1094_v60 = vadd.f32 %v1093_v3, %v1063_v0  ;;  %v1166_v12 = vadd.f32 %v1165_v6, %v1135_v51  ;;  %1033 = vst [vmem:[%s2200_s3 + $0x70] sm:$0xff] %v1281_v11 }
 0x1b4   :  { %v1095_v37 = vadd.f32 %v1094_v60, %v1064_v33  ;;  %v1167_v26 = vadd.f32 %v1166_v12, %v1136_v2 }
 0x1b6   :  { %v1096_v9 = vadd.f32 %v1095_v37, %v1065_v20  ;;  %v1168_v16 = vadd.f32 %v1167_v26, %v1137_v59 }
 0x1b8   :  { %v1097_v18 = vadd.f32 %v1096_v9, %v1066_v32  ;;  %v1169_v45 = vadd.f32 %v1168_v16, %v1138_v13 }
 0x1ba   :  { %1098 = vadd.xlane.f32.xlu0 %v1097_v18  ;;  %v1170_v56 = vadd.f32 %v1169_v45, %v1139_v7 }
 0x1bc   :  { %1171 = vadd.xlane.f32.xlu1 %v1170_v56 }
 0x247   :  { %v1099_v19 = vpop.xlane.xlu0 %1098 }
 0x248   :  { %v1100_v23 = vrot.slane %v1099_v19, 4 }
 0x249   :  { %v1172_v24 = vpop.xlane.xlu1 %1171 }
 0x24a   :  { %v1101_v52 = vadd.f32 %v1100_v23, %v1099_v19  ;;  %v1173_v61 = vrot.slane %v1172_v24, 4 }
 0x24c   :  { %v1102_v28 = vrot.slane %v1101_v52, 2  ;;  %v1174_v34 = vadd.f32 %v1173_v61, %v1172_v24 }
 0x24e   :  { %v1103_v38 = vadd.f32 %v1102_v28, %v1101_v52  ;;  %v1175_v8 = vrot.slane %v1174_v34, 2 }
 0x250   :  { %v1104_v22 = vrot.slane %v1103_v38, 1  ;;  %v1176_v15 = vadd.f32 %v1175_v8, %v1174_v34 }
 0x252   :  { %v1105_v4 = vadd.f32 %v1104_v22, %v1103_v38  ;;  %v1177_v41 = vrot.slane %v1176_v15, 1 }
 0x254   :  { %1411 = vpush %v1105_v4  ;;  %v1178_v29 = vadd.f32 %v1177_v41, %v1176_v15 }
 0x256   :  { %1413 = vpush %v1178_v29 }
 0x285   :  { %s1412_s3 = spop %1411 }
 0x286   :  { %s1107_s15 = smul.f32 3.0517578e-05, %s1412_s3 }
 0x287   :  { %s1414_s16 = spop %1413 }
 0x288   :  { %s1180_s17 = smul.f32 3.0517578e-05, %s1414_s16 }
 0x289   :  { %s1181_s18 = smul.f32 0.013, %s1107_s15 }
 0x28a   :  { %s1182_s19 = smul.f32 60.0, %s1180_s17 }
 0x28c   :  { %s1183_s20 = sadd.f32 %s1182_s19, %s1181_s18 }
 0x28e   :  { %1185 = sst [smem:[#allocation2]] %s1183_s20 }
 0x28f   :  { %1489 = shalt.err (!%p1486_p2)
}
 0x290   :  { %s1492_s28 = smov [#allocation2]  }
 0x291   :  { %1195 = dma.smem_to_hbm %s1492_s28, 16, %s2201_s4, [#allocation3]  }
 0x292   :  { %1490 = dma.done.wait [#allocation3], 16  }
 0x293   :  { %1491 = vsyncadd [#allocation3], 4294967280 }
 0x294   :  { %1201 = sfence }
 0x295   :  { %1202 = vsyncpa [#allocation3], 1 }

// kernel: kernel_net_autoencoder_forward.5
= control target key start
LH: loop header
LB: loop body
LE: loop exit
PB: predicated region body
PF: predicated region fallthrough
CT: control target
= control target key end

     0   :  { %12 = vsyncpa [#allocation3], 0  ;;  %s5495_s0 = inlined_call_operand.vmem [shape: bf16[512,128], index: 0, kind: input, shape index: {}]   ;;  %s5496_s1 = inlined_call_operand.vmem [shape: bf16[128,256], index: 1, kind: input, shape index: {}]   ;;  %s5497_s2 = inlined_call_operand.vmem [shape: f32[1,256], index: 2, kind: input, shape index: {}]   ;;  %s5498_s3 = inlined_call_operand.vmem [shape: bf16[256,128], index: 3, kind: input, shape index: {}]   ;;  %s5499_s4 = inlined_call_operand.vmem [shape: f32[1,128], index: 4, kind: input, shape index: {}]   ;;  %s5500_s5 = inlined_call_operand.hbm [shape: f32[512,128], index: 5, kind: output, shape index: {0}]   ;;  %s5501_s6 = inlined_call_operand.vmem [shape: f32[16,256], index: 6, kind: output, shape index: {1}]  }
   0x1   :  { %14 = vsyncpa [#allocation3 + $0x1], 0  ;;  %s3827_s21 = smov 0   ;;  %s3829_s22 = smov 0  }
   0x2   :  { %s3831_s23 = smov 0   ;;  %s3833_s24 = smov 0  }
   0x3 LB: > { %s3848_s25 = sadd.s32 4294967295, %s3784_s24   ;;  %s2772_s26 = sadd.s32 4294967294, %s3784_s24   ;;  %s3784_s24 = sphi %s3833_s24, %s5661_s24   ;;  %s3780_s23 = sphi %s3831_s23, %s5660_s23   ;;  %s3776_s22 = sphi %s3829_s22, %s5659_s22   ;;  %s3772_s21 = sphi %s3827_s21, %s5658_s21  }
   0x4   : > { %s3852_s27 = sadd.s32 1, %s3784_s24   ;;  %s137_s28 = sadd.s32 1, %s3780_s23 }
   0x5   : > { %s134_s29 = ssub.s32 %s3784_s24, %s3852_s27  ;;  %p147_p0 = scmp.ne.s32.totalorder %s3780_s23, %s3776_s22 }
   0x6   : > { %p135_p1 = scmp.eq.s32.totalorder %s134_s29, 0  ;;  %p148_p2 = scmp.eq.s32.totalorder %s3848_s25, 1 }
   0x7   : > { %p153_p3 = scmp.ne.s32.totalorder %s3776_s22, %s3772_s21  ;;  %p154_p4 = scmp.eq.s32.totalorder %s2772_s26, 1 }
   0x8   : > { %s3863_s30 = scalar_select %p135_p1, %s3780_s23, %s137_s28  }
   0x9   : > { %p3865_p5 = por %p148_p2, %p147_p0  ;;  %p3869_p6 = por %p154_p4, %p153_p3 }
   0xa   : > { %p2775_p7 = scmp.ge.s32.totalorder %s3784_s24, 1  ;;  %p219_p8 = scmp.lt.s32.totalorder %s3784_s24, 3 }
   0xc   : > { %p220_p9 = pnand %p2775_p7, %p219_p8 }
   0xe   : > { %223 = sbr.rel (%p220_p9) target bundleno = 875 (0x36b), region = 40 }
  0x15   : > { %v3218_v0 = vld [vmem:[%s5496_s1 + $0x4] ss:$8 sps:$4 sm:$0xff]   ;;  %s2777_s11 = sshll.u32 %s3848_s25, 5  ;;  %v3220_v1 = vld [vmem:[%s5496_s1] ss:$8 sps:$4 sm:$0xff]   ;;  %v3786_v2 = vmov 0   ;;  %v5502_v49 = vlaneseq }
  0x16   : > { %535 = vmatprep.mubr.bf16.mxu0 %v3786_v2  ;;  %p255_p10 = scmp.lt.s32.totalorder %s2777_s11, 63  ;;  %503 = vmatprep.subr.bf16.mxu0 %v3218_v0  ;;  %v3221_v3 = vld [vmem:[%s5496_s1 + $0x14] ss:$8 sps:$4 sm:$0xff]   ;;  %v3223_v4 = vld [vmem:[%s5496_s1 + $0x10] ss:$8 sps:$4 sm:$0xff]   ;;  %v3258_v30 = vld [vmem:[%s5498_s3 + $0x40] sm:$0xff]  }
  0x17   : > { %504 = vmatpush1.bf16.msra.mxu0 %v3220_v1  ;;  %v3224_v5 = vld [vmem:[%s5496_s1 + $0x24] ss:$8 sps:$4 sm:$0xff]   ;;  %v3226_v6 = vld [vmem:[%s5496_s1 + $0x20] ss:$8 sps:$4 sm:$0xff]   ;;  %v3227_v7 = vld [vmem:[%s5496_s1 + $0x34] ss:$8 sps:$4 sm:$0xff]   ;;  %3062 = vmatprep.subr.bf16.mxu1 %v3258_v30 }
  0x18   : > { %s5663_s11 = smov (!%p255_p10, %s2777_s11), 63  ;;  %505 = vmatprep.subr.bf16.mxu0 %v3221_v3  ;;  %v3229_v8 = vld [vmem:[%s5496_s1 + $0x30] ss:$8 sps:$4 sm:$0xff]   ;;  %v3230_v9 = vld [vmem:[%s5496_s1 + $0x44] ss:$8 sps:$4 sm:$0xff]   ;;  %v4010_v50 = vshrl.u32 %v5502_v49, 7 }
  0x19   : > { %s2778_s20 = sshll.u32 %s5663_s11, 2  ;;  %v3232_v10 = vld [vmem:[%s5496_s1 + $0x40] ss:$8 sps:$4 sm:$0xff]   ;;  %v3233_v11 = vld [vmem:[%s5496_s1 + $0x54] ss:$8 sps:$4 sm:$0xff]   ;;  %p261_p11 = scmp.lt.s32.totalorder %s3848_s25, 1 }
  0x1a   : > { %s3901_s13 = scalar_lea.vmem %s5495_s0, %s2778_s20  ;;  %v3235_v12 = vld [vmem:[%s5496_s1 + $0x50] ss:$8 sps:$4 sm:$0xff]   ;;  %v3236_v13 = vld [vmem:[%s5496_s1 + $0x64] ss:$8 sps:$4 sm:$0xff]   ;;  %v3238_v14 = vld [vmem:[%s5496_s1 + $0x60] ss:$8 sps:$4 sm:$0xff]  }
  0x1b   : > { %506 = vmatpush1.bf16.msra.mxu0 %v3223_v4  ;;  %v3239_v15 = vld [vmem:[%s5496_s1 + $0x74] ss:$8 sps:$4 sm:$0xff]   ;;  %v3241_v16 = vld [vmem:[%s5496_s1 + $0x70] ss:$8 sps:$4 sm:$0xff]   ;;  %v3242_v17 = vld [vmem:[%s3901_s13] sm:$0xff]   ;;  %5533 = vst [vmem:[#allocation5_spill] sm:$0xff] %v4010_v50 }
  0x1c   : > { %507 = vmatprep.subr.bf16.mxu0 %v3224_v5  ;;  %v3243_v18 = vld [vmem:[%s3901_s13 + $0x8] sm:$0xff]   ;;  %v3244_v19 = vld [vmem:[%s3901_s13 + $0x10] sm:$0xff]   ;;  %v3245_v20 = vld [vmem:[%s3901_s13 + $0x18] sm:$0xff]   ;;  %s3005_s20 = sshll.u32 %s3848_s25, 8  ;;  %v319_v51 = vsub.s32 0, %v4010_v50  ;;  %v323_v54 = vsub.s32 1, %v4010_v50 }
  0x1d   : > { %v3246_v21 = vld [vmem:[%s3901_s13 + $0x20] sm:$0xff]   ;;  %v3247_v22 = vld [vmem:[%s3901_s13 + $0x28] sm:$0xff]   ;;  %v3248_v23 = vld [vmem:[%s3901_s13 + $0x30] sm:$0xff]   ;;  %v4017_v53 = vstv %s3005_s20  ;;  %v1851_v55 = vadd.s32 8, %v4010_v50  ;;  %v1852_v60 = vadd.s32 16, %v4010_v50  ;;  %v1853_v61 = vadd.s32 24, %v4010_v50 }
  0x1e   : > { %v3249_v24 = vld [vmem:[%s3901_s13 + $0x38] sm:$0xff]   ;;  %v3250_v25 = vld [vmem:[%s3901_s13 + $0x40] sm:$0xff]   ;;  %v3251_v26 = vld [vmem:[%s3901_s13 + $0x48] sm:$0xff]   ;;  %v1883_v57 = vadd.s32 %v4017_v53, %v4010_v50  ;;  %s262_s28 = scalar_select %p261_p11, %s3848_s25, 1 }
  0x1f   : > { %508 = vmatpush1.bf16.msra.mxu0 %v3226_v6  ;;  %v3252_v27 = vld [vmem:[%s3901_s13 + $0x50] sm:$0xff]   ;;  %v3253_v28 = vld [vmem:[%s3901_s13 + $0x58] sm:$0xff]   ;;  %v3254_v29 = vld [vmem:[%s3901_s13 + $0x60] sm:$0xff]   ;;  %v1884_v59 = vadd.s32 %v4017_v53, %v1851_v55  ;;  %v1885_v3 = vadd.s32 %v4017_v53, %v1852_v60  ;;  %s244_s11 = sand.u32 1, %s3776_s22   ;;  %s3061_s18 = sshll.u32 %s3848_s25, 12 }
  0x20   : > { %509 = vmatprep.subr.bf16.mxu0 %v3227_v7  ;;  %v3259_v31 = vld [vmem:[%s5498_s3] sm:$0xff]   ;;  %v3255_v32 = vld [vmem:[%s3901_s13 + $0x68] sm:$0xff]   ;;  %v3262_v35 = vld [vmem:[%s5498_s3 + $0x50] sm:$0xff]   ;;  %vm1915_vm0 = vcmp.lt.s32.totalorder %v1883_v57, 512  ;;  %v1886_v7 = vadd.s32 %v4017_v53, %v1853_v61  ;;  %s3060_s29 = sshll.u32 %s262_s28, 4  ;;  %s2776_s16 = sshll.u32 %s244_s11, 8 }
  0x21   : > { %3063 = vmatpush3.bf16.msra.mxu1 %v3259_v31  ;;  %v3260_v33 = vld [vmem:[%s5498_s3 + $0x48] sm:$0xff]   ;;  %v3256_v36 = vld [vmem:[%s3901_s13 + $0x70] sm:$0xff]   ;;  %v3257_v37 = vld [vmem:[%s3901_s13 + $0x78] sm:$0xff]   ;;  %vm1916_vm1 = vcmp.lt.s32.totalorder %v1884_v59, 512  ;;  %vm1917_vm2 = vcmp.lt.s32.totalorder %v1885_v3, 512  ;;  %v1857_v31 = vadd.s32 56, %v4010_v50  ;;  %s5001_s12 = scalar_lea.vmem %s5501_s6, %s3060_s29  ;;  %s5446_s26 = scalar_lea.hbm %s5500_s5, %s3061_s18 }
  0x22   : > { %v3261_v34 = vld [vmem:[%s5498_s3 + $0x8] sm:$0xff]   ;;  %3064 = vmatprep.subr.bf16.mxu1 %v3260_v33  ;;  %v3263_v38 = vld [vmem:[%s5498_s3 + $0x10] sm:$0xff]   ;;  %v3264_v39 = vld [vmem:[%s5498_s3 + $0x58] sm:$0xff]   ;;  %vm1918_vm3 = vcmp.lt.s32.totalorder %v1886_v7, 512  ;;  %s5379_s17 = scalar_lea.vmem [#allocation2], %s2776_s16  ;;  %s5454_s28 = scalar_lea.sflag [#allocation3], %s244_s11 }
  0x23   : > { %510 = vmatpush1.bf16.msra.mxu0 %v3229_v8  ;;  %v3265_v40 = vld [vmem:[%s5498_s3 + $0x18] sm:$0xff]   ;;  %v3266_v41 = vld [vmem:[%s5498_s3 + $0x60] sm:$0xff]   ;;  %v3268_v43 = vld [vmem:[%s5498_s3 + $0x68] sm:$0xff]   ;;  %v1854_v8 = vadd.s32 32, %v4010_v50  ;;  %s2682_s19 = sshll.u32 %s5379_s17, 4  ;;  %s3789_s29 = smov [#allocation2]   ;;  %s5448_s19 = int_to_ptr.vmem [resolvable:$true] %s2682_s19 }
  0x24   : > { %511 = vmatprep.subr.bf16.mxu0 %v3230_v9  ;;  %v3267_v42 = vld [vmem:[%s5498_s3 + $0x20] sm:$0xff]   ;;  %v3269_v44 = vld [vmem:[%s5498_s3 + $0x28] sm:$0xff]   ;;  %v3270_v45 = vld [vmem:[%s5498_s3 + $0x70] sm:$0xff]   ;;  %s3722_s25 = scalar_lea.vmem %s5448_s19, 4096  ;;  %s3726_s9 = sshll.u32 %s3789_s29, 4  ;;  %s3727_s9 = int_to_ptr.vmem [resolvable:$false] %s3726_s9 }
  0x25   : > { %3065 = vmatpush3.bf16.msra.mxu1 %v3261_v34  ;;  %v3271_v46 = vld [vmem:[%s5498_s3 + $0x30] sm:$0xff]   ;;  %v3272_v47 = vld [vmem:[%s5498_s3 + $0x78] sm:$0xff]   ;;  %v315_v52 = vld [vmem:[%s5497_s2] sm:$0x3]  ;;  %p3723_p12 = scmp.ne.s32.totalorder %s5448_s19, %s3722_s25  ;;  %s3728_s10 = scalar_lea.vmem %s3727_s9, 8192 }
  0x26   : > { %3066 = vmatprep.subr.bf16.mxu1 %v3262_v35  ;;  %v3273_v48 = vld [vmem:[%s5498_s3 + $0x38] sm:$0xff]   ;;  %v4021_v56 = vrot.slane %v315_v52, %v319_v51  ;;  %v4025_v58 = vrot.slane %v315_v52, %v323_v54  ;;  %v1858_v35 = vadd.s32 64, %v4010_v50  ;;  %p3729_p1 = scmp.lt.s32.totalorder %s5448_s19, %s3727_s9  ;;  %p3730_p2 = scmp.lt.s32.totalorder %s3728_s10, %s3722_s25 }
  0x27   : > { %512 = vmatpush1.bf16.msra.mxu0 %v3232_v10  ;;  %p3724_p13 = pnand %p3723_p12, %p3865_p5 }
  0x28   : > { %513 = vmatprep.subr.bf16.mxu0 %v3233_v11  ;;  %v1855_v11 = vadd.s32 40, %v4010_v50  ;;  %p3731_p3 = por %p3730_p2, %p3729_p1 }
  0x29   : > { %3067 = vmatpush3.bf16.msra.mxu1 %v3263_v38  ;;  %p3725_p0 = pneg %p3724_p13 }
  0x2a   : > { %3068 = vmatprep.subr.bf16.mxu1 %v3264_v39 }
  0x2b   : > { %514 = vmatpush1.bf16.msra.mxu0 %v3235_v12  ;;  %v1856_v12 = vadd.s32 48, %v4010_v50  ;;  %p3732_p4 = pnand %p3731_p3, %p3725_p0 }
  0x2c   : > { %515 = vmatprep.subr.bf16.mxu0 %v3236_v13 }
  0x2d   : > { %3069 = vmatpush3.bf16.msra.mxu1 %v3265_v40 }
  0x2e   : > { %3070 = vmatprep.subr.bf16.mxu1 %v3266_v41 }
  0x2f   : > { %516 = vmatpush1.bf16.msra.mxu0 %v3238_v14  ;;  %v5503_v14 = vmov 0.0  }
  0x30   : > { %517 = vmatprep.subr.bf16.mxu0 %v3239_v15  ;;  %v4043_v15 = vsel %vm1915_vm0, 1.0, %v5503_v14  ;;  %v4083_v52 = vsel %vm1918_vm3, 1.0, %v5503_v14 }
  0x31   : > { %3071 = vmatpush3.bf16.msra.mxu1 %v3267_v42 }
  0x32   : > { %3072 = vmatprep.subr.bf16.mxu1 %v3268_v43  ;;  %v1890_v43 = vadd.s32 %v4017_v53, %v1857_v31 }
  0x33   : > { %518 = vmatpush1.bf16.msra.mxu0 %v3241_v16 }
  0x34   : > { %vm1922_vm7 = vcmp.lt.s32.totalorder %v1890_v43, 512 }
  0x35   : > { %3073 = vmatpush3.bf16.msra.mxu1 %v3269_v44  ;;  %v4073_v44 = vsel %vm1917_vm2, 1.0, %v5503_v14 }
  0x36   : > { %536 = vmatmul.mubr.bf16.vlgmr.msra.gmra.mrb[0].mxu0 %v3242_v17  ;;  %3074 = vmatprep.subr.bf16.mxu1 %v3270_v45 }
  0x37   : > { %545 = vmatprep.mubr.bf16.mxu0 %v3786_v2 }
  0x39   : > { %3075 = vmatpush3.bf16.msra.mxu1 %v3271_v46 }
  0x3a   : > { %3076 = vmatprep.subr.bf16.mxu1 %v3272_v47  ;;  %v1891_v47 = vadd.s32 %v4017_v53, %v1858_v35  ;;  %v4127_v35 = vadd.s32 88, %v4010_v50 }
  0x3c   : > { %vm1923_vm8 = vcmp.lt.s32.totalorder %v1891_v47, 512 }
  0x3d   : > { %3077 = vmatpush3.bf16.msra.mxu1 %v3273_v48 }
  0x3e   : > { %546 = vmatmul.mubr.bf16.gmra.mrb[4].mxu0 %v3243_v18  ;;  %v4049_v18 = vsel %vm1916_vm1, 1.0, %v5503_v14 }
  0x3f   : > { %555 = vmatprep.mubr.bf16.mxu0 %v3786_v2 }
  0x46   : > { %556 = vmatmul.mubr.bf16.gmra.mrb[8].mxu0 %v3244_v19 }
  0x47   : > { %565 = vmatprep.mubr.bf16.mxu0 %v3786_v2 }
  0x4e   : > { %566 = vmatmul.mubr.bf16.gmra.mrb[12].mxu0 %v3245_v20 }
  0x4f   : > { %575 = vmatprep.mubr.bf16.mxu0 %v3786_v2 }
  0x56   : > { %576 = vmatmul.mubr.bf16.gmra.mrb[16].mxu0 %v3246_v21 }
  0x57   : > { %585 = vmatprep.mubr.bf16.mxu0 %v3786_v2 }
  0x5e   : > { %586 = vmatmul.mubr.bf16.gmra.mrb[20].mxu0 %v3247_v22  ;;  %v1887_v22 = vadd.s32 %v4017_v53, %v1854_v8  ;;  %v1859_v8 = vadd.s32 72, %v4010_v50 }
  0x5f   : > { %595 = vmatprep.mubr.bf16.mxu0 %v3786_v2 }
  0x60   : > { %vm1919_vm4 = vcmp.lt.s32.totalorder %v1887_v22, 512  ;;  %v4121_v31 = vadd.s32 %v4017_v53, %v1859_v8 }
  0x61   : > { %v4087_v54 = vsel %vm1919_vm4, 1.0, %v5503_v14 }
  0x62   : > { %5534 = vst [vmem:[#allocation6_spill] sm:$0xff] %v4087_v54  ;;  %vm1924_vm9 = vcmp.lt.s32.totalorder %v4121_v31, 512 }
  0x66   : > { %596 = vmatmul.mubr.bf16.gmra.mrb[24].mxu0 %v3248_v23 }
  0x67   : > { %605 = vmatprep.mubr.bf16.mxu0 %v3786_v2 }
  0x6e   : > { %606 = vmatmul.mubr.bf16.gmra.mrb[28].mxu0 %v3249_v24 }
  0x6f   : > { %615 = vmatprep.mubr.bf16.mxu0 %v3786_v2 }
  0x76   : > { %616 = vmatmul.mubr.bf16.gmra.mrb[32].mxu0 %v3250_v25 }
  0x77   : > { %625 = vmatprep.mubr.bf16.mxu0 %v3786_v2 }
  0x7e   : > { %626 = vmatmul.mubr.bf16.gmra.mrb[36].mxu0 %v3251_v26  ;;  %v1888_v26 = vadd.s32 %v4017_v53, %v1855_v11 }
  0x7f   : > { %635 = vmatprep.mubr.bf16.mxu0 %v3786_v2 }
  0x80   : > { %vm1920_vm5 = vcmp.lt.s32.totalorder %v1888_v26, 512 }
  0x81   : > { %v4094_v60 = vsel %vm1920_vm5, 1.0, %v5503_v14 }
  0x82   : > { %5535 = vst [vmem:[#allocation7_spill] sm:$0xff] %v4094_v60 }
  0x86   : > { %636 = vmatmul.mubr.bf16.gmra.mrb[40].mxu0 %v3252_v27  ;;  %v1889_v27 = vadd.s32 %v4017_v53, %v1856_v12 }
  0x87   : > { %645 = vmatprep.mubr.bf16.mxu0 %v3786_v2 }
  0x88   : > { %vm1921_vm6 = vcmp.lt.s32.totalorder %v1889_v27, 512 }
  0x89   : > { %v4097_v61 = vsel %vm1921_vm6, 1.0, %v5503_v14 }
  0x8a   : > { %5536 = vst [vmem:[#allocation8_spill] sm:$0xff] %v4097_v61 }
  0x8e   : > { %646 = vmatmul.mubr.bf16.gmra.mrb[44].mxu0 %v3253_v28 }
  0x8f   : > { %655 = vmatprep.mubr.bf16.mxu0 %v3786_v2 }
  0x96   : > { %656 = vmatmul.mubr.bf16.gmra.mrb[48].mxu0 %v3254_v29 }
  0x97   : > { %665 = vmatprep.mubr.bf16.mxu0 %v3786_v2 }
  0x9e   : > { %666 = vmatmul.mubr.bf16.gmra.mrb[52].mxu0 %v3255_v32 }
  0x9f   : > { %675 = vmatprep.mubr.bf16.mxu0 %v3786_v2 }
  0xa6   : > { %676 = vmatmul.mubr.bf16.gmra.mrb[56].mxu0 %v3256_v36 }
  0xa7   : > { %685 = vmatprep.mubr.bf16.mxu0 %v3786_v2 }
  0xae   : > { %686 = vmatmul.mubr.bf16.gmra.mrb[60].mxu0 %v3257_v37 }
 0x109   : > { %v537_v62 = vpop.f32.mrb[0].mxu0 }
 0x10a   : > { %v538_v63 = vadd.f32 %v537_v62, %v4021_v56  ;;  %v539_v0 = vpop.f32.mrb[1].mxu0 }
 0x10b   : > { %v540_v1 = vadd.f32 %v539_v0, %v4025_v58  ;;  %v541_v2 = vpop.f32.mrb[2].mxu0 }
 0x10c   : > { %v2813_v4 = vclamps-f32 %v538_v63, 13.81551  ;;  %v542_v5 = vadd.f32 %v541_v2, %v4021_v56  ;;  %v543_v6 = vpop.f32.mrb[3].mxu0 }
 0x10d   : > { %v2814_v9 = vclamps-f32 %v540_v1, 13.81551  ;;  %v544_v10 = vadd.f32 %v543_v6, %v4025_v58 }
 0x10e   : > { %v4039_v13 = vsub.f32 0.0, %v2813_v4  ;;  %v2815_v16 = vclamps-f32 %v542_v5, 13.81551 }
 0x10f   : > { %v4045_v17 = vsub.f32 0.0, %v2814_v9  ;;  %v2816_v19 = vclamps-f32 %v544_v10, 13.81551 }
 0x110   : > { %v888_v20 = vmul.f32 1.442695, %v4039_v13  ;;  %v4052_v21 = vsub.f32 0.0, %v2815_v16 }
 0x111   : > { %v890_v23 = vmul.f32 1.442695, %v4045_v17  ;;  %v4056_v24 = vsub.f32 0.0, %v2816_v19  ;;  %v547_v25 = vpop.f32.mrb[4].mxu0 }
 0x112   : > { %3274 = vpow2.f32 %v888_v20  ;;  %v892_v28 = vmul.f32 1.442695, %v4052_v21  ;;  %v548_v29 = vadd.f32 %v547_v25, %v4021_v56  ;;  %v549_v30 = vpop.f32.mrb[5].mxu0 }
 0x113   : > { %3276 = vpow2.f32 %v890_v23  ;;  %v894_v32 = vmul.f32 1.442695, %v4056_v24  ;;  %v550_v33 = vadd.f32 %v549_v30, %v4025_v58  ;;  %v551_v34 = vpop.f32.mrb[6].mxu0  ;;  %v4110_v23 = vsel %vm1922_vm7, 1.0, %v5503_v14 }
 0x114   : > { %3278 = vpow2.f32 %v892_v28  ;;  %v2817_v36 = vclamps-f32 %v548_v29, 13.81551  ;;  %v552_v37 = vadd.f32 %v551_v34, %v4021_v56  ;;  %v553_v38 = vpop.f32.mrb[7].mxu0  ;;  %5538 = vst [vmem:[#allocation10_spill] sm:$0xff] %v4110_v23  ;;  %v4118_v30 = vsel %vm1923_vm8, 1.0, %v5503_v14 }
 0x115   : > { %3280 = vpow2.f32 %v894_v32  ;;  %v2818_v39 = vclamps-f32 %v550_v33, 13.81551  ;;  %v554_v40 = vadd.f32 %v553_v38, %v4025_v58  ;;  %5541 = vst [vmem:[#allocation13_spill] sm:$0xff] %v4118_v30  ;;  %v4124_v34 = vadd.s32 80, %v4010_v50 }
 0x116   : > { %v4068_v41 = vsub.f32 0.0, %v2817_v36  ;;  %v2819_v42 = vclamps-f32 %v552_v37, 13.81551 }
 0x117   : > { %v4075_v45 = vsub.f32 0.0, %v2818_v39  ;;  %v2820_v46 = vclamps-f32 %v554_v40, 13.81551  ;;  %v4134_v39 = vadd.s32 96, %v4010_v50  ;;  %v4314_v31 = vadd.s32 %v4017_v53, %v4124_v34 }
 0x118   : > { %v896_v48 = vmul.f32 1.442695, %v4068_v41  ;;  %v4079_v51 = vsub.f32 0.0, %v2819_v42 }
 0x119   : > { %v898_v55 = vmul.f32 1.442695, %v4075_v45  ;;  %v4090_v57 = vsub.f32 0.0, %v2820_v46  ;;  %v557_v59 = vpop.f32.mrb[8].mxu0  ;;  %5542 = vst [vmem:[#allocation14_spill] sm:$0xff] %v4134_v39  ;;  %vm1925_vm10 = vcmp.lt.s32.totalorder %v4314_v31, 512 }
 0x11a   : > { %3282 = vpow2.f32 %v896_v48  ;;  %v900_v62 = vmul.f32 1.442695, %v4079_v51  ;;  %v558_v63 = vadd.f32 %v557_v59, %v4021_v56  ;;  %v559_v0 = vpop.f32.mrb[9].mxu0 }
 0x11b   : > { %3284 = vpow2.f32 %v898_v55  ;;  %v902_v1 = vmul.f32 1.442695, %v4090_v57  ;;  %v560_v2 = vadd.f32 %v559_v0, %v4025_v58  ;;  %v561_v3 = vpop.f32.mrb[10].mxu0 }
 0x11c   : > { %v3275_v4 = vpop.eup %3274  ;;  %3286 = vpow2.f32 %v900_v62  ;;  %v2821_v5 = vclamps-f32 %v558_v63, 13.81551  ;;  %v562_v6 = vadd.f32 %v561_v3, %v4021_v56  ;;  %v563_v7 = vpop.f32.mrb[11].mxu0 }
 0x11d   : > { %v3277_v9 = vpop.eup %3276  ;;  %v1016_v10 = vadd.f32 1.0, %v3275_v4  ;;  %3288 = vpow2.f32 %v902_v1  ;;  %v2822_v11 = vclamps-f32 %v560_v2, 13.81551  ;;  %v564_v12 = vadd.f32 %v563_v7, %v4025_v58 }
 0x11e   : > { %v3279_v16 = vpop.eup %3278  ;;  %v1017_v19 = vadd.f32 1.0, %v3277_v9  ;;  %v4106_v20 = vsub.f32 0.0, %v2821_v5  ;;  %v2823_v22 = vclamps-f32 %v562_v6, 13.81551 }
 0x11f   : > { %v3281_v25 = vpop.eup %3280  ;;  %3290 = vrcp.f32 %v1016_v10  ;;  %v1018_v26 = vadd.f32 1.0, %v3279_v16  ;;  %v4112_v27 = vsub.f32 0.0, %v2822_v11  ;;  %v2824_v28 = vclamps-f32 %v564_v12, 13.81551 }
 0x120   : > { %5537 = vst [vmem:[#allocation9_spill] sm:$0xff] %v4106_v20  ;;  %3292 = vlog2.f32 %v1016_v10  ;;  %v4114_v29 = vsub.f32 0.0, %v2823_v22  ;;  %v1019_v32 = vadd.f32 1.0, %v3281_v25  ;;  %v4130_v36 = vmul.f32 1.442695, %v4106_v20 }
 0x121   : > { %5539 = vst [vmem:[#allocation11_spill] sm:$0xff] %v4112_v27  ;;  %3294 = vrcp.f32 %v1017_v19  ;;  %v567_v33 = vpop.f32.mrb[12].mxu0  ;;  %v4137_v40 = vmul.f32 1.442695, %v4112_v27  ;;  %v4139_v42 = vsub.f32 0.0, %v2824_v28 }
 0x122   : > { %5540 = vst [vmem:[#allocation12_spill] sm:$0xff] %v4114_v29  ;;  %3296 = vlog2.f32 %v1017_v19  ;;  %v568_v37 = vadd.f32 %v567_v33, %v4021_v56  ;;  %v569_v38 = vpop.f32.mrb[13].mxu0  ;;  %v4143_v48 = vmul.f32 1.442695, %v4114_v29 }
 0x123   : > { %3298 = vrcp.f32 %v1018_v26  ;;  %5543 = vst [vmem:[#allocation15_spill] sm:$0xff] %v4139_v42  ;;  %v570_v43 = vadd.f32 %v569_v38, %v4025_v58  ;;  %v571_v46 = vpop.f32.mrb[14].mxu0  ;;  %v4152_v12 = vmul.f32 1.442695, %v4139_v42 }
 0x124   : > { %v3283_v47 = vpop.eup %3282  ;;  %3300 = vlog2.f32 %v1018_v26  ;;  %v2825_v55 = vclamps-f32 %v568_v37, 13.81551  ;;  %v572_v59 = vadd.f32 %v571_v46, %v4021_v56  ;;  %v573_v62 = vpop.f32.mrb[15].mxu0 }
 0x125   : > { %v3285_v63 = vpop.eup %3284  ;;  %3302 = vrcp.f32 %v1019_v32  ;;  %v1020_v0 = vadd.f32 1.0, %v3283_v47  ;;  %v2826_v1 = vclamps-f32 %v570_v43, 13.81551  ;;  %v574_v2 = vadd.f32 %v573_v62, %v4025_v58 }
 0x126   : > { %v3287_v3 = vpop.eup %3286  ;;  %3304 = vlog2.f32 %v1019_v32  ;;  %v1021_v4 = vadd.f32 1.0, %v3285_v63  ;;  %v4147_v5 = vsub.f32 0.0, %v2825_v55  ;;  %v2827_v6 = vclamps-f32 %v572_v59, 13.81551 }
 0x127   : > { %v3289_v7 = vpop.eup %3288  ;;  %3306 = vrcp.f32 %v1020_v0  ;;  %v1022_v8 = vadd.f32 1.0, %v3287_v3  ;;  %v4149_v9 = vsub.f32 0.0, %v2826_v1  ;;  %v2828_v10 = vclamps-f32 %v574_v2, 13.81551 }
 0x128   : > { %5544 = vst [vmem:[#allocation16_spill] sm:$0xff] %v4147_v5  ;;  %3308 = vlog2.f32 %v1020_v0  ;;  %v1023_v11 = vadd.f32 1.0, %v3289_v7  ;;  %v4154_v16 = vsub.f32 0.0, %v2827_v6  ;;  %v4159_v22 = vmul.f32 1.442695, %v4147_v5 }
 0x129   : > { %5545 = vst [vmem:[#allocation17_spill] sm:$0xff] %v4149_v9  ;;  %v4156_v19 = vpop.eup %3290  ;;  %3310 = vrcp.f32 %v1021_v4  ;;  %v4162_v25 = vmul.f32 1.442695, %v4149_v9  ;;  %v4164_v26 = vsub.f32 0.0, %v2828_v10  ;;  %v577_v28 = vpop.f32.mrb[16].mxu0 }
 0x12a   : > { %5546 = vst [vmem:[#allocation18_spill] sm:$0xff] %v4154_v16  ;;  %v3293_v32 = vpop.eup %3292  ;;  %v1528_v33 = vsub.f32 1.0, %v4156_v19  ;;  %3312 = vlog2.f32 %v1021_v4  ;;  %v4168_v37 = vmul.f32 1.442695, %v4154_v16  ;;  %v578_v38 = vadd.f32 %v577_v28, %v4021_v56  ;;  %v579_v43 = vpop.f32.mrb[17].mxu0 }
 0x12b   : > { %5547 = vst [vmem:[#allocation19_spill] sm:$0xff] %v4164_v26  ;;  %v4171_v46 = vpop.eup %3294  ;;  %v1209_v47 = vmul.f32 0.6931472, %v3293_v32  ;;  %3314 = vrcp.f32 %v1022_v8  ;;  %v4174_v55 = vmul.f32 1.442695, %v4164_v26  ;;  %v4177_v59 = vadd.f32 %v579_v43, %v4025_v58  ;;  %v581_v62 = vpop.f32.mrb[18].mxu0 }
 0x12c   : > { %v3297_v63 = vpop.eup %3296  ;;  %v1529_v0 = vsub.f32 1.0, %v4171_v46  ;;  %3316 = vlog2.f32 %v1022_v8  ;;  %v2829_v1 = vclamps-f32 %v578_v38, 13.81551  ;;  %v4181_v2 = vadd.f32 %v581_v62, %v4021_v56  ;;  %v4183_v3 = vpop.f32.mrb[19].mxu0 }
 0x12d   : > { %v4185_v4 = vpop.eup %3298  ;;  %v1336_v6 = vsub.f32 0.0, %v1209_v47  ;;  %v1592_v7 = vsub.f32 %v4039_v13, %v1209_v47  ;;  %v1211_v10 = vmul.f32 0.6931472, %v3297_v63  ;;  %3318 = vrcp.f32 %v1023_v11 }
 0x12e   : > { %v3301_v28 = vpop.eup %3300  ;;  %v1530_v32 = vsub.f32 1.0, %v4185_v4  ;;  %3320 = vlog2.f32 %v1023_v11  ;;  %v4189_v43 = vsub.f32 0.0, %v2829_v1 }
 0x12f   : > { %v4192_v38 = vpop.eup %3302  ;;  %v2877_v62 = vadd.f32 3.912023, %v1336_v6  ;;  %v2941_v49 = vadd.f32 0.020202707, %v1592_v7  ;;  %v1337_v14 = vsub.f32 0.0, %v1211_v10  ;;  %v1593_v30 = vsub.f32 %v4045_v17, %v1211_v10 }
 0x130   : > { %5548 = vst [vmem:[#allocation20_spill] sm:$0xff] %v4189_v43  ;;  %v3305_v23 = vpop.eup %3304  ;;  %v1213_v26 = vmul.f32 0.6931472, %v3301_v28  ;;  %v1531_v13 = vsub.f32 1.0, %v4192_v38  ;;  %3322 = vpow2.f32 %v4130_v36  ;;  %v4198_v47 = vmul.f32 1.442695, %v4189_v43 }
 0x131   : > { %v4200_v11 = vpop.eup %3306  ;;  %v1464_v63 = vmul.f32 %v4156_v19, %v2877_v62  ;;  %v1720_v1 = vmul.f32 %v2941_v49, %v1528_v33  ;;  %v2878_v8 = vadd.f32 3.912023, %v1337_v14  ;;  %v2942_v6 = vadd.f32 0.020202707, %v1593_v30  ;;  %v4203_v7 = vpop.f32.mrb[20].mxu0 }
 0x132   : > { %v3309_v61 = vpop.eup %3308  ;;  %v1338_v17 = vsub.f32 0.0, %v1213_v26  ;;  %v1594_v10 = vsub.f32 %v4052_v21, %v1213_v26  ;;  %v1215_v28 = vmul.f32 0.6931472, %v3305_v23  ;;  %v1532_v16 = vsub.f32 1.0, %v4200_v11  ;;  %v4207_v36 = vpop.f32.mrb[21].mxu0 }
 0x133   : > { %v4209_v43 = vpop.eup %3310  ;;  %v1784_v60 = vadd.f32 %v1720_v1, %v1464_v63  ;;  %v1465_v9 = vmul.f32 %v4171_v46, %v2878_v8  ;;  %v1721_v62 = vmul.f32 %v2942_v6, %v1529_v0  ;;  %v1217_v49 = vmul.f32 0.6931472, %v3309_v61  ;;  %v4212_v14 = vpop.f32.mrb[22].mxu0 }
 0x134   : > { %v3313_v30 = vpop.eup %3312  ;;  %v2879_v33 = vadd.f32 3.912023, %v1338_v17  ;;  %v2943_v5 = vadd.f32 0.020202707, %v1594_v10  ;;  %v1339_v42 = vsub.f32 0.0, %v1215_v28  ;;  %v1595_v21 = vsub.f32 %v4056_v24, %v1215_v28  ;;  %v4215_v23 = vpop.f32.mrb[23].mxu0 }
 0x135   : > { %v4217_v26 = vpop.eup %3314  ;;  %v2013_v29 = vmul.f32 %v4043_v15, %v1784_v60  ;;  %v1785_v27 = vadd.f32 %v1721_v62, %v1465_v9  ;;  %v1340_v63 = vsub.f32 0.0, %v1217_v49  ;;  %v1596_v8 = vsub.f32 %v4068_v41, %v1217_v49 }
 0x136   : > { %v3317_v0 = vpop.eup %3316  ;;  %v1466_v61 = vmul.f32 %v4185_v4, %v2879_v33  ;;  %v1722_v1 = vmul.f32 %v2943_v5, %v1530_v32  ;;  %v2880_v6 = vadd.f32 3.912023, %v1339_v42  ;;  %v2944_v17 = vadd.f32 0.020202707, %v1595_v21 }
 0x137   : > { %v4222_v10 = vpop.eup %3318  ;;  %v2014_v24 = vmul.f32 %v4043_v15, %v1785_v27  ;;  %v2881_v28 = vadd.f32 3.912023, %v1340_v63  ;;  %v2945_v54 = vadd.f32 0.020202707, %v1596_v8  ;;  %v1219_v20 = vmul.f32 0.6931472, %v3313_v30 }
 0x138   : > { %v3321_v50 = vpop.eup %3320  ;;  %v1786_v39 = vadd.f32 %v1722_v1, %v1466_v61  ;;  %v1467_v60 = vmul.f32 %v4192_v38, %v2880_v6  ;;  %v1723_v9 = vmul.f32 %v2944_v17, %v1531_v13  ;;  %v1533_v41 = vsub.f32 1.0, %v4209_v43 }
 0x139   : > { %v1468_v62 = vmul.f32 %v4200_v11, %v2881_v28  ;;  %v1724_v49 = vmul.f32 %v2945_v54, %v1532_v16  ;;  %v1341_v5 = vsub.f32 0.0, %v1219_v20  ;;  %v1597_v42 = vsub.f32 %v4075_v45, %v1219_v20  ;;  %v4229_v32 = vpop.f32.mrb[24].mxu0 }
 0x13a   : > { %v3323_v33 = vpop.eup %3322  ;;  %v2015_v15 = vmul.f32 %v4049_v18, %v1786_v39  ;;  %v1787_v27 = vadd.f32 %v1723_v9, %v1467_v60  ;;  %v1221_v30 = vmul.f32 0.6931472, %v3317_v0  ;;  %v1534_v21 = vsub.f32 1.0, %v4217_v26  ;;  %v4233_v63 = vpop.f32.mrb[25].mxu0 }
 0x13b   : > { %v1788_v13 = vadd.f32 %v1724_v49, %v1468_v62  ;;  %v2882_v8 = vadd.f32 3.912023, %v1341_v5  ;;  %v2946_v61 = vadd.f32 0.020202707, %v1597_v42  ;;  %v1223_v1 = vmul.f32 0.6931472, %v3321_v50 }
 0x13c   : > { %v2077_v6 = vadd.f32 %v2015_v15, %v2013_v29  ;;  %v2016_v54 = vmul.f32 %v4049_v18, %v1787_v27  ;;  %v1342_v16 = vsub.f32 0.0, %v1221_v30  ;;  %v1598_v45 = vsub.f32 %v4079_v51, %v1221_v30  ;;  %v4237_v20 = vpop.f32.mrb[26].mxu0 }
 0x13d   : > { %v2017_v39 = vmul.f32 %v4073_v44, %v1788_v13  ;;  %v1469_v0 = vmul.f32 %v4209_v43, %v2882_v8  ;;  %v1725_v17 = vmul.f32 %v2946_v61, %v1533_v41  ;;  %v1343_v28 = vsub.f32 0.0, %v1223_v1  ;;  %v4241_v60 = vpop.f32.mrb[27].mxu0 }
 0x13e   : > { %v2114_v9 = vadd.f32 %v2016_v54, %v2014_v24  ;;  %v2883_v62 = vadd.f32 3.912023, %v1342_v16  ;;  %v2947_v49 = vadd.f32 0.020202707, %v1598_v45  ;;  %v1535_v50 = vsub.f32 1.0, %v4222_v10 }
 0x13f   : > { %v2078_v29 = vadd.f32 %v2077_v6, %v2017_v39  ;;  %v1789_v18 = vadd.f32 %v1725_v17, %v1469_v0  ;;  %v2884_v5 = vadd.f32 3.912023, %v1343_v28  ;;  %v1599_v51 = vsub.f32 %v4090_v57, %v1223_v1 }
 0x140   : > { %v1470_v42 = vmul.f32 %v4217_v26, %v2883_v62  ;;  %v1726_v15 = vmul.f32 %v2947_v49, %v1534_v21  ;;  %v1024_v27 = vadd.f32 1.0, %v3323_v33  ;;  %3324 = vpow2.f32 %v4137_v40 }
 0x141   : > { %v2018_v41 = vmul.f32 %v4073_v44, %v1789_v18  ;;  %v1471_v24 = vmul.f32 %v4222_v10, %v2884_v5  ;;  %v2948_v30 = vadd.f32 0.020202707, %v1599_v51  ;;  %3326 = vpow2.f32 %v4143_v48  ;;  %v4251_v13 = vpop.f32.mrb[28].mxu0 }
 0x142   : > { %v1790_v8 = vadd.f32 %v1726_v15, %v1470_v42  ;;  %3328 = vrcp.f32 %v1024_v27  ;;  %v5549_v57 = vclamps-f32 %v4177_v59, 13.81551  ;;  %v2831_v21 = vclamps-f32 %v4181_v2, 13.81551  ;;  %v4258_v33 = vpop.f32.mrb[29].mxu0 }
 0x143   : > { %v2115_v40 = vadd.f32 %v2114_v9, %v2018_v41  ;;  %v1727_v1 = vmul.f32 %v2948_v30, %v1535_v50  ;;  %3330 = vlog2.f32 %v1024_v27  ;;  %v584_v44 = vadd.f32 %v4183_v3, %v4025_v58  ;;  %v4262_v6 = vpop.f32.mrb[30].mxu0  ;;  %v5559_v27 = vld [vmem:[#allocation5_spill] sm:$0xff] }
 0x144   : > { %v4255_v61 = vsub.f32 0.0, %v5549_v57  ;;  %v2019_v48 = vmul.f32 %v4083_v52, %v1790_v8  ;;  %3332 = vpow2.f32 %v4152_v12  ;;  %v4267_v54 = vsub.f32 0.0, %v2831_v21  ;;  %v4269_v16 = vpop.f32.mrb[31].mxu0 }
 0x145   : > { %5550 = vst [vmem:[#allocation21_spill] sm:$0xff] %v4269_v16  ;;  %v1791_v2 = vadd.f32 %v1727_v1, %v1471_v24  ;;  %3334 = vpow2.f32 %v4159_v22  ;;  %v2832_v45 = vclamps-f32 %v584_v44, 13.81551  ;;  %v2176_v39 = vpack.c.bf16 %v4192_v38, %v4171_v46 }
 0x146   : > { %v922_v59 = vmul.f32 1.442695, %v4255_v61  ;;  %v4274_v3 = vadd.f32 %v2078_v29, %v2019_v48  ;;  %3336 = vpow2.f32 %v4162_v25  ;;  %v924_v0 = vmul.f32 1.442695, %v4267_v54 }
 0x147   : > { %v2175_v12 = vpack.c.bf16 %v4185_v4, %v4156_v19  ;;  %v2020_v17 = vmul.f32 %v4083_v52, %v1791_v2  ;;  %3338 = vpow2.f32 %v4168_v37  ;;  %v4282_v28 = vsub.f32 0.0, %v2832_v45  ;;  %2374 = vmatprep.mubr.bf16.mxu1 %v2176_v39 }
 0x148   : > { %v588_v22 = vadd.f32 %v4203_v7, %v4021_v56  ;;  %3340 = vpow2.f32 %v4174_v55  ;;  %v590_v25 = vadd.f32 %v4207_v36, %v4025_v58  ;;  %v592_v46 = vadd.f32 %v4212_v14, %v4021_v56 }
 0x149   : > { %5551 = vst [vmem:[#allocation22_spill] sm:$0xff] %v4282_v28  ;;  %2375 = vmatmul.mubr.bf16.vlgmr.msra.gmra.mrb[0].mxu1 %v2175_v12  ;;  %v594_v52 = vadd.f32 %v4215_v23, %v4025_v58  ;;  %v4293_v19 = vadd.f32 %v2115_v40, %v2020_v17  ;;  %3342 = vpow2.f32 %v4198_v47  ;;  %v926_v37 = vmul.f32 1.442695, %v4282_v28  ;;  %v4297_v38 = vpop.f32.mrb[32].mxu0 }
 0x14a   : > { %v2833_v4 = vclamps-f32 %v588_v22, 13.81551  ;;  %5552 = vst [vmem:[#allocation23_spill] sm:$0xff] %v4297_v38  ;;  %v3325_v55 = vpop.eup %3324  ;;  %3344 = vpow2.f32 %v922_v59  ;;  %v5553_v7 = vmov 0.0   ;;  %v2834_v14 = vclamps-f32 %v590_v25, 13.81551 }
 0x14b   : > { %v4302_v36 = vsel %vm1924_vm9, 1.0, %v5553_v7  ;;  %v2835_v9 = vclamps-f32 %v592_v46, 13.81551  ;;  %v3327_v62 = vpop.eup %3326  ;;  %v1025_v23 = vadd.f32 1.0, %v3325_v55  ;;  %3346 = vpow2.f32 %v924_v0  ;;  %v4308_v50 = vpop.f32.mrb[33].mxu0  ;;  %v5563_v59 = vld [vmem:[#allocation9_spill] sm:$0xff]  ;;  %2011 = vst [vmem:[%s5001_s12] sm:$0xff] %v5553_v7 }
 0x14c   : > { %5554 = vst [vmem:[#allocation24_spill] sm:$0xff] %v4302_v36  ;;  %v4304_v49 = vsub.f32 0.0, %v2833_v4  ;;  %v2178_v47 = vpack.c.bf16 %v4222_v10, %v4209_v43  ;;  %5556 = vst [vmem:[#allocation26_spill] sm:$0xff] %v4308_v50  ;;  %v4310_v29 = vpop.eup %3328  ;;  %v1026_v18 = vadd.f32 1.0, %v3327_v62  ;;  %3348 = vpow2.f32 %v926_v37  ;;  %v4320_v51 = vpop.f32.mrb[34].mxu0  ;;  %v5558_v43 = vld [vmem:[#allocation14_spill] sm:$0xff] }
 0x14d   : > { %v4318_v5 = vadd.s32 %v4017_v53, %v4127_v35  ;;  %5557 = vst [vmem:[#allocation27_spill] sm:$0xff] %v4320_v51  ;;  %v3331_v42 = vpop.eup %3330  ;;  %3350 = vrcp.f32 %v1025_v23  ;;  %v2836_v15 = vclamps-f32 %v594_v52, 13.81551  ;;  %v4324_v10 = vadd.s32 %v4017_v53, %v5558_v43  ;;  %v4329_v24 = vpop.f32.mrb[35].mxu0  ;;  %v5577_v51 = vld [vmem:[#allocation15_spill] sm:$0xff]  ;;  %2012 = vst [vmem:[%s5001_s12 + $0x8] sm:$0xff] %v5553_v7 }
 0x14e   : > { %5555 = vst [vmem:[#allocation25_spill] sm:$0xff] %v4304_v49  ;;  %2382 = vmatprep.mubr.bf16.mxu1 %v2178_v47  ;;  %v4327_v41 = vadd.s32 104, %v5559_v27  ;;  %5560 = vst [vmem:[#allocation14_spill] sm:$0xff] %v4329_v24  ;;  %v3333_v34 = vpop.eup %3332  ;;  %v1225_v30 = vmul.f32 0.6931472, %v3331_v42  ;;  %3352 = vlog2.f32 %v1025_v23  ;;  %v4331_v35 = vsub.f32 0.0, %v2834_v14 }
 0x14f   : > { %v4333_v8 = vsub.f32 0.0, %v2835_v9  ;;  %v3335_v57 = vpop.eup %3334  ;;  %3354 = vrcp.f32 %v1026_v18  ;;  %v1027_v21 = vadd.f32 1.0, %v3333_v34  ;;  %v4336_v40 = vmul.f32 1.442695, %v4304_v49 }
 0x150   : > { %5561 = vst [vmem:[#allocation28_spill] sm:$0xff] %v4331_v35  ;;  %v2177_v1 = vpack.c.bf16 %v4217_v26, %v4200_v11  ;;  %v3337_v44 = vpop.eup %3336  ;;  %v1344_v48 = vsub.f32 0.0, %v1225_v30  ;;  %v1600_v2 = vsub.f32 %v5563_v59, %v1225_v30  ;;  %3356 = vlog2.f32 %v1026_v18 }
 0x151   : > { %5562 = vst [vmem:[#allocation29_spill] sm:$0xff] %v4333_v8  ;;  %v1028_v45 = vadd.f32 1.0, %v3335_v57  ;;  %v3339_v39 = vpop.eup %3338  ;;  %3358 = vrcp.f32 %v1027_v21  ;;  %v1029_v0 = vadd.f32 1.0, %v3337_v44  ;;  %v598_v12 = vadd.f32 %v4229_v32, %v4021_v56  ;;  %v4345_v22 = vpop.f32.mrb[36].mxu0 }
 0x152   : > { %2383 = vmatmul.mubr.bf16.gmra.mrb[4].mxu1 %v2177_v1  ;;  %v600_v17 = vadd.f32 %v4233_v63, %v4025_v58  ;;  %5564 = vst [vmem:[#allocation9_spill] sm:$0xff] %v4345_v22  ;;  %v3341_v25 = vpop.eup %3340  ;;  %v2885_v11 = vadd.f32 3.912023, %v1344_v48  ;;  %v1536_v26 = vsub.f32 1.0, %v4310_v29  ;;  %v2949_v46 = vadd.f32 0.020202707, %v1600_v2 }
 0x153   : > { %3360 = vlog2.f32 %v1027_v21  ;;  %v4348_v52 = vpop.f32.mrb[37].mxu0  ;;  %v3343_v37 = vpop.eup %3342  ;;  %v1030_v4 = vadd.f32 1.0, %v3339_v39  ;;  %v4350_v55 = vsub.f32 0.0, %v2836_v15  ;;  %v2837_v14 = vclamps-f32 %v598_v12, 13.81551 }
 0x154   : > { %5565 = vst [vmem:[#allocation30_spill] sm:$0xff] %v4348_v52  ;;  %3362 = vrcp.f32 %v1028_v45  ;;  %v4352_v32 = vpop.f32.mrb[38].mxu0  ;;  %v3345_v9 = vpop.eup %3344  ;;  %v1472_v63 = vmul.f32 %v4310_v29, %v2885_v11  ;;  %v1728_v62 = vmul.f32 %v2949_v46, %v1536_v26  ;;  %v2838_v23 = vclamps-f32 %v600_v17, 13.81551 }
 0x155   : > { %5566 = vst [vmem:[#allocation31_spill] sm:$0xff] %v4350_v55  ;;  %5567 = vst [vmem:[#allocation32_spill] sm:$0xff] %v4352_v32  ;;  %3364 = vlog2.f32 %v1028_v45  ;;  %v4355_v47 = vpop.f32.mrb[39].mxu0  ;;  %v3347_v18 = vpop.eup %3346  ;;  %v1031_v42 = vadd.f32 1.0, %v3341_v25  ;;  %v4358_v43 = vmul.f32 1.442695, %v4331_v35  ;;  %v602_v21 = vadd.f32 %v4237_v20, %v4021_v56 }
 0x156   : > { %5568 = vst [vmem:[#allocation33_spill] sm:$0xff] %v4355_v47  ;;  %3366 = vrcp.f32 %v1029_v0  ;;  %v4361_v15 = vmul.f32 1.442695, %v4333_v8  ;;  %v3349_v34 = vpop.eup %3348  ;;  %v1792_v30 = vadd.f32 %v1728_v62, %v1472_v63  ;;  %v4363_v57 = vsub.f32 0.0, %v2837_v14  ;;  %v5570_v45 = vld [vmem:[#allocation6_spill] sm:$0xff] }
 0x157   : > { %3368 = vlog2.f32 %v1029_v0  ;;  %v4367_v1 = vpop.eup %3350  ;;  %v1032_v44 = vadd.f32 1.0, %v3343_v37  ;;  %v4369_v48 = vadd.f32 1.0, %v3345_v9  ;;  %v4372_v59 = vmul.f32 1.442695, %v4350_v55 }
 0x158   : > { %5569 = vst [vmem:[#allocation34_spill] sm:$0xff] %v4363_v57  ;;  %3370 = vrcp.f32 %v1030_v4  ;;  %v3353_v2 = vpop.eup %3352  ;;  %v2021_v39 = vmul.f32 %v5570_v45, %v1792_v30  ;;  %v4375_v12 = vsub.f32 0.0, %v2838_v23  ;;  %v2839_v0 = vclamps-f32 %v602_v21, 13.81551  ;;  %v5573_v23 = vld [vmem:[#allocation11_spill] sm:$0xff] }
 0x159   : > { %3372 = vlog2.f32 %v1030_v4  ;;  %v4377_v17 = vpop.eup %3354  ;;  %v1227_v25 = vmul.f32 0.6931472, %v3353_v2  ;;  %v4379_v20 = vadd.f32 1.0, %v3347_v18  ;;  %v4381_v11 = vadd.f32 1.0, %v3349_v34  ;;  %v4383_v26 = vpop.f32.mrb[40].mxu0 }
 0x15a   : > { %3374 = vrcp.f32 %v1031_v42  ;;  %5571 = vst [vmem:[#allocation6_spill] sm:$0xff] %v4383_v26  ;;  %v3357_v46 = vpop.eup %3356  ;;  %v4386_v37 = vadd.f32 %v4274_v3, %v2021_v39  ;;  %v1537_v14 = vsub.f32 1.0, %v4367_v1  ;;  %v4390_v4 = vmul.f32 1.442695, %v4363_v57  ;;  %v4392_v9 = vpop.f32.mrb[41].mxu0 }
 0x15b   : > { %3376 = vlog2.f32 %v1031_v42  ;;  %5572 = vst [vmem:[#allocation35_spill] sm:$0xff] %v4392_v9  ;;  %v4394_v63 = vpop.eup %3358  ;;  %v1345_v62 = vsub.f32 0.0, %v1227_v25  ;;  %v1601_v18 = vsub.f32 %v5573_v23, %v1227_v25  ;;  %v1229_v34 = vmul.f32 0.6931472, %v3357_v46  ;;  %v4397_v30 = vpop.f32.mrb[42].mxu0  ;;  %v5576_v23 = vld [vmem:[#allocation12_spill] sm:$0xff] }
 0x15c   : > { %3378 = vrcp.f32 %v1032_v44  ;;  %5574 = vst [vmem:[#allocation11_spill] sm:$0xff] %v4397_v30  ;;  %v1538_v3 = vsub.f32 1.0, %v4377_v17  ;;  %v4400_v2 = vsub.f32 0.0, %v2839_v0  ;;  %v4404_v42 = vadd.f32 %v4241_v60, %v4025_v58  ;;  %v4406_v39 = vpop.f32.mrb[43].mxu0 }
 0x15d   : > { %v3361_v21 = vpop.eup %3360  ;;  %3380 = vlog2.f32 %v1032_v44  ;;  %5575 = vst [vmem:[#allocation36_spill] sm:$0xff] %v4406_v39  ;;  %v2886_v26 = vadd.f32 3.912023, %v1345_v62  ;;  %v2950_v25 = vadd.f32 0.020202707, %v1601_v18  ;;  %v1346_v46 = vsub.f32 0.0, %v1229_v34 }
 0x15e   : > { %v4408_v9 = vpop.eup %3362  ;;  %v1602_v47 = vsub.f32 %v5576_v23, %v1229_v34  ;;  %v1231_v32 = vmul.f32 0.6931472, %v3361_v21  ;;  %v1539_v52 = vsub.f32 1.0, %v4394_v63  ;;  %3382 = vrcp.f32 %v4369_v48 }
 0x15f   : > { %v3365_v30 = vpop.eup %3364  ;;  %v1540_v44 = vsub.f32 1.0, %v4408_v9  ;;  %v1473_v60 = vmul.f32 %v4367_v1, %v2886_v26  ;;  %v1729_v39 = vmul.f32 %v2950_v25, %v1537_v14  ;;  %v2887_v22 = vadd.f32 3.912023, %v1346_v46  ;;  %v5579_v46 = vld [vmem:[#allocation16_spill] sm:$0xff] }
 0x160   : > { %v4414_v0 = vpop.eup %3366  ;;  %v2951_v24 = vadd.f32 0.020202707, %v1602_v47  ;;  %v1347_v18 = vsub.f32 0.0, %v1231_v32  ;;  %v1603_v57 = vsub.f32 %v5577_v51, %v1231_v32  ;;  %v1233_v34 = vmul.f32 0.6931472, %v3365_v30 }
 0x161   : > { %v3369_v62 = vpop.eup %3368  ;;  %v1541_v21 = vsub.f32 1.0, %v4414_v0  ;;  %v1793_v55 = vadd.f32 %v1729_v39, %v1473_v60  ;;  %v1474_v8 = vmul.f32 %v4377_v17, %v2887_v22  ;;  %v4422_v50 = vpop.f32.mrb[44].mxu0  ;;  %v5581_v60 = vld [vmem:[#allocation17_spill] sm:$0xff]  ;;  %3384 = vlog2.f32 %v4369_v48 }
 0x162   : > { %v4419_v23 = vpop.eup %3370  ;;  %v1730_v35 = vmul.f32 %v2951_v24, %v1538_v3  ;;  %v1235_v49 = vmul.f32 0.6931472, %v3369_v62  ;;  %5578 = vst [vmem:[#allocation12_spill] sm:$0xff] %v4422_v50  ;;  %v2888_v14 = vadd.f32 3.912023, %v1347_v18  ;;  %v1348_v47 = vsub.f32 0.0, %v1233_v34 }
 0x163   : > { %v3373_v26 = vpop.eup %3372  ;;  %v2952_v25 = vadd.f32 0.020202707, %v1603_v57  ;;  %v1604_v38 = vsub.f32 %v5579_v46, %v1233_v34  ;;  %v4425_v16 = vpop.f32.mrb[45].mxu0  ;;  %v2022_v32 = vmul.f32 %v5570_v45, %v1793_v55  ;;  %v5582_v46 = vld [vmem:[#allocation7_spill] sm:$0xff]  ;;  %3386 = vrcp.f32 %v4379_v20 }
 0x164   : > { %5580 = vst [vmem:[#allocation15_spill] sm:$0xff] %v4425_v16  ;;  %v4427_v51 = vpop.eup %3374  ;;  %v1794_v30 = vadd.f32 %v1730_v35, %v1474_v8  ;;  %v1349_v39 = vsub.f32 0.0, %v1235_v49  ;;  %v1605_v22 = vsub.f32 %v5581_v60, %v1235_v49  ;;  %v1475_v3 = vmul.f32 %v4394_v63, %v2888_v14  ;;  %v4444_v60 = vpop.f32.mrb[46].mxu0 }
 0x165   : > { %v3377_v24 = vpop.eup %3376  ;;  %v1731_v62 = vmul.f32 %v2952_v25, %v1539_v52  ;;  %v2889_v50 = vadd.f32 3.912023, %v1348_v47  ;;  %v2953_v18 = vadd.f32 0.020202707, %v1604_v38  ;;  %v2117_v34 = vadd.f32 %v4293_v19, %v2022_v32  ;;  %5584 = vst [vmem:[#allocation16_spill] sm:$0xff] %v4444_v60 }
 0x166   : > { %v4432_v57 = vpop.eup %3378  ;;  %v2023_v16 = vmul.f32 %v5582_v46, %v1794_v30  ;;  %v2890_v27 = vadd.f32 3.912023, %v1349_v39  ;;  %v2954_v36 = vadd.f32 0.020202707, %v1605_v22  ;;  %v1237_v49 = vmul.f32 0.6931472, %v3373_v26 }
 0x167   : > { %v3381_v28 = vpop.eup %3380  ;;  %v1795_v55 = vadd.f32 %v1731_v62, %v1475_v3  ;;  %v1476_v35 = vmul.f32 %v4408_v9, %v2889_v50  ;;  %v1732_v8 = vmul.f32 %v2953_v18, %v1540_v44  ;;  %v2840_v38 = vclamps-f32 %v4404_v42, 13.81551  ;;  %v5583_v30 = vld [vmem:[#allocation18_spill] sm:$0xff]  ;;  %v5586_v62 = vld [vmem:[#allocation19_spill] sm:$0xff] }
 0x168   : > { %v2081_v45 = vadd.f32 %v4386_v37, %v2023_v16  ;;  %v1477_v52 = vmul.f32 %v4414_v0, %v2890_v27  ;;  %v1733_v14 = vmul.f32 %v2954_v36, %v1541_v21  ;;  %v4440_v25 = vpop.eup %3382  ;;  %v1350_v32 = vsub.f32 0.0, %v1237_v49  ;;  %v5585_v27 = vld [vmem:[#allocation8_spill] sm:$0xff] }
 0x169   : > { %v2024_v19 = vmul.f32 %v5582_v46, %v1795_v55  ;;  %v1796_v47 = vadd.f32 %v1732_v8, %v1476_v35  ;;  %v1606_v39 = vsub.f32 %v5583_v30, %v1237_v49  ;;  %v1542_v44 = vsub.f32 1.0, %v4419_v23 }
 0x16a   : > { %v1797_v50 = vadd.f32 %v1733_v14, %v1477_v52  ;;  %v1239_v26 = vmul.f32 0.6931472, %v3377_v24  ;;  %v1241_v16 = vmul.f32 0.6931472, %v3381_v28  ;;  %v2891_v21 = vadd.f32 3.912023, %v1350_v32 }
 0x16b   : > { %v2118_v37 = vadd.f32 %v2117_v34, %v2024_v19  ;;  %v2025_v36 = vmul.f32 %v5585_v27, %v1796_v47  ;;  %v2955_v42 = vadd.f32 0.020202707, %v1606_v39  ;;  %v1543_v49 = vsub.f32 1.0, %v4427_v51  ;;  %v4452_v52 = vpop.f32.mrb[47].mxu0  ;;  %v5588_v32 = vld [vmem:[#allocation20_spill] sm:$0xff] }
 0x16c   : > { %v2026_v22 = vmul.f32 %v5585_v27, %v1797_v50  ;;  %v1351_v3 = vsub.f32 0.0, %v1239_v26  ;;  %v1607_v18 = vsub.f32 %v5586_v62, %v1239_v26  ;;  %v1352_v46 = vsub.f32 0.0, %v1241_v16  ;;  %5587 = vst [vmem:[#allocation17_spill] sm:$0xff] %v4452_v52  ;;  %v5610_v52 = vld [vmem:[#allocation34_spill] sm:$0xff] }
 0x16d   : > { %v2082_v55 = vadd.f32 %v2081_v45, %v2025_v36  ;;  %v1478_v35 = vmul.f32 %v4419_v23, %v2891_v21  ;;  %v1734_v8 = vmul.f32 %v2955_v42, %v1542_v44  ;;  %v1544_v47 = vsub.f32 1.0, %v4432_v57  ;;  %v5589_v44 = vld [vmem:[#allocation10_spill] sm:$0xff] }
 0x16e   : > { %v2119_v28 = vadd.f32 %v2118_v37, %v2026_v22  ;;  %v2892_v24 = vadd.f32 3.912023, %v1351_v3  ;;  %v2956_v34 = vadd.f32 0.020202707, %v1607_v18  ;;  %v2893_v14 = vadd.f32 3.912023, %v1352_v46 }
 0x16f   : > { %v1798_v19 = vadd.f32 %v1734_v8, %v1478_v35  ;;  %v1608_v30 = vsub.f32 %v5588_v32, %v1241_v16  ;;  %vm1926_vm11 = vcmp.lt.s32.totalorder %v4318_v5, 512  ;;  %3388 = vlog2.f32 %v4379_v20  ;;  %v5593_v46 = vld [vmem:[#allocation13_spill] sm:$0xff]  ;;  %v3385_v35 = vpop.eup %3384 }
 0x170   : > { %v1479_v45 = vmul.f32 %v4427_v51, %v2892_v24  ;;  %v1735_v39 = vmul.f32 %v2956_v34, %v1543_v49  ;;  %v1480_v50 = vmul.f32 %v4432_v57, %v2893_v14  ;;  %v4464_v27 = vsub.f32 0.0, %v2840_v38 }
 0x171   : > { %v2027_v26 = vmul.f32 %v5589_v44, %v1798_v19  ;;  %v2957_v37 = vadd.f32 0.020202707, %v1608_v30  ;;  %3390 = vrcp.f32 %v4381_v11  ;;  %v2180_v48 = vpack.c.bf16 %v4394_v63, %v4367_v1  ;;  %v4478_v1 = vpop.f32.mrb[48].mxu0 }
 0x172   : > { %v1799_v36 = vadd.f32 %v1735_v39, %v1479_v45  ;;  %v2179_v16 = vpack.c.bf16 %v4377_v17, %v4310_v29  ;;  %3392 = vlog2.f32 %v4381_v11  ;;  %v938_v22 = vmul.f32 1.442695, %v4375_v12  ;;  %5590 = vst [vmem:[#allocation7_spill] sm:$0xff] %v4478_v1  ;;  %v4485_v11 = vpop.f32.mrb[49].mxu0 }
 0x173   : > { %v2083_v21 = vadd.f32 %v2082_v55, %v2027_v26  ;;  %v1736_v42 = vmul.f32 %v2957_v37, %v1544_v47  ;;  %3394 = vpow2.f32 %v4336_v40  ;;  %v940_v20 = vmul.f32 1.442695, %v4400_v2  ;;  %2390 = vmatprep.mubr.bf16.mxu1 %v2180_v48  ;;  %5591 = vst [vmem:[#allocation18_spill] sm:$0xff] %v4485_v11  ;;  %v4491_v18 = vpop.f32.mrb[50].mxu0 }
 0x174   : > { %v2028_v3 = vmul.f32 %v5589_v44, %v1799_v36  ;;  %v608_v38 = vadd.f32 %v4251_v13, %v4021_v56  ;;  %3396 = vpow2.f32 %v4358_v43  ;;  %2391 = vmatmul.mubr.bf16.gmra.mrb[8].mxu1 %v2179_v16  ;;  %v610_v29 = vadd.f32 %v4258_v33, %v4025_v58  ;;  %5592 = vst [vmem:[#allocation8_spill] sm:$0xff] %v4491_v18 }
 0x175   : > { %v1800_v63 = vadd.f32 %v1736_v42, %v1480_v50  ;;  %v612_v17 = vadd.f32 %v4262_v6, %v4021_v56  ;;  %3398 = vpow2.f32 %v4361_v15  ;;  %v942_v13 = vmul.f32 1.442695, %v4464_v27 }
 0x176   : > { %v4487_v40 = vadd.f32 %v2119_v28, %v2028_v3  ;;  %v2841_v62 = vclamps-f32 %v608_v38, 13.81551  ;;  %3400 = vpow2.f32 %v4372_v59  ;;  %v2842_v55 = vclamps-f32 %v610_v29, 13.81551 }
 0x177   : > { %v2029_v43 = vmul.f32 %v5593_v46, %v1800_v63  ;;  %v2843_v33 = vclamps-f32 %v612_v17, 13.81551  ;;  %3402 = vpow2.f32 %v4390_v4  ;;  %vm1927_vm12 = vcmp.lt.s32.totalorder %v4324_v10, 512  ;;  %v4512_v4 = vpop.eup %3386 }
 0x178   : > { %v4499_v6 = vadd.s32 %v4017_v53, %v4327_v41  ;;  %v4501_v15 = vsub.f32 0.0, %v2841_v62  ;;  %v4508_v49 = vsel %vm1925_vm10, 1.0, %v5553_v7  ;;  %3404 = vpow2.f32 %v938_v22 }
 0x179   : > { %v4503_v8 = vadd.f32 %v2083_v21, %v2029_v43  ;;  %v4510_v59 = vsub.f32 0.0, %v2842_v55  ;;  %v1243_v10 = vmul.f32 0.6931472, %v3385_v35  ;;  %3406 = vpow2.f32 %v940_v20  ;;  %v3389_v24 = vpop.eup %3388 }
 0x17a   : > { %v944_v41 = vmul.f32 1.442695, %v4501_v15  ;;  %v4515_v28 = vsub.f32 0.0, %v2843_v33  ;;  %v4520_v34 = vsel %vm1926_vm11, 1.0, %v5553_v7  ;;  %v4523_v31 = vsel %vm1927_vm12, 1.0, %v5553_v7 }
 0x17b   : > { %3408 = vpow2.f32 %v942_v13  ;;  %v946_v14 = vmul.f32 1.442695, %v4510_v59  ;;  %v4526_v19 = vpop.eup %3390  ;;  %v1353_v47 = vsub.f32 0.0, %v1243_v10  ;;  %v1609_v32 = vsub.f32 %v4255_v61, %v1243_v10  ;;  %v5594_v13 = vld [vmem:[#allocation22_spill] sm:$0xff] }
 0x17c   : > { %v1245_v30 = vmul.f32 0.6931472, %v3389_v24  ;;  %vm1928_vm13 = vcmp.lt.s32.totalorder %v4499_v6, 512  ;;  %3410 = vpow2.f32 %v944_v41  ;;  %v3393_v45 = vpop.eup %3392  ;;  %v1545_v5 = vsub.f32 1.0, %v4440_v25 }
 0x17d   : > { %v1546_v39 = vsub.f32 1.0, %v4512_v4  ;;  %3412 = vpow2.f32 %v946_v14  ;;  %v948_v50 = vmul.f32 1.442695, %v4515_v28  ;;  %v3395_v44 = vpop.eup %3394  ;;  %v2894_v26 = vadd.f32 3.912023, %v1353_v47  ;;  %v4538_v47 = vpop.f32.mrb[51].mxu0 }
 0x17e   : > { %v2958_v37 = vadd.f32 0.020202707, %v1609_v32  ;;  %v1354_v36 = vsub.f32 0.0, %v1245_v30  ;;  %v1610_v48 = vsub.f32 %v4267_v54, %v1245_v30  ;;  %v3397_v16 = vpop.eup %3396  ;;  %v1247_v61 = vmul.f32 0.6931472, %v3393_v45  ;;  %5595 = vst [vmem:[#allocation19_spill] sm:$0xff] %v4538_v47 }
 0x17f   : > { %v1547_v21 = vsub.f32 1.0, %v4526_v19  ;;  %v1036_v42 = vadd.f32 1.0, %v3395_v44  ;;  %3414 = vpow2.f32 %v948_v50  ;;  %v3399_v22 = vpop.eup %3398  ;;  %v1481_v3 = vmul.f32 %v4440_v25, %v2894_v26 }
 0x180   : > { %v1737_v20 = vmul.f32 %v2958_v37, %v1545_v5  ;;  %v2895_v38 = vadd.f32 3.912023, %v1354_v36  ;;  %v2959_v63 = vadd.f32 0.020202707, %v1610_v48  ;;  %v3401_v29 = vpop.eup %3400  ;;  %v1355_v17 = vsub.f32 0.0, %v1247_v61  ;;  %v5596_v48 = vld [vmem:[#allocation24_spill] sm:$0xff] }
 0x181   : > { %v1611_v62 = vsub.f32 %v5594_v13, %v1247_v61  ;;  %3416 = vrcp.f32 %v1036_v42  ;;  %v1037_v43 = vadd.f32 1.0, %v3397_v16  ;;  %v3403_v55 = vpop.eup %3402  ;;  %v1038_v14 = vadd.f32 1.0, %v3399_v22  ;;  %v5597_v61 = vld [vmem:[#allocation5_spill] sm:$0xff] }
 0x182   : > { %v1801_v54 = vadd.f32 %v1737_v20, %v1481_v3  ;;  %v1482_v33 = vmul.f32 %v4512_v4, %v2895_v38  ;;  %v1738_v35 = vmul.f32 %v2959_v63, %v1546_v39  ;;  %3418 = vlog2.f32 %v1036_v42  ;;  %v3405_v10 = vpop.eup %3404 }
 0x183   : > { %v2896_v41 = vadd.f32 3.912023, %v1355_v17  ;;  %v2960_v24 = vadd.f32 0.020202707, %v1611_v62  ;;  %3420 = vrcp.f32 %v1037_v43  ;;  %v3407_v32 = vpop.eup %3406  ;;  %v1039_v5 = vadd.f32 1.0, %v3401_v29  ;;  %v5598_v17 = vld [vmem:[#allocation21_spill] sm:$0xff] }
 0x184   : > { %v2030_v30 = vmul.f32 %v5593_v46, %v1801_v54  ;;  %v1802_v45 = vadd.f32 %v1738_v35, %v1482_v33  ;;  %3422 = vlog2.f32 %v1037_v43  ;;  %v1040_v39 = vadd.f32 1.0, %v3403_v55  ;;  %v5599_v43 = vld [vmem:[#allocation23_spill] sm:$0xff] }
 0x185   : > { %v3409_v50 = vpop.eup %3408  ;;  %v1483_v44 = vmul.f32 %v4526_v19, %v2896_v41  ;;  %v1739_v26 = vmul.f32 %v2960_v24, %v1547_v21  ;;  %3424 = vrcp.f32 %v1038_v14  ;;  %v1864_v42 = vadd.s32 112, %v5597_v61  ;;  %v4570_v41 = vpop.f32.mrb[52].mxu0 }
 0x186   : > { %v3411_v37 = vpop.eup %3410  ;;  %v2121_v36 = vadd.f32 %v4487_v40, %v2030_v30  ;;  %v2031_v16 = vmul.f32 %v5596_v48, %v1802_v45  ;;  %3426 = vlog2.f32 %v1038_v14  ;;  %v1041_v46 = vadd.f32 1.0, %v3405_v10  ;;  %5600 = vst [vmem:[#allocation20_spill] sm:$0xff] %v4570_v41  ;;  %v4579_v14 = vpop.f32.mrb[53].mxu0 }
 0x187   : > { %v3413_v22 = vpop.eup %3412  ;;  %v1803_v3 = vadd.f32 %v1739_v26, %v1483_v44  ;;  %3428 = vrcp.f32 %v1039_v5  ;;  %v4548_v20 = vsel %vm1928_vm13, 1.0, %v5553_v7  ;;  %v1042_v38 = vadd.f32 1.0, %v3407_v32  ;;  %5602 = vst [vmem:[#allocation10_spill] sm:$0xff] %v4579_v14 }
 0x188   : > { %v4551_v21 = vadd.f32 %v4503_v8, %v2031_v16  ;;  %3430 = vlog2.f32 %v1039_v5  ;;  %v1865_v40 = vadd.s32 120, %v5597_v61  ;;  %v614_v13 = vadd.f32 %v5598_v17, %v4025_v58 }
 0x189   : > { %v3415_v63 = vpop.eup %3414  ;;  %v2032_v29 = vmul.f32 %v5596_v48, %v1803_v3  ;;  %3432 = vrcp.f32 %v1040_v39  ;;  %v2182_v62 = vpack.c.bf16 %v4427_v51, %v4414_v0  ;;  %v4560_v6 = vadd.s32 %v4017_v53, %v1864_v42  ;;  %v5605_v42 = vld [vmem:[#allocation25_spill] sm:$0xff] }
 0x18a   : > { %3434 = vlog2.f32 %v1040_v39  ;;  %v2181_v8 = vpack.c.bf16 %v4419_v23, %v4408_v9  ;;  %v618_v55 = vadd.f32 %v5599_v43, %v4021_v56  ;;  %v1043_v35 = vadd.f32 1.0, %v3409_v50  ;;  %v5601_v23 = vld [vmem:[#allocation26_spill] sm:$0xff]  ;;  %v4587_v50 = vpop.f32.mrb[54].mxu0 }
 0x18b   : > { %v4566_v54 = vpop.eup %3416  ;;  %v4568_v33 = vadd.f32 %v2121_v36, %v2032_v29  ;;  %3436 = vrcp.f32 %v1041_v46  ;;  %v2844_v10 = vclamps-f32 %v614_v13, 13.81551  ;;  %2398 = vmatprep.mubr.bf16.mxu1 %v2182_v62  ;;  %v4573_v51 = vadd.s32 %v4017_v53, %v1865_v40  ;;  %5603 = vst [vmem:[#allocation13_spill] sm:$0xff] %v4587_v50 }
 0x18c   : > { %v3419_v0 = vpop.eup %3418  ;;  %3438 = vlog2.f32 %v1041_v46  ;;  %2399 = vmatmul.mubr.bf16.gmra.mrb[12].mxu1 %v2181_v8  ;;  %v2845_v9 = vclamps-f32 %v618_v55, 13.81551  ;;  %v4577_v24 = vadd.f32 %v5601_v23, %v4025_v58  ;;  %v4583_v45 = vadd.f32 1.0, %v3411_v37  ;;  %v4597_v37 = vpop.f32.mrb[55].mxu0  ;;  %v5607_v8 = vld [vmem:[#allocation28_spill] sm:$0xff] }
 0x18d   : > { %v4581_v32 = vpop.eup %3420  ;;  %v1249_v30 = vmul.f32 0.6931472, %v3419_v0  ;;  %3440 = vrcp.f32 %v1042_v38  ;;  %v4585_v5 = vadd.f32 1.0, %v3413_v22  ;;  %v1548_v26 = vsub.f32 1.0, %v4566_v54  ;;  %5606 = vst [vmem:[#allocation24_spill] sm:$0xff] %v4597_v37  ;;  %v5608_v37 = vld [vmem:[#allocation29_spill] sm:$0xff] }
 0x18e   : > { %v3423_v44 = vpop.eup %3422  ;;  %3442 = vlog2.f32 %v1042_v38  ;;  %v4590_v39 = vadd.f32 1.0, %v3415_v63  ;;  %v4592_v36 = vsub.f32 0.0, %v2844_v10  ;;  %v1549_v40 = vsub.f32 1.0, %v4581_v32 }
 0x18f   : > { %v4594_v48 = vpop.eup %3424  ;;  %v1356_v16 = vsub.f32 0.0, %v1249_v30  ;;  %v1612_v3 = vsub.f32 %v5605_v42, %v1249_v30  ;;  %v1251_v46 = vmul.f32 0.6931472, %v3423_v44  ;;  %3444 = vrcp.f32 %v1043_v35 }
 0x190   : > { %5604 = vst [vmem:[#allocation22_spill] sm:$0xff] %v4592_v36  ;;  %v3427_v22 = vpop.eup %3426  ;;  %3446 = vlog2.f32 %v1043_v35  ;;  %v4600_v29 = vsub.f32 0.0, %v2845_v9  ;;  %v1550_v0 = vsub.f32 1.0, %v4594_v48  ;;  %v4609_v30 = vmul.f32 1.442695, %v4592_v36 }
 0x191   : > { %v4603_v63 = vpop.eup %3428  ;;  %v2897_v17 = vadd.f32 3.912023, %v1356_v16  ;;  %v2961_v13 = vadd.f32 0.020202707, %v1612_v3  ;;  %v1357_v62 = vsub.f32 0.0, %v1251_v46  ;;  %v1613_v43 = vsub.f32 %v5607_v8, %v1251_v46 }
 0x192   : > { %v3431_v55 = vpop.eup %3430  ;;  %v1253_v10 = vmul.f32 0.6931472, %v3427_v22  ;;  %v1551_v23 = vsub.f32 1.0, %v4603_v63  ;;  %3448 = vrcp.f32 %v4583_v45  ;;  %vm1929_vm14 = vcmp.lt.s32.totalorder %v4560_v6, 512 }
 0x193   : > { %v4611_v35 = vpop.eup %3432  ;;  %v1484_v9 = vmul.f32 %v4566_v54, %v2897_v17  ;;  %v1740_v44 = vmul.f32 %v2961_v13, %v1548_v26  ;;  %v2898_v42 = vadd.f32 3.912023, %v1357_v62  ;;  %v2962_v16 = vadd.f32 0.020202707, %v1613_v43  ;;  %v5609_v13 = vld [vmem:[#allocation31_spill] sm:$0xff] }
 0x194   : > { %v3435_v3 = vpop.eup %3434  ;;  %v1358_v38 = vsub.f32 0.0, %v1253_v10  ;;  %v1614_v46 = vsub.f32 %v5608_v37, %v1253_v10  ;;  %v1255_v8 = vmul.f32 0.6931472, %v3431_v55  ;;  %v1552_v22 = vsub.f32 1.0, %v4611_v35 }
 0x195   : > { %v4616_v50 = vpop.eup %3436  ;;  %v1804_v14 = vadd.f32 %v1740_v44, %v1484_v9  ;;  %v1485_v41 = vmul.f32 %v4581_v32, %v2898_v42  ;;  %v1741_v47 = vmul.f32 %v2962_v16, %v1549_v40  ;;  %v1257_v18 = vmul.f32 0.6931472, %v3435_v3 }
 0x196   : > { %v3439_v11 = vpop.eup %3438  ;;  %v2899_v1 = vadd.f32 3.912023, %v1358_v38  ;;  %v2963_v17 = vadd.f32 0.020202707, %v1614_v46  ;;  %v1359_v26 = vsub.f32 0.0, %v1255_v8  ;;  %v1615_v62 = vsub.f32 %v5609_v13, %v1255_v8 }
 0x197   : > { %v4620_v43 = vpop.eup %3440  ;;  %v2033_v37 = vmul.f32 %v4508_v49, %v1804_v14  ;;  %v1805_v55 = vadd.f32 %v1741_v47, %v1485_v41  ;;  %v1360_v10 = vsub.f32 0.0, %v1257_v18  ;;  %v1616_v60 = vsub.f32 %v5610_v52, %v1257_v18 }
 0x198   : > { %v3443_v36 = vpop.eup %3442  ;;  %v1486_v9 = vmul.f32 %v4594_v48, %v2899_v1  ;;  %v1742_v44 = vmul.f32 %v2963_v17, %v1550_v0  ;;  %v2900_v40 = vadd.f32 3.912023, %v1359_v26  ;;  %v2964_v42 = vadd.f32 0.020202707, %v1615_v62 }
 0x199   : > { %v4625_v16 = vpop.eup %3444  ;;  %v2086_v38 = vadd.f32 %v4551_v21, %v2033_v37  ;;  %v2034_v3 = vmul.f32 %v4508_v49, %v1805_v55  ;;  %v2901_v46 = vadd.f32 3.912023, %v1360_v10  ;;  %v2965_v8 = vadd.f32 0.020202707, %v1616_v60 }
 0x19a   : > { %v3447_v13 = vpop.eup %3446  ;;  %v1806_v14 = vadd.f32 %v1742_v44, %v1486_v9  ;;  %v1487_v47 = vmul.f32 %v4603_v63, %v2900_v40  ;;  %v1743_v41 = vmul.f32 %v2964_v42, %v1551_v23  ;;  %v1259_v52 = vmul.f32 0.6931472, %v3439_v11 }
 0x19b   : > { %v2123_v18 = vadd.f32 %v4568_v33, %v2034_v3  ;;  %v1488_v1 = vmul.f32 %v4611_v35, %v2901_v46  ;;  %v1744_v0 = vmul.f32 %v2965_v8, %v1552_v22  ;;  %v1553_v62 = vsub.f32 1.0, %v4616_v50 }
 0x19c   : > { %v2035_v17 = vmul.f32 %v4520_v34, %v1806_v14  ;;  %v1807_v21 = vadd.f32 %v1743_v41, %v1487_v47  ;;  %v1361_v26 = vsub.f32 0.0, %v1259_v52  ;;  %v1617_v49 = vsub.f32 %v4375_v12, %v1259_v52  ;;  %v4644_v41 = vpop.f32.mrb[56].mxu0 }
 0x19d   : > { %v1808_v60 = vadd.f32 %v1744_v0, %v1488_v1  ;;  %v1261_v37 = vmul.f32 0.6931472, %v3443_v36  ;;  %v1263_v55 = vmul.f32 0.6931472, %v3447_v13  ;;  %v1554_v46 = vsub.f32 1.0, %v4620_v43  ;;  %v4649_v1 = vpop.f32.mrb[57].mxu0 }
 0x19e   : > { %v2087_v23 = vadd.f32 %v2086_v38, %v2035_v17  ;;  %v2036_v11 = vmul.f32 %v4520_v34, %v1807_v21  ;;  %v2902_v33 = vadd.f32 3.912023, %v1361_v26  ;;  %v2966_v10 = vadd.f32 0.020202707, %v1617_v49  ;;  %v4656_v21 = vpop.eup %3448 }
 0x19f   : > { %v2037_v22 = vmul.f32 %v4523_v31, %v1808_v60  ;;  %v1362_v9 = vsub.f32 0.0, %v1261_v37  ;;  %v1618_v44 = vsub.f32 %v4400_v2, %v1261_v37  ;;  %v1363_v40 = vsub.f32 0.0, %v1263_v55 }
 0x1a0   : > { %v2124_v42 = vadd.f32 %v2123_v18, %v2036_v11  ;;  %v1489_v3 = vmul.f32 %v4616_v50, %v2902_v33  ;;  %v1745_v12 = vmul.f32 %v2966_v10, %v1553_v62  ;;  %v1619_v34 = vsub.f32 %v4464_v27, %v1263_v55  ;;  %v5612_v62 = vld [vmem:[#allocation27_spill] sm:$0xff]  ;;  %v5614_v10 = vld [vmem:[#allocation14_spill] sm:$0xff] }
 0x1a1   : > { %v2088_v8 = vadd.f32 %v2087_v23, %v2037_v22  ;;  %v2903_v36 = vadd.f32 3.912023, %v1362_v9  ;;  %v2967_v13 = vadd.f32 0.020202707, %v1618_v44  ;;  %v2904_v38 = vadd.f32 3.912023, %v1363_v40 }
 0x1a2   : > { %v1809_v14 = vadd.f32 %v1745_v12, %v1489_v3  ;;  %3450 = vlog2.f32 %v4583_v45  ;;  %v952_v47 = vmul.f32 1.442695, %v4600_v29  ;;  %v1555_v17 = vsub.f32 1.0, %v4625_v16  ;;  %v4654_v45 = vpop.f32.mrb[58].mxu0 }
 0x1a3   : > { %v1490_v2 = vmul.f32 %v4620_v43, %v2903_v36  ;;  %v1746_v52 = vmul.f32 %v2967_v13, %v1554_v46  ;;  %v1491_v18 = vmul.f32 %v4625_v16, %v2904_v38  ;;  %3452 = vrcp.f32 %v4585_v5 }
 0x1a4   : > { %v2038_v0 = vmul.f32 %v4523_v31, %v1809_v14  ;;  %v2968_v27 = vadd.f32 0.020202707, %v1619_v34  ;;  %3454 = vlog2.f32 %v4585_v5  ;;  %v5611_v49 = vclamps-f32 %v4577_v24, 13.81551  ;;  %v4667_v5 = vpop.f32.mrb[59].mxu0 }
 0x1a5   : > { %v1810_v26 = vadd.f32 %v1746_v52, %v1490_v2  ;;  %3456 = vrcp.f32 %v4590_v39  ;;  %v622_v37 = vadd.f32 %v5612_v62, %v4021_v56  ;;  %5613 = vst [vmem:[#allocation5_spill] sm:$0xff] %v4667_v5  ;;  %vm1930_vm15 = vcmp.lt.s32.totalorder %v4573_v51, 512 }
 0x1a6   : > { %v4661_v60 = vsub.f32 0.0, %v5611_v49  ;;  %v2125_v31 = vadd.f32 %v2124_v42, %v2038_v0  ;;  %v1747_v55 = vmul.f32 %v2968_v27, %v1555_v17  ;;  %3458 = vlog2.f32 %v4590_v39 }
 0x1a7   : > { %v2039_v23 = vmul.f32 %v4548_v20, %v1810_v26  ;;  %3460 = vpow2.f32 %v4609_v30  ;;  %v2847_v24 = vclamps-f32 %v622_v37, 13.81551  ;;  %v624_v22 = vadd.f32 %v5614_v10, %v4025_v58 }
 0x1a8   : > { %v954_v11 = vmul.f32 1.442695, %v4661_v60  ;;  %v1811_v33 = vadd.f32 %v1747_v55, %v1491_v18  ;;  %3462 = vpow2.f32 %v952_v47  ;;  %v2184_v44 = vpack.c.bf16 %v4526_v19, %v4440_v25  ;;  %v5617_v55 = vld [vmem:[#allocation32_spill] sm:$0xff] }
 0x1a9   : > { %v4675_v9 = vadd.f32 %v2088_v8, %v2039_v23  ;;  %v4677_v39 = vsub.f32 0.0, %v2847_v24  ;;  %v1866_v40 = vadd.s32 128, %v5597_v61  ;;  %v2848_v42 = vclamps-f32 %v624_v22, 13.81551  ;;  %v5615_v8 = vld [vmem:[#allocation9_spill] sm:$0xff] }
 0x1aa   : > { %3464 = vpow2.f32 %v954_v11  ;;  %v2040_v30 = vmul.f32 %v4548_v20, %v1811_v33  ;;  %v2183_v3 = vpack.c.bf16 %v4512_v4, %v4432_v57  ;;  %v1867_v46 = vadd.s32 136, %v5597_v61  ;;  %2406 = vmatprep.mubr.bf16.mxu1 %v2184_v44  ;;  %v5616_v57 = vld [vmem:[#allocation30_spill] sm:$0xff] }
 0x1ab   : > { %v956_v12 = vmul.f32 1.442695, %v4677_v39  ;;  %v628_v36 = vadd.f32 %v5615_v8, %v4021_v56  ;;  %v4694_v25 = vsel %vm1929_vm14, 1.0, %v5553_v7  ;;  %v4696_v19 = vsub.f32 0.0, %v2848_v42 }
 0x1ac   : > { %v3451_v13 = vpop.eup %3450  ;;  %v4689_v38 = vadd.f32 %v2125_v31, %v2040_v30  ;;  %2407 = vmatmul.mubr.bf16.gmra.mrb[16].mxu1 %v2183_v3  ;;  %v630_v4 = vadd.f32 %v5616_v57, %v4025_v58  ;;  %v4705_v34 = vsel %vm1930_vm15, 1.0, %v5553_v7  ;;  %v1556_v6 = vsub.f32 1.0, %v4656_v21 }
 0x1ad   : > { %v4700_v20 = vpop.eup %3452  ;;  %v1265_v14 = vmul.f32 0.6931472, %v3451_v13  ;;  %3466 = vpow2.f32 %v956_v12  ;;  %v2849_v47 = vclamps-f32 %v628_v36, 13.81551  ;;  %v4709_v52 = vadd.s32 %v4017_v53, %v1866_v40 }
 0x1ae   : > { %v3455_v2 = vpop.eup %3454  ;;  %v958_v18 = vmul.f32 1.442695, %v4696_v19  ;;  %v2850_v0 = vclamps-f32 %v630_v4, 13.81551  ;;  %v4716_v51 = vadd.s32 %v4017_v53, %v1867_v46  ;;  %v1557_v37 = vsub.f32 1.0, %v4700_v20 }
 0x1af   : > { %v4712_v17 = vpop.eup %3456  ;;  %v1364_v27 = vsub.f32 0.0, %v1265_v14  ;;  %v1620_v26 = vsub.f32 %v4501_v15, %v1265_v14  ;;  %v1267_v49 = vmul.f32 0.6931472, %v3455_v2  ;;  %v4719_v31 = vsub.f32 0.0, %v2849_v47 }
 0x1b0   : > { %v3459_v62 = vpop.eup %3458  ;;  %3468 = vpow2.f32 %v958_v18  ;;  %v632_v23 = vadd.f32 %v5617_v55, %v4021_v56  ;;  %v1558_v30 = vsub.f32 1.0, %v4712_v17  ;;  %v4725_v42 = vsub.f32 0.0, %v2850_v0 }
 0x1b1   : > { %v3461_v11 = vpop.eup %3460  ;;  %v2905_v24 = vadd.f32 3.912023, %v1364_v27  ;;  %v2969_v33 = vadd.f32 0.020202707, %v1620_v26  ;;  %v1365_v10 = vsub.f32 0.0, %v1267_v49  ;;  %v1621_v22 = vsub.f32 %v4510_v59, %v1267_v49 }
 0x1b2   : > { %v3463_v15 = vpop.eup %3462  ;;  %v1269_v44 = vmul.f32 0.6931472, %v3459_v62  ;;  %v1047_v40 = vadd.f32 1.0, %v3461_v11  ;;  %vm1931_vm0 = vcmp.lt.s32.totalorder %v4709_v52, 512  ;;  %vm1932_vm1 = vcmp.lt.s32.totalorder %v4716_v51, 512 }
 0x1b3   : > { %v1492_v12 = vmul.f32 %v4656_v21, %v2905_v24  ;;  %v1748_v46 = vmul.f32 %v2969_v33, %v1556_v6  ;;  %v2906_v8 = vadd.f32 3.912023, %v1365_v10  ;;  %v2970_v36 = vadd.f32 0.020202707, %v1621_v22 }
 0x1b4   : > { %v3465_v3 = vpop.eup %3464  ;;  %v1366_v13 = vsub.f32 0.0, %v1269_v44  ;;  %v1622_v57 = vsub.f32 %v4515_v28, %v1269_v44  ;;  %3470 = vrcp.f32 %v1047_v40  ;;  %v1048_v4 = vadd.f32 1.0, %v3463_v15  ;;  %v5618_v15 = vld [vmem:[#allocation33_spill] sm:$0xff] }
 0x1b5   : > { %v1812_v59 = vadd.f32 %v1748_v46, %v1492_v12  ;;  %v1493_v14 = vmul.f32 %v4700_v20, %v2906_v8  ;;  %v1749_v47 = vmul.f32 %v2970_v36, %v1557_v37  ;;  %3472 = vlog2.f32 %v1047_v40  ;;  %v4740_v40 = vpop.f32.mrb[60].mxu0 }
 0x1b6   : > { %v2907_v2 = vadd.f32 3.912023, %v1366_v13  ;;  %v2971_v18 = vadd.f32 0.020202707, %v1622_v57  ;;  %3474 = vrcp.f32 %v1048_v4  ;;  %v1049_v6 = vadd.f32 1.0, %v3465_v3  ;;  %5619 = vst [vmem:[#allocation21_spill] sm:$0xff] %v4740_v40 }
 0x1b7   : > { %v3467_v0 = vpop.eup %3466  ;;  %v2041_v27 = vmul.f32 %v4694_v25, %v1812_v59  ;;  %v1813_v26 = vadd.f32 %v1749_v47, %v1493_v14  ;;  %3476 = vlog2.f32 %v1048_v4  ;;  %v960_v28 = vmul.f32 1.442695, %v4719_v31 }
 0x1b8   : > { %v1494_v49 = vmul.f32 %v4712_v17, %v2907_v2  ;;  %v1750_v62 = vmul.f32 %v2971_v18, %v1558_v30  ;;  %3478 = vrcp.f32 %v1049_v6  ;;  %v1050_v55 = vadd.f32 1.0, %v3467_v0 }
 0x1b9   : > { %v2090_v11 = vadd.f32 %v4675_v9, %v2041_v27  ;;  %v2042_v37 = vmul.f32 %v4694_v25, %v1813_v26  ;;  %3480 = vlog2.f32 %v1049_v6  ;;  %v2851_v24 = vclamps-f32 %v632_v23, 13.81551  ;;  %v4747_v25 = vpop.f32.mrb[61].mxu0 }
 0x1ba   : > { %v3469_v33 = vpop.eup %3468  ;;  %v1814_v10 = vadd.f32 %v1750_v62, %v1494_v49  ;;  %3482 = vrcp.f32 %v1050_v55  ;;  %v1868_v22 = vadd.s32 144, %v5597_v61  ;;  %v634_v44 = vadd.f32 %v5618_v15, %v4025_v58  ;;  %5620 = vst [vmem:[#allocation23_spill] sm:$0xff] %v4747_v25  ;;  %v4751_v8 = vpop.f32.mrb[62].mxu0 }
 0x1bb   : > { %v4743_v30 = vadd.f32 %v4689_v38, %v2042_v37  ;;  %3484 = vlog2.f32 %v1050_v55  ;;  %v1051_v3 = vadd.f32 1.0, %v3469_v33  ;;  %v4745_v9 = vsub.f32 0.0, %v2851_v24  ;;  %5621 = vst [vmem:[#allocation26_spill] sm:$0xff] %v4751_v8  ;;  %v4757_v57 = vpop.f32.mrb[63].mxu0 }
 0x1bc   : > { %v2043_v23 = vmul.f32 %v4705_v34, %v1814_v10  ;;  %3486 = vpow2.f32 %v960_v28  ;;  %v962_v12 = vmul.f32 1.442695, %v4725_v42  ;;  %v2852_v46 = vclamps-f32 %v634_v44, 13.81551  ;;  %5622 = vst [vmem:[#allocation25_spill] sm:$0xff] %v4757_v57  ;;  %v5624_v28 = vld [vmem:[#allocation35_spill] sm:$0xff] }
 0x1bd   : > { %3488 = vrcp.f32 %v1051_v3  ;;  %v964_v36 = vmul.f32 1.442695, %v4745_v9  ;;  %v1869_v38 = vadd.s32 152, %v5597_v61  ;;  %v2186_v13 = vpack.c.bf16 %v4603_v63, %v4581_v32  ;;  %v5623_v63 = vld [vmem:[#allocation6_spill] sm:$0xff]  ;;  %v5626_v44 = vld [vmem:[#allocation11_spill] sm:$0xff] }
 0x1be   : > { %v4759_v4 = vpop.eup %3470  ;;  %v4761_v59 = vadd.f32 %v2090_v11, %v2043_v23  ;;  %3490 = vlog2.f32 %v1051_v3  ;;  %v4763_v14 = vsub.f32 0.0, %v2852_v46  ;;  %v2185_v47 = vpack.c.bf16 %v4594_v48, %v4566_v54  ;;  %v5625_v11 = vld [vmem:[#allocation22_spill] sm:$0xff] }
 0x1bf   : > { %v3473_v2 = vpop.eup %3472  ;;  %v4770_v18 = vsel %vm1931_vm0, 1.0, %v5553_v7  ;;  %v4775_v32 = vsel %vm1932_vm1, 1.0, %v5553_v7  ;;  %2414 = vmatprep.mubr.bf16.mxu1 %v2186_v13  ;;  %v638_v6 = vadd.f32 %v5623_v63, %v4021_v56  ;;  %v4782_v54 = vadd.s32 %v4017_v53, %v1868_v22 }
 0x1c0   : > { %v4779_v0 = vpop.eup %3474  ;;  %v1271_v27 = vmul.f32 0.6931472, %v3473_v2  ;;  %3492 = vpow2.f32 %v962_v12  ;;  %v966_v48 = vmul.f32 1.442695, %v4763_v14  ;;  %2415 = vmatmul.mubr.bf16.gmra.mrb[20].mxu1 %v2185_v47  ;;  %v4786_v51 = vadd.s32 %v4017_v53, %v1869_v38 }
 0x1c1   : > { %v3477_v52 = vpop.eup %3476  ;;  %3494 = vpow2.f32 %v964_v36  ;;  %v2853_v26 = vclamps-f32 %v638_v6, 13.81551  ;;  %v4790_v49 = vadd.f32 %v5624_v28, %v4025_v58  ;;  %v1559_v10 = vsub.f32 1.0, %v4759_v4 }
 0x1c2   : > { %v4792_v62 = vpop.eup %3478  ;;  %v1367_v55 = vsub.f32 0.0, %v1271_v27  ;;  %v1623_v37 = vsub.f32 %v5625_v11, %v1271_v27  ;;  %v1273_v24 = vmul.f32 0.6931472, %v3477_v52  ;;  %3496 = vpow2.f32 %v966_v48 }
 0x1c3   : > { %v3481_v33 = vpop.eup %3480  ;;  %v1560_v22 = vsub.f32 1.0, %v4779_v0  ;;  %v1561_v15 = vsub.f32 1.0, %v4792_v62  ;;  %v4800_v3 = vadd.f32 %v5626_v44, %v4021_v56  ;;  %v4806_v63 = vsub.f32 0.0, %v2853_v26 }
 0x1c4   : > { %v4802_v23 = vpop.eup %3482  ;;  %v2908_v12 = vadd.f32 3.912023, %v1367_v55  ;;  %v2972_v46 = vadd.f32 0.020202707, %v1623_v37  ;;  %v1368_v36 = vsub.f32 0.0, %v1273_v24  ;;  %v1624_v38 = vsub.f32 %v4600_v29, %v1273_v24 }
 0x1c5   : > { %v3485_v13 = vpop.eup %3484  ;;  %v1275_v47 = vmul.f32 0.6931472, %v3481_v33  ;;  %v1562_v2 = vsub.f32 1.0, %v4802_v23  ;;  %v2854_v6 = vclamps-f32 %v4790_v49, 13.81551  ;;  %vm1933_vm2 = vcmp.lt.s32.totalorder %v4782_v54, 512 }
 0x1c6   : > { %v3487_v27 = vpop.eup %3486  ;;  %v1495_v48 = vmul.f32 %v4759_v4, %v2908_v12  ;;  %v1751_v52 = vmul.f32 %v2972_v46, %v1559_v10  ;;  %v2909_v28 = vadd.f32 3.912023, %v1368_v36  ;;  %v2973_v11 = vadd.f32 0.020202707, %v1624_v38 }
 0x1c7   : > { %v4810_v44 = vpop.eup %3488  ;;  %v1369_v55 = vsub.f32 0.0, %v1275_v47  ;;  %v1625_v37 = vsub.f32 %v4661_v60, %v1275_v47  ;;  %v1277_v29 = vmul.f32 0.6931472, %v3485_v13  ;;  %v1052_v24 = vadd.f32 1.0, %v3487_v27 }
 0x1c8   : > { %v3491_v33 = vpop.eup %3490  ;;  %v1815_v57 = vadd.f32 %v1751_v52, %v1495_v48  ;;  %v1496_v26 = vmul.f32 %v4779_v0, %v2909_v28  ;;  %v1752_v8 = vmul.f32 %v2973_v11, %v1560_v22  ;;  %v1563_v49 = vsub.f32 1.0, %v4810_v44 }
 0x1c9   : > { %v2910_v25 = vadd.f32 3.912023, %v1369_v55  ;;  %v2974_v40 = vadd.f32 0.020202707, %v1625_v37  ;;  %v1370_v12 = vsub.f32 0.0, %v1277_v29  ;;  %v1626_v10 = vsub.f32 %v4677_v39, %v1277_v29 }
 0x1ca   : > { %v3493_v46 = vpop.eup %3492  ;;  %v2044_v36 = vmul.f32 %v4705_v34, %v1815_v57  ;;  %v1816_v38 = vadd.f32 %v1752_v8, %v1496_v26  ;;  %v1279_v5 = vmul.f32 0.6931472, %v3491_v33  ;;  %3498 = vrcp.f32 %v1052_v24 }
 0x1cb   : > { %v3495_v60 = vpop.eup %3494  ;;  %v1497_v13 = vmul.f32 %v4792_v62, %v2910_v25  ;;  %v1753_v47 = vmul.f32 %v2974_v40, %v1561_v15  ;;  %v2911_v27 = vadd.f32 3.912023, %v1370_v12  ;;  %v2975_v48 = vadd.f32 0.020202707, %v1626_v10 }
 0x1cc   : > { %v3497_v22 = vpop.eup %3496  ;;  %v2128_v52 = vadd.f32 %v4743_v30, %v2044_v36  ;;  %v2045_v28 = vmul.f32 %v4770_v18, %v1816_v38  ;;  %v1371_v11 = vsub.f32 0.0, %v1279_v5  ;;  %v1627_v39 = vsub.f32 %v4696_v19, %v1279_v5 }
 0x1cd   : > { %v1817_v55 = vadd.f32 %v1753_v47, %v1497_v13  ;;  %v1498_v34 = vmul.f32 %v4802_v23, %v2911_v27  ;;  %v1754_v8 = vmul.f32 %v2975_v48, %v1562_v2  ;;  %3500 = vlog2.f32 %v1052_v24 }
 0x1ce   : > { %v2092_v57 = vadd.f32 %v4761_v59, %v2045_v28  ;;  %v2912_v37 = vadd.f32 3.912023, %v1371_v11  ;;  %v2976_v25 = vadd.f32 0.020202707, %v1627_v39  ;;  %v1053_v40 = vadd.f32 1.0, %v3493_v46 }
 0x1cf   : > { %v2046_v15 = vmul.f32 %v4770_v18, %v1817_v55  ;;  %v1818_v29 = vadd.f32 %v1754_v8, %v1498_v34  ;;  %v1054_v33 = vadd.f32 1.0, %v3495_v60  ;;  %v1055_v30 = vadd.f32 1.0, %v3497_v22  ;;  %v5629_v55 = vld [vmem:[#allocation15_spill] sm:$0xff] }
 0x1d0   : > { %v1499_v26 = vmul.f32 %v4810_v44, %v2912_v37  ;;  %v1755_v12 = vmul.f32 %v2976_v25, %v1563_v49  ;;  %3502 = vrcp.f32 %v1053_v40  ;;  %v4825_v5 = vsub.f32 0.0, %v2854_v6  ;;  %v5627_v6 = vld [vmem:[#allocation36_spill] sm:$0xff] }
 0x1d1   : > { %v2129_v19 = vadd.f32 %v2128_v52, %v2046_v15  ;;  %v2047_v2 = vmul.f32 %v4775_v32, %v1818_v29  ;;  %3504 = vlog2.f32 %v1053_v40  ;;  %v2855_v59 = vclamps-f32 %v4800_v3, 13.81551 }
 0x1d2   : > { %v1819_v24 = vadd.f32 %v1755_v12, %v1499_v26  ;;  %3506 = vrcp.f32 %v1054_v33  ;;  %v968_v10 = vmul.f32 1.442695, %v4806_v63  ;;  %v970_v18 = vmul.f32 1.442695, %v4825_v5 }
 0x1d3   : > { %v4831_v46 = vadd.f32 %v2092_v57, %v2047_v2  ;;  %3508 = vlog2.f32 %v1054_v33  ;;  %v4833_v36 = vsub.f32 0.0, %v2855_v59  ;;  %v644_v49 = vadd.f32 %v5627_v6, %v4025_v58  ;;  %v5630_v33 = vld [vmem:[#allocation16_spill] sm:$0xff] }
 0x1d4   : > { %v4837_v38 = vpop.eup %3498  ;;  %v2048_v60 = vmul.f32 %v4775_v32, %v1819_v24  ;;  %3510 = vrcp.f32 %v1055_v30  ;;  %v2188_v3 = vpack.c.bf16 %v4625_v16, %v4616_v50  ;;  %vm1934_vm3 = vcmp.lt.s32.totalorder %v4786_v51, 512  ;;  %v5628_v16 = vld [vmem:[#allocation12_spill] sm:$0xff] }
 0x1d5   : > { %3512 = vlog2.f32 %v1055_v30  ;;  %v972_v13 = vmul.f32 1.442695, %v4833_v36  ;;  %v2856_v47 = vclamps-f32 %v644_v49, 13.81551  ;;  %v1870_v48 = vadd.s32 160, %v5597_v61 }
 0x1d6   : > { %v4845_v27 = vadd.f32 %v2129_v19, %v2048_v60  ;;  %3514 = vpow2.f32 %v968_v10  ;;  %2422 = vmatprep.mubr.bf16.mxu1 %v2188_v3  ;;  %v2187_v32 = vpack.c.bf16 %v4620_v43, %v4611_v35  ;;  %v4851_v22 = vsel %vm1933_vm2, 1.0, %v5553_v7 }
 0x1d7   : > { %v3501_v54 = vpop.eup %3500  ;;  %3516 = vpow2.f32 %v970_v18  ;;  %v4853_v50 = vsub.f32 0.0, %v2856_v47  ;;  %v648_v51 = vadd.f32 %v5628_v16, %v4021_v56  ;;  %v4858_v28 = vsel %vm1934_vm3, 1.0, %v5553_v7 }
 0x1d8   : > { %v1281_v52 = vmul.f32 0.6931472, %v3501_v54  ;;  %3518 = vpow2.f32 %v972_v13  ;;  %v1871_v11 = vadd.s32 168, %v5597_v61  ;;  %2423 = vmatmul.mubr.bf16.gmra.mrb[24].mxu1 %v2187_v32  ;;  %v1872_v39 = vadd.s32 176, %v5597_v61 }
 0x1d9   : > { %v974_v35 = vmul.f32 1.442695, %v4853_v50  ;;  %v2857_v43 = vclamps-f32 %v648_v51, 13.81551  ;;  %v4865_v34 = vadd.f32 %v5629_v55, %v4025_v58  ;;  %v1564_v37 = vsub.f32 1.0, %v4837_v38 }
 0x1da   : > { %v4867_v8 = vpop.eup %3502  ;;  %v1372_v57 = vsub.f32 0.0, %v1281_v52  ;;  %v1628_v25 = vsub.f32 %v4719_v31, %v1281_v52  ;;  %v4872_v40 = vadd.s32 %v4017_v53, %v1870_v48  ;;  %v4878_v30 = vadd.f32 %v5630_v33, %v4021_v56 }
 0x1db   : > { %v3505_v15 = vpop.eup %3504  ;;  %3520 = vpow2.f32 %v974_v35  ;;  %v4874_v29 = vsub.f32 0.0, %v2857_v43  ;;  %v4881_v26 = vadd.s32 184, %v5597_v61  ;;  %v4886_v31 = vadd.s32 %v4017_v53, %v1871_v11 }
 0x1dc   : > { %v4883_v12 = vpop.eup %3506  ;;  %v2913_v19 = vadd.f32 3.912023, %v1372_v57  ;;  %v2977_v2 = vadd.f32 0.020202707, %v1628_v25  ;;  %v1283_v59 = vmul.f32 0.6931472, %v3505_v15  ;;  %v4891_v6 = vadd.s32 %v4017_v53, %v1872_v39 }
 0x1dd   : > { %v3509_v24 = vpop.eup %3508  ;;  %v1565_v10 = vsub.f32 1.0, %v4867_v8  ;;  %v976_v18 = vmul.f32 1.442695, %v4874_v29  ;;  %v2858_v49 = vclamps-f32 %v4865_v34, 13.81551  ;;  %v1566_v16 = vsub.f32 1.0, %v4883_v12 }
 0x1de   : > { %v4894_v60 = vpop.eup %3510  ;;  %v1500_v3 = vmul.f32 %v4837_v38, %v2913_v19  ;;  %v1756_v13 = vmul.f32 %v2977_v2, %v1564_v37  ;;  %v1373_v47 = vsub.f32 0.0, %v1283_v59  ;;  %v1629_v48 = vsub.f32 %v4725_v42, %v1283_v59 }
 0x1df   : > { %v3513_v32 = vpop.eup %3512  ;;  %v1285_v54 = vmul.f32 0.6931472, %v3509_v24  ;;  %3522 = vpow2.f32 %v976_v18  ;;  %v2859_v51 = vclamps-f32 %v4878_v30, 13.81551  ;;  %v1567_v37 = vsub.f32 1.0, %v4894_v60 }
 0x1e0   : > { %v3515_v52 = vpop.eup %3514  ;;  %v1820_v11 = vadd.f32 %v1756_v13, %v1500_v3  ;;  %v2914_v35 = vadd.f32 3.912023, %v1373_v47  ;;  %v2978_v43 = vadd.f32 0.020202707, %v1629_v48  ;;  %v1287_v39 = vmul.f32 0.6931472, %v3513_v32 }
 0x1e1   : > { %v3517_v55 = vpop.eup %3516  ;;  %v1374_v34 = vsub.f32 0.0, %v1285_v54  ;;  %v1630_v57 = vsub.f32 %v4745_v9, %v1285_v54  ;;  %v1056_v25 = vadd.f32 1.0, %v3515_v52  ;;  %vm1935_vm4 = vcmp.lt.s32.totalorder %v4872_v40, 512 }
 0x1e2   : > { %v3519_v42 = vpop.eup %3518  ;;  %v2049_v15 = vmul.f32 %v4851_v22, %v1820_v11  ;;  %v1501_v33 = vmul.f32 %v4867_v8, %v2914_v35  ;;  %v1757_v19 = vmul.f32 %v2978_v43, %v1565_v10  ;;  %v1375_v2 = vsub.f32 0.0, %v1287_v39 }
 0x1e3   : > { %v2915_v30 = vadd.f32 3.912023, %v1374_v34  ;;  %v2979_v59 = vadd.f32 0.020202707, %v1630_v57  ;;  %v1631_v24 = vsub.f32 %v4763_v14, %v1287_v39  ;;  %3524 = vrcp.f32 %v1056_v25 }
 0x1e4   : > { %v2094_v18 = vadd.f32 %v4831_v46, %v2049_v15  ;;  %v1821_v9 = vadd.f32 %v1757_v19, %v1501_v33  ;;  %v2916_v3 = vadd.f32 3.912023, %v1375_v2  ;;  %3526 = vlog2.f32 %v1056_v25  ;;  %v5632_v2 = vld [vmem:[#allocation7_spill] sm:$0xff] }
 0x1e5   : > { %v3521_v13 = vpop.eup %3520  ;;  %v1502_v47 = vmul.f32 %v4883_v12, %v2915_v30  ;;  %v1758_v48 = vmul.f32 %v2979_v59, %v1566_v16  ;;  %v2980_v32 = vadd.f32 0.020202707, %v1631_v24  ;;  %v1057_v54 = vadd.f32 1.0, %v3517_v55  ;;  %v5631_v16 = vld [vmem:[#allocation17_spill] sm:$0xff] }
 0x1e6   : > { %vm1936_vm5 = vcmp.lt.s32.totalorder %v4886_v31, 512  ;;  %v2050_v10 = vmul.f32 %v4851_v22, %v1821_v9  ;;  %v1503_v14 = vmul.f32 %v4894_v60, %v2916_v3  ;;  %v1058_v52 = vadd.f32 1.0, %v3519_v42 }
 0x1e7   : > { %v4911_v11 = vsub.f32 0.0, %v2858_v49  ;;  %v1822_v35 = vadd.f32 %v1758_v48, %v1502_v47  ;;  %v1759_v46 = vmul.f32 %v2980_v32, %v1567_v37  ;;  %3528 = vrcp.f32 %v1057_v54 }
 0x1e8   : > { %v1059_v43 = vadd.f32 1.0, %v3521_v13  ;;  %v2131_v39 = vadd.f32 %v4845_v27, %v2050_v10  ;;  %3530 = vlog2.f32 %v1057_v54  ;;  %vm1937_vm6 = vcmp.lt.s32.totalorder %v4891_v6, 512 }
 0x1e9   : > { %v654_v55 = vadd.f32 %v5631_v16, %v4025_v58  ;;  %v3523_v34 = vpop.eup %3522  ;;  %v2051_v22 = vmul.f32 %v4858_v28, %v1822_v35  ;;  %v1823_v57 = vadd.f32 %v1759_v46, %v1503_v14  ;;  %3532 = vrcp.f32 %v1058_v52 }
 0x1ea   : > { %v4918_v25 = vsub.f32 0.0, %v2859_v51  ;;  %3534 = vlog2.f32 %v1058_v52  ;;  %v1060_v49 = vadd.f32 1.0, %v3523_v34  ;;  %v978_v37 = vmul.f32 1.442695, %v4911_v11 }
 0x1eb   : > { %v2860_v42 = vclamps-f32 %v654_v55, 13.81551  ;;  %v4921_v15 = vadd.f32 %v2094_v18, %v2051_v22  ;;  %v2052_v27 = vmul.f32 %v4858_v28, %v1823_v57  ;;  %3536 = vrcp.f32 %v1059_v43  ;;  %v5633_v18 = vld [vmem:[#allocation18_spill] sm:$0xff] }
 0x1ec   : > { %v2190_v33 = vpack.c.bf16 %v4759_v4, %v4700_v20  ;;  %3538 = vlog2.f32 %v1059_v43  ;;  %v2189_v51 = vpack.c.bf16 %v4712_v17, %v4656_v21  ;;  %v658_v30 = vadd.f32 %v5632_v2, %v4021_v56 }
 0x1ed   : > { %v4926_v19 = vsub.f32 0.0, %v2860_v42  ;;  %v4932_v59 = vpop.eup %3524  ;;  %v4934_v24 = vadd.f32 %v2131_v39, %v2052_v27  ;;  %3540 = vrcp.f32 %v1060_v49  ;;  %v980_v28 = vmul.f32 1.442695, %v4918_v25 }
 0x1ee   : > { %2430 = vmatprep.mubr.bf16.mxu1 %v2190_v33  ;;  %v660_v20 = vadd.f32 %v5633_v18, %v4025_v58  ;;  %v3527_v4 = vpop.eup %3526  ;;  %v4942_v9 = vsel %vm1935_vm4, 1.0, %v5553_v7  ;;  %3542 = vlog2.f32 %v1060_v49  ;;  %v2861_v17 = vclamps-f32 %v658_v30, 13.81551 }
 0x1ef   : > { %v982_v21 = vmul.f32 1.442695, %v4926_v19  ;;  %2431 = vmatmul.mubr.bf16.gmra.mrb[28].mxu1 %v2189_v51  ;;  %v1289_v3 = vmul.f32 0.6931472, %v3527_v4  ;;  %3544 = vpow2.f32 %v978_v37  ;;  %v1874_v13 = vadd.s32 192, %v5597_v61 }
 0x1f0   : > { %v2862_v47 = vclamps-f32 %v660_v20, 13.81551  ;;  %v4949_v48 = vsel %vm1936_vm5, 1.0, %v5553_v7  ;;  %v4954_v40 = vsel %vm1937_vm6, 1.0, %v5553_v7  ;;  %v4958_v32 = vadd.s32 %v4017_v53, %v4881_v26  ;;  %v5634_v26 = vld [vmem:[#allocation8_spill] sm:$0xff] }
 0x1f1   : > { %v4960_v54 = vsub.f32 0.0, %v2861_v17  ;;  %v4962_v10 = vpop.eup %3528  ;;  %v1376_v14 = vsub.f32 0.0, %v1289_v3  ;;  %v1568_v52 = vsub.f32 1.0, %v4932_v59  ;;  %v1632_v31 = vsub.f32 %v4806_v63, %v1289_v3 }
 0x1f2   : > { %3546 = vpow2.f32 %v980_v28  ;;  %v3531_v35 = vpop.eup %3530  ;;  %v4967_v46 = vsub.f32 0.0, %v2862_v47  ;;  %v4971_v43 = vadd.f32 %v5634_v26, %v4021_v56  ;;  %v4976_v22 = vadd.s32 %v4017_v53, %v1874_v13 }
 0x1f3   : > { %3548 = vpow2.f32 %v982_v21  ;;  %v984_v6 = vmul.f32 1.442695, %v4960_v54  ;;  %v4973_v39 = vpop.eup %3532  ;;  %v2917_v16 = vadd.f32 3.912023, %v1376_v14  ;;  %v2981_v55 = vadd.f32 0.020202707, %v1632_v31 }
 0x1f4   : > { %v1291_v34 = vmul.f32 0.6931472, %v3531_v35  ;;  %v3535_v63 = vpop.eup %3534  ;;  %v1569_v57 = vsub.f32 1.0, %v4962_v10  ;;  %v986_v49 = vmul.f32 1.442695, %v4967_v46  ;;  %v4981_v37 = vadd.s32 200, %v5597_v61 }
 0x1f5   : > { %3550 = vpow2.f32 %v984_v6  ;;  %v4984_v42 = vpop.eup %3536  ;;  %v1504_v27 = vmul.f32 %v4932_v59, %v2917_v16  ;;  %v1760_v33 = vmul.f32 %v2981_v55, %v1568_v52  ;;  %v1293_v28 = vmul.f32 0.6931472, %v3535_v63 }
 0x1f6   : > { %v1377_v51 = vsub.f32 0.0, %v1291_v34  ;;  %v1633_v2 = vsub.f32 %v4825_v5, %v1291_v34  ;;  %v3539_v30 = vpop.eup %3538  ;;  %v1570_v18 = vsub.f32 1.0, %v4973_v39  ;;  %3552 = vpow2.f32 %v986_v49 }
 0x1f7   : > { %v2863_v20 = vclamps-f32 %v4971_v43, 13.81551  ;;  %v4991_v4 = vpop.eup %3540  ;;  %v1824_v21 = vadd.f32 %v1760_v33, %v1504_v27  ;;  %v1295_v13 = vmul.f32 0.6931472, %v3539_v30  ;;  %v1378_v14 = vsub.f32 0.0, %v1293_v28 }
 0x1f8   : > { %5635 = vst [vmem:[#allocation28_spill] sm:$0xff] %v4991_v4  ;;  %v2918_v17 = vadd.f32 3.912023, %v1377_v51  ;;  %v2982_v3 = vadd.f32 0.020202707, %v1633_v2  ;;  %v3543_v47 = vpop.eup %3542  ;;  %v1634_v52 = vsub.f32 %v4833_v36, %v1293_v28  ;;  %v1571_v5 = vsub.f32 1.0, %v4984_v42 }
 0x1f9   : > { %v1572_v31 = vsub.f32 1.0, %v4991_v4  ;;  %v3545_v35 = vpop.eup %3544  ;;  %v2053_v6 = vmul.f32 %v4942_v9, %v1824_v21  ;;  %v1379_v16 = vsub.f32 0.0, %v1295_v13  ;;  %v2919_v36 = vadd.f32 3.912023, %v1378_v14 }
 0x1fa   : > { %v1505_v26 = vmul.f32 %v4962_v10, %v2918_v17  ;;  %v1761_v43 = vmul.f32 %v2982_v3, %v1569_v57  ;;  %v2983_v55 = vadd.f32 0.020202707, %v1634_v52  ;;  %v1635_v34 = vsub.f32 %v4853_v50, %v1295_v13 }
 0x1fb   : > { %v1297_v63 = vmul.f32 0.6931472, %v3543_v47  ;;  %v2096_v57 = vadd.f32 %v4921_v15, %v2053_v6  ;;  %v2920_v33 = vadd.f32 3.912023, %v1379_v16  ;;  %v1061_v51 = vadd.f32 1.0, %v3545_v35 }
 0x1fc   : > { %v3547_v49 = vpop.eup %3546  ;;  %v1825_v27 = vadd.f32 %v1761_v43, %v1505_v26  ;;  %v1506_v30 = vmul.f32 %v4973_v39, %v2919_v36  ;;  %v1762_v28 = vmul.f32 %v2983_v55, %v1570_v18  ;;  %v2984_v21 = vadd.f32 0.020202707, %v1635_v34 }
 0x1fd   : > { %v3549_v2 = vpop.eup %3548  ;;  %v1380_v17 = vsub.f32 0.0, %v1297_v63  ;;  %vm1938_vm7 = vcmp.lt.s32.totalorder %v4958_v32, 512  ;;  %v1507_v3 = vmul.f32 %v4984_v42, %v2920_v33  ;;  %v1636_v13 = vsub.f32 %v4874_v29, %v1297_v63 }
 0x1fe   : > { %v2054_v50 = vmul.f32 %v4942_v9, %v1825_v27  ;;  %3554 = vrcp.f32 %v1061_v51  ;;  %v1826_v15 = vadd.f32 %v1762_v28, %v1506_v30  ;;  %v1763_v14 = vmul.f32 %v2984_v21, %v1571_v5  ;;  %v5636_v27 = vld [vmem:[#allocation19_spill] sm:$0xff] }
 0x1ff   : > { %v3551_v47 = vpop.eup %3550  ;;  %v2921_v52 = vadd.f32 3.912023, %v1380_v17  ;;  %3556 = vlog2.f32 %v1061_v51  ;;  %v2985_v6 = vadd.f32 0.020202707, %v1636_v13  ;;  %v1062_v18 = vadd.f32 1.0, %v3547_v49  ;;  %v5639_v17 = vld [vmem:[#allocation13_spill] sm:$0xff] }
 0x200   : > { %v2133_v35 = vadd.f32 %v4934_v24, %v2054_v50  ;;  %v1063_v26 = vadd.f32 1.0, %v3549_v2  ;;  %v3553_v43 = vpop.eup %3552  ;;  %v2055_v16 = vmul.f32 %v4949_v48, %v1826_v15  ;;  %v1827_v36 = vadd.f32 %v1763_v14, %v1507_v3 }
 0x201   : > { %v1508_v9 = vmul.f32 %v4991_v4, %v2921_v52  ;;  %vm1939_vm8 = vcmp.lt.s32.totalorder %v4976_v22, 512  ;;  %v1764_v29 = vmul.f32 %v2985_v6, %v1572_v31  ;;  %3558 = vrcp.f32 %v1062_v18  ;;  %v5637_v31 = vld [vmem:[#allocation20_spill] sm:$0xff] }
 0x202   : > { %v1064_v55 = vadd.f32 1.0, %v3551_v47  ;;  %v5018_v34 = vsub.f32 0.0, %v2863_v20  ;;  %v2097_v5 = vadd.f32 %v2096_v57, %v2055_v16  ;;  %v2056_v63 = vmul.f32 %v4949_v48, %v1827_v36 }
 0x203   : > { %3560 = vlog2.f32 %v1062_v18  ;;  %v1065_v24 = vadd.f32 1.0, %v3553_v43  ;;  %v1828_v49 = vadd.f32 %v1764_v29, %v1508_v9  ;;  %v664_v33 = vadd.f32 %v5636_v27, %v4025_v58 }
 0x204   : > { %3562 = vrcp.f32 %v1063_v26  ;;  %v2192_v51 = vpack.c.bf16 %v4810_v44, %v4792_v62  ;;  %v5025_v2 = vadd.f32 %v2133_v35, %v2056_v63  ;;  %v2191_v20 = vpack.c.bf16 %v4802_v23, %v4779_v0  ;;  %v5638_v62 = vld [vmem:[#allocation10_spill] sm:$0xff] }
 0x205   : > { %3564 = vlog2.f32 %v1063_v26  ;;  %v668_v57 = vadd.f32 %v5637_v31, %v4021_v56  ;;  %v2057_v48 = vmul.f32 %v4954_v40, %v1828_v49  ;;  %v988_v30 = vmul.f32 1.442695, %v5018_v34 }
 0x206   : > { %3566 = vrcp.f32 %v1064_v55  ;;  %v2864_v28 = vclamps-f32 %v664_v33, 13.81551  ;;  %2438 = vmatprep.mubr.bf16.mxu1 %v2192_v51  ;;  %v670_v44 = vadd.f32 %v5638_v62, %v4025_v58  ;;  %v672_v50 = vadd.f32 %v5639_v17, %v4021_v56 }
 0x207   : > { %3568 = vlog2.f32 %v1064_v55  ;;  %2439 = vmatmul.mubr.bf16.gmra.mrb[32].mxu1 %v2191_v20  ;;  %v2865_v21 = vclamps-f32 %v668_v57, 13.81551  ;;  %v5039_v23 = vadd.f32 %v2097_v5, %v2057_v48  ;;  %v5044_v3 = vsel %vm1938_vm7, 1.0, %v5553_v7 }
 0x208   : > { %v5037_v0 = vpop.eup %3554  ;;  %3570 = vrcp.f32 %v1065_v24  ;;  %v5046_v13 = vsub.f32 0.0, %v2864_v28  ;;  %v5051_v15 = vsel %vm1939_vm8, 1.0, %v5553_v7  ;;  %v2866_v52 = vclamps-f32 %v670_v44, 13.81551 }
 0x209   : > { %5640 = vst [vmem:[#allocation29_spill] sm:$0xff] %v5037_v0  ;;  %v3557_v47 = vpop.eup %3556  ;;  %3572 = vlog2.f32 %v1065_v24  ;;  %v5053_v14 = vsub.f32 0.0, %v2865_v21  ;;  %v1876_v32 = vadd.s32 208, %v5597_v61  ;;  %v5059_v18 = vadd.s32 %v4017_v53, %v4981_v37 }
 0x20a   : > { %v1299_v35 = vmul.f32 0.6931472, %v3557_v47  ;;  %3574 = vpow2.f32 %v988_v30  ;;  %v990_v6 = vmul.f32 1.442695, %v5046_v13  ;;  %v5062_v43 = vsub.f32 0.0, %v2866_v52  ;;  %v5641_v47 = vld [vmem:[#allocation24_spill] sm:$0xff] }
 0x20b   : > { %v992_v26 = vmul.f32 1.442695, %v5053_v14  ;;  %v2867_v22 = vclamps-f32 %v672_v50, 13.81551  ;;  %v5064_v16 = vpop.eup %3558  ;;  %v1877_v29 = vadd.s32 216, %v5597_v61  ;;  %v1573_v5 = vsub.f32 1.0, %v5037_v0 }
 0x20c   : > { %v1381_v36 = vsub.f32 0.0, %v1299_v35  ;;  %v1637_v9 = vsub.f32 %v4911_v11, %v1299_v35  ;;  %3576 = vpow2.f32 %v990_v6  ;;  %v994_v37 = vmul.f32 1.442695, %v5062_v43 }
 0x20d   : > { %v3561_v55 = vpop.eup %3560  ;;  %3578 = vpow2.f32 %v992_v26  ;;  %v5070_v63 = vsub.f32 0.0, %v2867_v22  ;;  %v5075_v51 = vadd.s32 %v4017_v53, %v1876_v32  ;;  %v1574_v20 = vsub.f32 1.0, %v5064_v16 }
 0x20e   : > { %v5072_v24 = vpop.eup %3562  ;;  %v2922_v49 = vadd.f32 3.912023, %v1381_v36  ;;  %v2986_v27 = vadd.f32 0.020202707, %v1637_v9  ;;  %v1301_v33 = vmul.f32 0.6931472, %v3561_v55  ;;  %3580 = vpow2.f32 %v994_v37 }
 0x20f   : > { %v3565_v11 = vpop.eup %3564  ;;  %v996_v31 = vmul.f32 1.442695, %v5070_v63  ;;  %v5080_v57 = vadd.s32 %v4017_v53, %v1877_v29  ;;  %v1575_v50 = vsub.f32 1.0, %v5072_v24  ;;  %v674_v52 = vadd.f32 %v5641_v47, %v4025_v58 }
 0x210   : > { %v5082_v48 = vpop.eup %3566  ;;  %v1509_v30 = vmul.f32 %v5037_v0, %v2922_v49  ;;  %v1765_v28 = vmul.f32 %v2986_v27, %v1573_v5  ;;  %v1382_v21 = vsub.f32 0.0, %v1301_v33  ;;  %v1638_v62 = vsub.f32 %v4918_v25, %v1301_v33 }
 0x211   : > { %v3569_v44 = vpop.eup %3568  ;;  %v1303_v17 = vmul.f32 0.6931472, %v3565_v11  ;;  %3582 = vpow2.f32 %v996_v31  ;;  %v1576_v25 = vsub.f32 1.0, %v5082_v48  ;;  %vm1940_vm9 = vcmp.lt.s32.totalorder %v5059_v18, 512 }
 0x212   : > { %v5089_v35 = vpop.eup %3570  ;;  %v1829_v6 = vadd.f32 %v1765_v28, %v1509_v30  ;;  %v2923_v32 = vadd.f32 3.912023, %v1382_v21  ;;  %v2987_v26 = vadd.f32 0.020202707, %v1638_v62  ;;  %v1305_v22 = vmul.f32 0.6931472, %v3569_v44 }
 0x213   : > { %v3573_v36 = vpop.eup %3572  ;;  %v1383_v9 = vsub.f32 0.0, %v1303_v17  ;;  %v1639_v29 = vsub.f32 %v4926_v19, %v1303_v17  ;;  %v1577_v55 = vsub.f32 1.0, %v5089_v35  ;;  %vm1941_vm10 = vcmp.lt.s32.totalorder %v5075_v51, 512 }
 0x214   : > { %v3575_v5 = vpop.eup %3574  ;;  %v2058_v37 = vmul.f32 %v4954_v40, %v1829_v6  ;;  %v1510_v49 = vmul.f32 %v5064_v16, %v2923_v32  ;;  %v1766_v27 = vmul.f32 %v2987_v26, %v1574_v20  ;;  %v1384_v33 = vsub.f32 0.0, %v1305_v22 }
 0x215   : > { %v2924_v11 = vadd.f32 3.912023, %v1383_v9  ;;  %v2988_v31 = vadd.f32 0.020202707, %v1639_v29  ;;  %v1640_v30 = vsub.f32 %v4960_v54, %v1305_v22  ;;  %v1307_v28 = vmul.f32 0.6931472, %v3573_v36 }
 0x216   : > { %v3577_v21 = vpop.eup %3576  ;;  %v2135_v62 = vadd.f32 %v5025_v2, %v2058_v37  ;;  %v1830_v19 = vadd.f32 %v1766_v27, %v1510_v49  ;;  %v2925_v44 = vadd.f32 3.912023, %v1384_v33  ;;  %v1066_v17 = vadd.f32 1.0, %v3575_v5 }
 0x217   : > { %v3579_v47 = vpop.eup %3578  ;;  %v1511_v4 = vmul.f32 %v5072_v24, %v2924_v11  ;;  %v1767_v0 = vmul.f32 %v2988_v31, %v1575_v50  ;;  %v2989_v40 = vadd.f32 0.020202707, %v1640_v30  ;;  %v1385_v6 = vsub.f32 0.0, %v1307_v28 }
 0x218   : > { %v2059_v20 = vmul.f32 %v5044_v3, %v1830_v19  ;;  %v1512_v32 = vmul.f32 %v5082_v48, %v2925_v44  ;;  %v1641_v26 = vsub.f32 %v4967_v46, %v1307_v28  ;;  %3584 = vrcp.f32 %v1066_v17  ;;  %v3581_v54 = vpop.eup %3580 }
 0x219   : > { %v1831_v2 = vadd.f32 %v1767_v0, %v1511_v4  ;;  %v1768_v22 = vmul.f32 %v2989_v40, %v1576_v25  ;;  %v2926_v36 = vadd.f32 3.912023, %v1385_v6  ;;  %3586 = vlog2.f32 %v1066_v17 }
 0x21a   : > { %v2099_v50 = vadd.f32 %v5039_v23, %v2059_v20  ;;  %v2990_v9 = vadd.f32 0.020202707, %v1641_v26  ;;  %v1067_v29 = vadd.f32 1.0, %v3577_v21  ;;  %v1068_v5 = vadd.f32 1.0, %v3579_v47 }
 0x21b   : > { %v3583_v37 = vpop.eup %3582  ;;  %v2060_v49 = vmul.f32 %v5044_v3, %v1831_v2  ;;  %v1832_v27 = vadd.f32 %v1768_v22, %v1512_v32  ;;  %v1513_v46 = vmul.f32 %v5089_v35, %v2926_v36  ;;  %v1069_v33 = vadd.f32 1.0, %v3581_v54  ;;  %v5642_v22 = vld [vmem:[#allocation5_spill] sm:$0xff] }
 0x21c   : > { %v1769_v11 = vmul.f32 %v2990_v9, %v1577_v55  ;;  %3588 = vrcp.f32 %v1067_v29  ;;  %v1070_v31 = vadd.f32 1.0, %v3583_v37  ;;  %v2868_v30 = vclamps-f32 %v674_v52, 13.81551  ;;  %v5110_v25 = vpop.f32.mrb[0].mxu1 }
 0x21d   : > { %v2136_v4 = vadd.f32 %v2135_v62, %v2060_v49  ;;  %v2061_v0 = vmul.f32 %v5051_v15, %v1832_v27  ;;  %3590 = vlog2.f32 %v1067_v29  ;;  %v2194_v23 = vpack.c.bf16 %v4894_v60, %v4867_v8  ;;  %v5116_v55 = vpop.f32.mrb[1].mxu1 }
 0x21e   : > { %v1833_v28 = vadd.f32 %v1769_v11, %v1513_v46  ;;  %3592 = vrcp.f32 %v1068_v5  ;;  %v5112_v3 = vsub.f32 0.0, %v2868_v30  ;;  %v2193_v21 = vpack.c.bf16 %v4883_v12, %v4837_v38  ;;  %v5123_v60 = vpop.f32.mrb[2].mxu1 }
 0x21f   : > { %v5118_v19 = vadd.f32 %v2099_v50, %v2061_v0  ;;  %3594 = vlog2.f32 %v1068_v5  ;;  %vm1942_vm11 = vcmp.lt.s32.totalorder %v5080_v57, 512  ;;  %2446 = vmatprep.mubr.bf16.mxu1 %v2194_v23  ;;  %v678_v8 = vadd.f32 %v4644_v41, %v4021_v56  ;;  %v5129_v12 = vpop.f32.mrb[3].mxu1 }
 0x220   : > { %v2062_v52 = vmul.f32 %v5051_v15, %v1833_v28  ;;  %3596 = vrcp.f32 %v1069_v33  ;;  %v998_v62 = vmul.f32 1.442695, %v5112_v3  ;;  %2447 = vmatmul.mubr.bf16.gmra.mrb[36].mxu1 %v2193_v21  ;;  %v680_v38 = vadd.f32 %v4649_v1, %v4025_v58 }
 0x221   : > { %3598 = vlog2.f32 %v1069_v33  ;;  %v2869_v44 = vclamps-f32 %v678_v8, 13.81551  ;;  %v1878_v17 = vadd.s32 224, %v5597_v61  ;;  %v682_v41 = vadd.f32 %v4654_v45, %v4021_v56 }
 0x222   : > { %v5134_v47 = vpop.eup %3584  ;;  %v5136_v40 = vadd.f32 %v2136_v4, %v2062_v52  ;;  %3600 = vrcp.f32 %v1070_v31  ;;  %v2870_v15 = vclamps-f32 %v680_v38, 13.81551  ;;  %v5141_v1 = vsel %vm1940_vm9, 1.0, %v5553_v7 }
 0x223   : > { %v3587_v6 = vpop.eup %3586  ;;  %v5146_v20 = vsel %vm1941_vm10, 1.0, %v5553_v7  ;;  %3602 = vlog2.f32 %v1070_v31  ;;  %v5148_v32 = vsub.f32 0.0, %v2869_v44  ;;  %v5153_v26 = vsel %vm1942_vm11, 1.0, %v5553_v7 }
 0x224   : > { %v1309_v45 = vmul.f32 0.6931472, %v3587_v6  ;;  %3604 = vpow2.f32 %v998_v62  ;;  %v5155_v54 = vsub.f32 0.0, %v2870_v15  ;;  %v5159_v2 = vadd.s32 %v4017_v53, %v1878_v17 }
 0x225   : > { %v1000_v18 = vmul.f32 1.442695, %v5148_v32  ;;  %v2871_v51 = vclamps-f32 %v682_v41, 13.81551  ;;  %v684_v36 = vadd.f32 %v5642_v22, %v4025_v58  ;;  %v2196_v5 = vpack.c.bf16 %v4984_v42, %v4962_v10  ;;  %v5169_v37 = vpop.f32.mrb[4].mxu1 }
 0x226   : > { %v5163_v50 = vpop.eup %3588  ;;  %v1386_v9 = vsub.f32 0.0, %v1309_v45  ;;  %v1642_v29 = vsub.f32 %v5018_v34, %v1309_v45  ;;  %v1002_v57 = vmul.f32 1.442695, %v5155_v54  ;;  %5643 = vst [vmem:[#allocation31_spill] sm:$0xff] %v5169_v37  ;;  %v1578_v27 = vsub.f32 1.0, %v5134_v47  ;;  %v5177_v11 = vpop.f32.mrb[5].mxu1 }
 0x227   : > { %v3591_v49 = vpop.eup %3590  ;;  %3606 = vpow2.f32 %v1000_v18  ;;  %v5172_v46 = vsub.f32 0.0, %v2871_v51  ;;  %v5175_v33 = vadd.s32 232, %v5597_v61  ;;  %5644 = vst [vmem:[#allocation34_spill] sm:$0xff] %v5177_v11  ;;  %2454 = vmatprep.mubr.bf16.mxu1 %v2196_v5  ;;  %v1579_v42 = vsub.f32 1.0, %v5163_v50  ;;  %v5188_v44 = vpop.f32.mrb[6].mxu1 }
 0x228   : > { %v5179_v31 = vpop.eup %3592  ;;  %v2927_v34 = vadd.f32 3.912023, %v1386_v9  ;;  %v2991_v30 = vadd.f32 0.020202707, %v1642_v29  ;;  %v1311_v4 = vmul.f32 0.6931472, %v3591_v49  ;;  %3608 = vpow2.f32 %v1002_v57 }
 0x229   : > { %v3595_v10 = vpop.eup %3594  ;;  %v1580_v0 = vsub.f32 1.0, %v5179_v31  ;;  %v1004_v23 = vmul.f32 1.442695, %v5172_v46  ;;  %v2872_v28 = vclamps-f32 %v684_v36, 13.81551  ;;  %5645 = vst [vmem:[#allocation27_spill] sm:$0xff] %v5188_v44 }
 0x22a   : > { %v5184_v21 = vpop.eup %3596  ;;  %v1514_v8 = vmul.f32 %v5134_v47, %v2927_v34  ;;  %v1770_v52 = vmul.f32 %v2991_v30, %v1578_v27  ;;  %v1387_v62 = vsub.f32 0.0, %v1311_v4  ;;  %v1643_v38 = vsub.f32 %v5046_v13, %v1311_v4  ;;  %v5193_v45 = vpop.f32.mrb[7].mxu1 }
 0x22b   : > { %v3599_v17 = vpop.eup %3598  ;;  %v1313_v41 = vmul.f32 0.6931472, %v3595_v10  ;;  %v1581_v15 = vsub.f32 1.0, %v5184_v21  ;;  %3610 = vpow2.f32 %v1004_v23  ;;  %v5191_v6 = vsub.f32 0.0, %v2872_v28  ;;  %5646 = vst [vmem:[#allocation14_spill] sm:$0xff] %v5193_v45 }
 0x22c   : > { %v5195_v18 = vpop.eup %3600  ;;  %v1834_v51 = vadd.f32 %v1770_v52, %v1514_v8  ;;  %v2928_v22 = vadd.f32 3.912023, %v1387_v62  ;;  %v2992_v36 = vadd.f32 0.020202707, %v1643_v38  ;;  %v1315_v9 = vmul.f32 0.6931472, %v3599_v17 }
 0x22d   : > { %v3603_v29 = vpop.eup %3602  ;;  %v1388_v57 = vsub.f32 0.0, %v1313_v41  ;;  %v1644_v13 = vsub.f32 %v5053_v14, %v1313_v41  ;;  %v1582_v5 = vsub.f32 1.0, %v5195_v18  ;;  %v1006_v49 = vmul.f32 1.442695, %v5191_v6 }
 0x22e   : > { %v3605_v27 = vpop.eup %3604  ;;  %v2063_v34 = vmul.f32 %v5141_v1, %v1834_v51  ;;  %v1515_v30 = vmul.f32 %v5163_v50, %v2928_v22  ;;  %v1771_v4 = vmul.f32 %v2992_v36, %v1579_v42  ;;  %v1389_v10 = vsub.f32 0.0, %v1315_v9 }
 0x22f   : > { %v2929_v23 = vadd.f32 3.912023, %v1388_v57  ;;  %v2993_v28 = vadd.f32 0.020202707, %v1644_v13  ;;  %v1645_v8 = vsub.f32 %v5062_v43, %v1315_v9  ;;  %v1317_v52 = vmul.f32 0.6931472, %v3603_v29 }
 0x230   : > { %v2101_v62 = vadd.f32 %v5118_v19, %v2063_v34  ;;  %v1835_v38 = vadd.f32 %v1771_v4, %v1515_v30  ;;  %v2930_v14 = vadd.f32 3.912023, %v1389_v10  ;;  %v1071_v17 = vadd.f32 1.0, %v3605_v27 }
 0x231   : > { %v3607_v41 = vpop.eup %3606  ;;  %v1516_v45 = vmul.f32 %v5179_v31, %v2929_v23  ;;  %v1772_v44 = vmul.f32 %v2993_v28, %v1580_v0  ;;  %v2994_v11 = vadd.f32 0.020202707, %v1645_v8  ;;  %v1390_v51 = vsub.f32 0.0, %v1317_v52 }
 0x232   : > { %v3609_v37 = vpop.eup %3608  ;;  %v2064_v42 = vmul.f32 %v5141_v1, %v1835_v38  ;;  %v1517_v22 = vmul.f32 %v5184_v21, %v2930_v14  ;;  %v1646_v36 = vsub.f32 %v5070_v63, %v1317_v52  ;;  %3612 = vrcp.f32 %v1071_v17 }
 0x233   : > { %v1836_v43 = vadd.f32 %v1772_v44, %v1516_v45  ;;  %v1773_v9 = vmul.f32 %v2994_v11, %v1581_v15  ;;  %v2931_v19 = vadd.f32 3.912023, %v1390_v51  ;;  %3614 = vlog2.f32 %v1071_v17 }
 0x234   : > { %v2138_v29 = vadd.f32 %v5136_v40, %v2064_v42  ;;  %v2995_v57 = vadd.f32 0.020202707, %v1646_v36  ;;  %v1072_v13 = vadd.f32 1.0, %v3607_v41  ;;  %v1073_v27 = vadd.f32 1.0, %v3609_v37  ;;  %v5647_v37 = vld [vmem:[#allocation21_spill] sm:$0xff] }
 0x235   : > { %v3611_v0 = vpop.eup %3610  ;;  %v2065_v34 = vmul.f32 %v5146_v20, %v1836_v43  ;;  %v1837_v30 = vadd.f32 %v1773_v9, %v1517_v22  ;;  %v1518_v1 = vmul.f32 %v5195_v18, %v2931_v19  ;;  %3616 = vpow2.f32 %v1006_v49 }
 0x236   : > { %v1774_v4 = vmul.f32 %v2995_v57, %v1582_v5  ;;  %vm1943_vm12 = vcmp.lt.s32.totalorder %v5159_v2, 512  ;;  %v1074_v63 = vadd.f32 1.0, %v3611_v0  ;;  %v2195_v11 = vpack.c.bf16 %v4973_v39, %v4932_v59  ;;  %v5648_v5 = vld [vmem:[#allocation23_spill] sm:$0xff]  ;;  %v5649_v59 = vld [vmem:[#allocation26_spill] sm:$0xff] }
 0x237   : > { %v2102_v44 = vadd.f32 %v2101_v62, %v2065_v34  ;;  %v2066_v40 = vmul.f32 %v5146_v20, %v1837_v30  ;;  %3618 = vlog2.f32 %v1072_v13  ;;  %v688_v15 = vadd.f32 %v5647_v37, %v4021_v56 }
 0x238   : > { %v1838_v45 = vadd.f32 %v1774_v4, %v1518_v1  ;;  %3620 = vrcp.f32 %v1072_v13  ;;  %2455 = vmatmul.mubr.bf16.gmra.mrb[40].mxu1 %v2195_v11  ;;  %v1880_v10 = vadd.s32 240, %v5597_v61  ;;  %v690_v49 = vadd.f32 %v5648_v5, %v4025_v58 }
 0x239   : > { %v5220_v23 = vadd.f32 %v2138_v29, %v2066_v40  ;;  %3622 = vlog2.f32 %v1073_v27  ;;  %v2873_v28 = vclamps-f32 %v688_v15, 13.81551  ;;  %v692_v39 = vadd.f32 %v5649_v59, %v4021_v56  ;;  %v5650_v56 = vld [vmem:[#allocation25_spill] sm:$0xff] }
 0x23a   : > { %v2067_v20 = vmul.f32 %v5153_v26, %v1838_v45  ;;  %3624 = vrcp.f32 %v1073_v27  ;;  %v1912_v8 = vadd.s32 %v4017_v53, %v5175_v33  ;;  %v2874_v52 = vclamps-f32 %v690_v49, 13.81551 }
 0x23b   : > { %3626 = vlog2.f32 %v1074_v63  ;;  %v5227_v62 = vsub.f32 0.0, %v2873_v28  ;;  %v1913_v38 = vadd.s32 %v4017_v53, %v1880_v10  ;;  %v2875_v14 = vclamps-f32 %v692_v39, 13.81551 }
 0x23c   : > { %v5230_v17 = vpop.eup %3612  ;;  %v5232_v41 = vadd.f32 %v2102_v44, %v2067_v20  ;;  %3628 = vrcp.f32 %v1074_v63  ;;  %v5234_v51 = vsub.f32 0.0, %v2874_v52  ;;  %v694_v42 = vadd.f32 %v5650_v56, %v4025_v58 }
 0x23d   : > { %v3615_v22 = vpop.eup %3614  ;;  %v5241_v33 = vsel %vm1943_vm12, 1.0, %v5553_v7  ;;  %v1008_v36 = vmul.f32 1.442695, %v5227_v62  ;;  %v5244_v43 = vsub.f32 0.0, %v2875_v14  ;;  %vm1944_vm13 = vcmp.lt.s32.totalorder %v1912_v8, 512 }
 0x23e   : > { %v1319_v9 = vmul.f32 0.6931472, %v3615_v22  ;;  %v1010_v19 = vmul.f32 1.442695, %v5234_v51  ;;  %v2876_v29 = vclamps-f32 %v694_v42, 13.81551 }
 0x23f   : > { %v3617_v57 = vpop.eup %3616  ;;  %3630 = vpow2.f32 %v1008_v36  ;;  %vm1945_vm14 = vcmp.lt.s32.totalorder %v1913_v38, 512  ;;  %v1012_v58 = vmul.f32 1.442695, %v5244_v43  ;;  %v1583_v34 = vsub.f32 1.0, %v5230_v17 }
 0x240   : > { %v1391_v13 = vsub.f32 0.0, %v1319_v9  ;;  %v1647_v27 = vsub.f32 %v5112_v3, %v1319_v9  ;;  %v1075_v2 = vadd.f32 1.0, %v3617_v57  ;;  %3632 = vpow2.f32 %v1010_v19 }
 0x241   : > { %v3619_v0 = vpop.eup %3618  ;;  %3634 = vpow2.f32 %v1012_v58  ;;  %v1881_v30 = vadd.s32 248, %v5597_v61  ;;  %v5251_v1 = vsub.f32 0.0, %v2876_v29  ;;  %v5257_v3 = vsel %vm1944_vm13, 1.0, %v5553_v7 }
 0x242   : > { %v5253_v4 = vpop.eup %3620  ;;  %v2932_v63 = vadd.f32 3.912023, %v1391_v13  ;;  %v2996_v11 = vadd.f32 0.020202707, %v1647_v27  ;;  %v1321_v44 = vmul.f32 0.6931472, %v3619_v0  ;;  %3636 = vrcp.f32 %v1075_v2 }
 0x243   : > { %v3623_v40 = vpop.eup %3622  ;;  %3638 = vlog2.f32 %v1075_v2  ;;  %v5261_v37 = vsel %vm1945_vm14, 1.0, %v5553_v7  ;;  %v1014_v15 = vmul.f32 1.442695, %v5251_v1  ;;  %v1584_v39 = vsub.f32 1.0, %v5253_v4 }
 0x244   : > { %v5264_v45 = vpop.eup %3624  ;;  %v1519_v10 = vmul.f32 %v5230_v17, %v2932_v63  ;;  %v1775_v5 = vmul.f32 %v2996_v11, %v1583_v34  ;;  %v1392_v49 = vsub.f32 0.0, %v1321_v44  ;;  %v1648_v28 = vsub.f32 %v5148_v32, %v1321_v44  ;;  %v5651_v32 = vld [vmem:[#allocation29_spill] sm:$0xff] }
 0x245   : > { %v3627_v59 = vpop.eup %3626  ;;  %v1323_v20 = vmul.f32 0.6931472, %v3623_v40  ;;  %v5270_v8 = vadd.s32 %v4017_v53, %v1881_v30  ;;  %3640 = vpow2.f32 %v1014_v15  ;;  %v1585_v36 = vsub.f32 1.0, %v5264_v45 }
 0x246   : > { %v5272_v52 = vpop.eup %3628  ;;  %v1839_v38 = vadd.f32 %v1775_v5, %v1519_v10  ;;  %v2933_v14 = vadd.f32 3.912023, %v1392_v49  ;;  %v2997_v56 = vadd.f32 0.020202707, %v1648_v28  ;;  %v1325_v42 = vmul.f32 0.6931472, %v3627_v59 }
 0x247   : > { %v1393_v22 = vsub.f32 0.0, %v1323_v20  ;;  %v1649_v9 = vsub.f32 %v5155_v54, %v1323_v20  ;;  %v2198_v19 = vpack.c.bf16 %v5072_v24, %v5651_v32  ;;  %v1586_v0 = vsub.f32 1.0, %v5272_v52  ;;  %v3090_v30 = vpop.f32.mrb[8].mxu1 }
 0x248   : > { %v2068_v29 = vmul.f32 %v5153_v26, %v1839_v38  ;;  %v1520_v53 = vmul.f32 %v5253_v4, %v2933_v14  ;;  %v1776_v57 = vmul.f32 %v2997_v56, %v1584_v39  ;;  %v1394_v58 = vsub.f32 0.0, %v1325_v42  ;;  %v3091_v26 = vpop.f32.mrb[9].mxu1 }
 0x249   : > { %v3631_v13 = vpop.eup %3630  ;;  %v2934_v27 = vadd.f32 3.912023, %v1393_v22  ;;  %v2998_v2 = vadd.f32 0.020202707, %v1649_v9  ;;  %v1650_v34 = vsub.f32 %v5172_v46, %v1325_v42  ;;  %2462 = vmatprep.mubr.bf16.mxu1 %v2198_v19  ;;  %vm1946_vm15 = vcmp.lt.s32.totalorder %v5270_v8, 512  ;;  %v3093_v28 = vpop.f32.mrb[10].mxu1 }
 0x24a   : > { %v3633_v63 = vpop.eup %3632  ;;  %v2140_v54 = vadd.f32 %v5220_v23, %v2068_v29  ;;  %v1840_v11 = vadd.f32 %v1776_v57, %v1520_v53  ;;  %v2935_v24 = vadd.f32 3.912023, %v1394_v58  ;;  %v1076_v44 = vadd.f32 1.0, %v3631_v13  ;;  %v3094_v20 = vpop.f32.mrb[11].mxu1  ;;  %v5652_v9 = vld [vmem:[#allocation28_spill] sm:$0xff] }
 0x24b   : > { %v3635_v40 = vpop.eup %3634  ;;  %v1521_v15 = vmul.f32 %v5264_v45, %v2934_v27  ;;  %v1777_v10 = vmul.f32 %v2998_v2, %v1585_v36  ;;  %v2999_v5 = vadd.f32 0.020202707, %v1650_v34  ;;  %v1077_v49 = vadd.f32 1.0, %v3633_v63  ;;  %v5311_v63 = vld [vmem:[%s5499_s4] ss:$0 sm:$0xff] }
 0x24c   : > { %v5285_v59 = vpop.eup %3636  ;;  %v2069_v46 = vmul.f32 %v5241_v33, %v1840_v11  ;;  %v1522_v39 = vmul.f32 %v5272_v52, %v2935_v24  ;;  %3642 = vrcp.f32 %v1076_v44  ;;  %v1078_v23 = vadd.f32 1.0, %v3635_v40  ;;  %v5653_v11 = vld [vmem:[#allocation31_spill] sm:$0xff]  ;;  %v5654_v24 = vld [vmem:[#allocation34_spill] sm:$0xff] }
 0x24d   : > { %v3639_v38 = vpop.eup %3638  ;;  %v1841_v14 = vadd.f32 %v1777_v10, %v1521_v15  ;;  %v1778_v56 = vmul.f32 %v2999_v5, %v1586_v0  ;;  %v1587_v42 = vsub.f32 1.0, %v5285_v59  ;;  %3644 = vlog2.f32 %v1076_v44  ;;  %v5655_v40 = vld [vmem:[#allocation27_spill] sm:$0xff]  ;;  %v5656_v15 = vld [vmem:[#allocation14_spill] sm:$0xff] }
 0x24e   : > { %v2104_v22 = vadd.f32 %v5232_v41, %v2069_v46  ;;  %v1327_v36 = vmul.f32 0.6931472, %v3639_v38  ;;  %3646 = vrcp.f32 %v1077_v49  ;;  %v2197_v32 = vpack.c.bf16 %v5064_v16, %v5652_v9 }
 0x24f   : > { %v3641_v19 = vpop.eup %3640  ;;  %v2070_v29 = vmul.f32 %v5241_v33, %v1841_v14  ;;  %v1842_v53 = vadd.f32 %v1778_v56, %v1522_v39  ;;  %3648 = vlog2.f32 %v1077_v49  ;;  %v2200_v57 = vpack.c.bf16 %v5163_v50, %v5089_v35 }
 0x250   : > { %v1395_v58 = vsub.f32 0.0, %v1327_v36  ;;  %v1651_v13 = vsub.f32 %v5191_v6, %v1327_v36  ;;  %3650 = vrcp.f32 %v1078_v23  ;;  %v1079_v27 = vadd.f32 1.0, %v3641_v19  ;;  %2463 = vmatmul.mubr.bf16.gmra.mrb[44].mxu1 %v2197_v32 }
 0x251   : > { %v2141_v41 = vadd.f32 %v2140_v54, %v2070_v29  ;;  %v2071_v2 = vmul.f32 %v5257_v3, %v1842_v53  ;;  %3652 = vlog2.f32 %v1078_v23  ;;  %2470 = vmatprep.mubr.bf16.mxu1 %v2200_v57  ;;  %v2199_v16 = vpack.c.bf16 %v5134_v47, %v5082_v48 }
 0x252   : > { %v2936_v33 = vadd.f32 3.912023, %v1395_v58  ;;  %v3000_v0 = vadd.f32 0.020202707, %v1651_v13  ;;  %3654 = vrcp.f32 %v1079_v27  ;;  %v2202_v35 = vpack.c.bf16 %v5230_v17, %v5184_v21 }
 0x253   : > { %v5302_v50 = vadd.f32 %v2104_v22, %v2071_v2  ;;  %3656 = vlog2.f32 %v1079_v27  ;;  %v2201_v6 = vpack.c.bf16 %v5195_v18, %v5179_v31  ;;  %v2204_v34 = vpack.c.bf16 %v5285_v59, %v5264_v45 }
 0x254   : > { %v1523_v48 = vmul.f32 %v5285_v59, %v2936_v33  ;;  %v1779_v47 = vmul.f32 %v3000_v0, %v1587_v42  ;;  %v2203_v21 = vpack.c.bf16 %v5272_v52, %v5253_v4  ;;  %v3080_v17 = vadd.f32 %v5116_v55, %v5110_v25 }
 0x255   : > { %v3083_v54 = vadd.f32 %v5129_v12, %v5123_v60  ;;  %v3086_v44 = vadd.f32 %v5654_v24, %v5653_v11  ;;  %v3089_v10 = vadd.f32 %v5656_v15, %v5655_v40  ;;  %v3092_v5 = vadd.f32 %v3091_v26, %v3090_v30 }
 0x256   : > { %v5324_v49 = vpop.eup %3642  ;;  %v1843_v46 = vadd.f32 %v1779_v47, %v1523_v48  ;;  %v5329_v39 = vsel %vm1946_vm15, 1.0, %v5553_v7  ;;  %v2377_v25 = vadd.f32 %v3080_v17, %v5311_v63  ;;  %v3095_v55 = vadd.f32 %v3094_v20, %v3093_v28 }
 0x257   : > { %v3645_v23 = vpop.eup %3644  ;;  %v1588_v60 = vsub.f32 1.0, %v5324_v49  ;;  %v2380_v12 = vadd.f32 %v3083_v54, %v5311_v63  ;;  %v2385_v38 = vadd.f32 %v3086_v44, %v5311_v63  ;;  %v2388_v30 = vadd.f32 %v3089_v10, %v5311_v63 }
 0x258   : > { %v5336_v26 = vpop.eup %3646  ;;  %v2072_v14 = vmul.f32 %v5257_v3, %v1843_v46  ;;  %v1329_v56 = vmul.f32 0.6931472, %v3645_v23  ;;  %2471 = vmatmul.mubr.bf16.gmra.mrb[48].mxu1 %v2199_v16  ;;  %v2503_v7 = vmul.f32 0.5, %v2377_v25  ;;  %v2393_v8 = vadd.f32 %v3092_v5, %v5311_v63 }
 0x259   : > { %v3649_v42 = vpop.eup %3648  ;;  %v1589_v28 = vsub.f32 1.0, %v5336_v26  ;;  %2478 = vmatprep.mubr.bf16.mxu1 %v2202_v35  ;;  %v2504_v20 = vmul.f32 0.5, %v2380_v12  ;;  %v2505_v22 = vmul.f32 0.5, %v2385_v38  ;;  %v2506_v36 = vmul.f32 0.5, %v2388_v30 }
 0x25a   : > { %v5341_v9 = vpop.eup %3650  ;;  %v2142_v32 = vadd.f32 %v2141_v41, %v2072_v14  ;;  %v1396_v19 = vsub.f32 0.0, %v1329_v56  ;;  %v1652_v29 = vsub.f32 %v5227_v62, %v1329_v56  ;;  %v1331_v53 = vmul.f32 0.6931472, %v3649_v42 }
 0x25b   : > { %v3653_v3 = vpop.eup %3652  ;;  %v1590_v57 = vsub.f32 1.0, %v5341_v9  ;;  %v2205_v58 = vpack.c.bf16 %v5341_v9, %v5324_v49  ;;  %3658 = vtanh.f32 %v2503_v7  ;;  %v2507_v13 = vmul.f32 0.5, %v2393_v8 }
 0x25c   : > { %v5347_v27 = vpop.eup %3654  ;;  %v2937_v2 = vadd.f32 3.912023, %v1396_v19  ;;  %v3001_v16 = vadd.f32 0.020202707, %v1652_v29  ;;  %v1397_v33 = vsub.f32 0.0, %v1331_v53  ;;  %v1653_v0 = vsub.f32 %v5234_v51, %v1331_v53 }
 0x25d   : > { %v3657_v41 = vpop.eup %3656  ;;  %v1333_v35 = vmul.f32 0.6931472, %v3653_v3  ;;  %v1591_v62 = vsub.f32 1.0, %v5347_v27  ;;  %v2206_v48 = vpack.c.bf16 %v5347_v27, %v5336_v26  ;;  %3660 = vtanh.f32 %v2504_v20 }
 0x25e   : > { %v1524_v47 = vmul.f32 %v5324_v49, %v2937_v2  ;;  %v1780_v17 = vmul.f32 %v3001_v16, %v1588_v60  ;;  %v2938_v54 = vadd.f32 3.912023, %v1397_v33  ;;  %v3002_v11 = vadd.f32 0.020202707, %v1653_v0 }
 0x25f   : > { %v1398_v24 = vsub.f32 0.0, %v1333_v35  ;;  %v1654_v44 = vsub.f32 %v5244_v43, %v1333_v35  ;;  %v1335_v40 = vmul.f32 0.6931472, %v3657_v41  ;;  %3662 = vtanh.f32 %v2505_v22  ;;  %v3096_v5 = vpop.f32.mrb[12].mxu1 }
 0x260   : > { %v1844_v51 = vadd.f32 %v1780_v17, %v1524_v47  ;;  %v1525_v15 = vmul.f32 %v5336_v26, %v2938_v54  ;;  %v1781_v10 = vmul.f32 %v3002_v11, %v1589_v28  ;;  %2479 = vmatmul.mubr.bf16.gmra.mrb[52].mxu1 %v2201_v6  ;;  %3664 = vtanh.f32 %v2506_v36  ;;  %v3097_v43 = vpop.f32.mrb[13].mxu1 }
 0x261   : > { %v2939_v46 = vadd.f32 3.912023, %v1398_v24  ;;  %v3003_v25 = vadd.f32 0.020202707, %v1654_v44  ;;  %v1399_v23 = vsub.f32 0.0, %v1335_v40  ;;  %v1655_v60 = vsub.f32 %v5251_v1, %v1335_v40  ;;  %2486 = vmatprep.mubr.bf16.mxu1 %v2204_v34  ;;  %v3099_v18 = vpop.f32.mrb[14].mxu1 }
 0x262   : > { %v2073_v12 = vmul.f32 %v5261_v37, %v1844_v51  ;;  %v1845_v38 = vadd.f32 %v1781_v10, %v1525_v15  ;;  %3666 = vtanh.f32 %v2507_v13  ;;  %v2396_v31 = vadd.f32 %v3095_v55, %v5311_v63  ;;  %v3100_v56 = vpop.f32.mrb[15].mxu1 }
 0x263   : > { %v1526_v6 = vmul.f32 %v5341_v9, %v2939_v46  ;;  %v1782_v30 = vmul.f32 %v3003_v25, %v1590_v57  ;;  %v2940_v26 = vadd.f32 3.912023, %v1399_v23  ;;  %v3004_v14 = vadd.f32 0.020202707, %v1655_v60 }
 0x264   : > { %v2106_v1 = vadd.f32 %v5302_v50, %v2073_v12  ;;  %v2074_v7 = vmul.f32 %v5261_v37, %v1845_v38  ;;  %v2508_v45 = vmul.f32 0.5, %v2396_v31  ;;  %v3098_v59 = vadd.f32 %v3097_v43, %v3096_v5 }
 0x265   : > { %v3659_v34 = vpop.eup %3658  ;;  %v1846_v8 = vadd.f32 %v1782_v30, %v1526_v6  ;;  %v1527_v42 = vmul.f32 %v5347_v27, %v2940_v26  ;;  %v1783_v55 = vmul.f32 %v3004_v14, %v1591_v62  ;;  %v3101_v28 = vadd.f32 %v3100_v56, %v3099_v18 }
 0x266   : > { %v2143_v20 = vadd.f32 %v2142_v32, %v2074_v7  ;;  %v2567_v22 = vmul.f32 0.5, %v3659_v34  ;;  %3668 = vtanh.f32 %v2508_v45  ;;  %v2401_v36 = vadd.f32 %v3098_v59, %v5311_v63 }
 0x267   : > { %v3661_v19 = vpop.eup %3660  ;;  %v2075_v50 = vmul.f32 %v5329_v39, %v1846_v8  ;;  %v1847_v29 = vadd.f32 %v1783_v55, %v1527_v42  ;;  %v2404_v37 = vadd.f32 %v3101_v28, %v5311_v63  ;;  %v3788_v11 = vmov 1966171168  }
 0x268   : > { %2487 = vmatmul.mubr.bf16.gmra.mrb[56].mxu1 %v2203_v21  ;;  %v2599_v53 = vadd.f32 0.5, %v2567_v22  ;;  %v2568_v3 = vmul.f32 0.5, %v3661_v19  ;;  %v2509_v57 = vmul.f32 0.5, %v2401_v36  ;;  %v2155_v24 = vunpack.c.l.s4 %v3788_v11 }
 0x269   : > { %v3663_v13 = vpop.eup %3662  ;;  %v2107_v27 = vadd.f32 %v2106_v1, %v2075_v50  ;;  %v2076_v32 = vmul.f32 %v5329_v39, %v1847_v29  ;;  %2494 = vmatprep.mubr.bf16.mxu1 %v2206_v48  ;;  %v2510_v2 = vmul.f32 0.5, %v2404_v37  ;;  %v5657_v14 = vlaneseq }
 0x26a   : > { %v3665_v16 = vpop.eup %3664  ;;  %2631 = vst [vmem:[%s5379_s17] sm:$0xff] %v2599_v53  ;;  %v2600_v33 = vadd.f32 0.5, %v2568_v3  ;;  %v2569_v0 = vmul.f32 0.5, %v3663_v13  ;;  %3670 = vtanh.f32 %v2509_v57  ;;  %v2156_v25 = vunpack.c.0.s8 %v2155_v24 }
 0x26b   : > { %v2108_v4 = vrot.slane %v2107_v27, 4  ;;  %v2144_v52 = vadd.f32 %v2143_v20, %v2076_v32  ;;  %v2570_v21 = vmul.f32 0.5, %v3665_v16  ;;  %3672 = vtanh.f32 %v2510_v2 }
 0x26c   : > { %v3667_v41 = vpop.eup %3666  ;;  %2632 = vst [vmem:[%s5379_s17 + $0x8] sm:$0xff] %v2600_v33  ;;  %v2601_v39 = vadd.f32 0.5, %v2569_v0  ;;  %v2159_v9 = vsub.s32 %v2156_v25, %v5597_v61  ;;  %vm2171_vm0 = vcmp.lt.s32.totalorder %v5657_v14, 256 }
 0x26d   : > { %v2109_v35 = vadd.f32 %v2108_v4, %v2107_v27  ;;  %v2145_v62 = vrot.slane %v2144_v52, 4  ;;  %v2602_v48 = vadd.f32 0.5, %v2570_v21  ;;  %v2571_v47 = vmul.f32 0.5, %v3667_v41 }
 0x26e   : > { %2633 = vst [vmem:[%s5379_s17 + $0x10] sm:$0xff] %v2601_v39 }
 0x26f   : > { %v2110_v17 = vrot.slane %v2109_v35, 2  ;;  %v2146_v54 = vadd.f32 %v2145_v62, %v2144_v52  ;;  %2634 = vst [vmem:[%s5379_s17 + $0x18] sm:$0xff] %v2602_v48  ;;  %v2603_v44 = vadd.f32 0.5, %v2571_v47 }
 0x270   : > { %v3669_v40 = vpop.eup %3668  ;;  %2495 = vmatmul.mubr.bf16.gmra.mrb[60].mxu1 %v2205_v58 }
 0x271   : > { %v2111_v51 = vadd.f32 %v2110_v17, %v2109_v35  ;;  %v2147_v15 = vrot.slane %v2146_v54, 2  ;;  %2635 = vst [vmem:[%s5379_s17 + $0x20] sm:$0xff] %v2603_v44  ;;  %v2572_v10 = vmul.f32 0.5, %v3669_v40 }
 0x273   : > { %v2112_v5 = vrot.slane %v2111_v51, 1  ;;  %v2148_v46 = vadd.f32 %v2147_v15, %v2146_v54  ;;  %v2604_v23 = vadd.f32 0.5, %v2572_v10 }
 0x274   : > { %v3671_v60 = vpop.eup %3670 }
 0x275   : > { %v3673_v43 = vpop.eup %3672  ;;  %v2113_v12 = vadd.f32 %v2112_v5, %v2111_v51  ;;  %v2149_v38 = vrot.slane %v2148_v46, 1  ;;  %2636 = vst [vmem:[%s5379_s17 + $0x28] sm:$0xff] %v2604_v23  ;;  %v2573_v31 = vmul.f32 0.5, %v3671_v60 }
 0x276   : > { %v2574_v18 = vmul.f32 0.5, %v3673_v43 }
 0x277   : > { %v2150_v49 = vadd.f32 %v2149_v38, %v2148_v46  ;;  %v2605_v58 = vadd.f32 0.5, %v2573_v31 }
 0x278   : > { %v2606_v6 = vadd.f32 0.5, %v2574_v18 }
 0x279   : > { %v2153_v30 = vcombine.low %v2113_v12, %v2150_v49  ;;  %2637 = vst [vmem:[%s5379_s17 + $0x30] sm:$0xff] %v2605_v58 }
 0x27a   : > { %2638 = vst [vmem:[%s5379_s17 + $0x38] sm:$0xff] %v2606_v6 }
 0x27b   : > { %v2160_v26 = vrot.slane %v2153_v30, %v2159_v9 }
 0x27d   : > { %v2167_v56 = vrot.slane %v2160_v26, %v2159_v9 }
 0x27f   : > { %2173 = vst.msk [vmem:[%s5001_s12] ss:$8 sm:$0x3] %vm2171_vm0, %v2167_v56  ;;  %v3102_v1 = vpop.f32.mrb[16].mxu1 }
 0x280   : > { %v3103_v7 = vpop.f32.mrb[17].mxu1 }
 0x281   : > { %v3104_v45 = vadd.f32 %v3103_v7, %v3102_v1  ;;  %v3105_v59 = vpop.f32.mrb[18].mxu1 }
 0x282   : > { %v3106_v34 = vpop.f32.mrb[19].mxu1 }
 0x283   : > { %v2409_v8 = vadd.f32 %v3104_v45, %v5311_v63  ;;  %v3107_v42 = vadd.f32 %v3106_v34, %v3105_v59 }
 0x285   : > { %v2511_v61 = vmul.f32 0.5, %v2409_v8  ;;  %v2412_v55 = vadd.f32 %v3107_v42, %v5311_v63 }
 0x287   : > { %3674 = vtanh.f32 %v2511_v61  ;;  %v2512_v28 = vmul.f32 0.5, %v2412_v55 }
 0x289   : > { %3676 = vtanh.f32 %v2512_v28 }
 0x291   : > { %v3675_v20 = vpop.eup %3674 }
 0x292   : > { %v2575_v22 = vmul.f32 0.5, %v3675_v20 }
 0x293   : > { %v3677_v36 = vpop.eup %3676  ;;  %v3108_v19 = vpop.f32.mrb[20].mxu1 }
 0x294   : > { %v2607_v50 = vadd.f32 0.5, %v2575_v22  ;;  %v2576_v29 = vmul.f32 0.5, %v3677_v36  ;;  %v3109_v37 = vpop.f32.mrb[21].mxu1 }
 0x295   : > { %v3110_v53 = vadd.f32 %v3109_v37, %v3108_v19  ;;  %v3111_v3 = vpop.f32.mrb[22].mxu1 }
 0x296   : > { %2639 = vst [vmem:[%s5379_s17 + $0x40] sm:$0xff] %v2607_v50  ;;  %v2608_v57 = vadd.f32 0.5, %v2576_v29  ;;  %v3112_v13 = vpop.f32.mrb[23].mxu1 }
 0x297   : > { %v2417_v27 = vadd.f32 %v3110_v53, %v5311_v63  ;;  %v3113_v32 = vadd.f32 %v3112_v13, %v3111_v3 }
 0x298   : > { %2640 = vst [vmem:[%s5379_s17 + $0x48] sm:$0xff] %v2608_v57 }
 0x299   : > { %v2513_v2 = vmul.f32 0.5, %v2417_v27  ;;  %v2420_v16 = vadd.f32 %v3113_v32, %v5311_v63 }
 0x29b   : > { %3678 = vtanh.f32 %v2513_v2  ;;  %v2514_v33 = vmul.f32 0.5, %v2420_v16 }
 0x29d   : > { %3680 = vtanh.f32 %v2514_v33 }
 0x2a5   : > { %v3679_v0 = vpop.eup %3678 }
 0x2a6   : > { %v2577_v4 = vmul.f32 0.5, %v3679_v0 }
 0x2a7   : > { %v3681_v52 = vpop.eup %3680 }
 0x2a8   : > { %v2609_v21 = vadd.f32 0.5, %v2577_v4  ;;  %v2578_v41 = vmul.f32 0.5, %v3681_v52 }
 0x2aa   : > { %2641 = vst [vmem:[%s5379_s17 + $0x50] sm:$0xff] %v2609_v21  ;;  %v2610_v39 = vadd.f32 0.5, %v2578_v41 }
 0x2ab   : > { %v3114_v35 = vpop.f32.mrb[24].mxu1 }
 0x2ac   : > { %2642 = vst [vmem:[%s5379_s17 + $0x58] sm:$0xff] %v2610_v39  ;;  %v3115_v62 = vpop.f32.mrb[25].mxu1 }
 0x2ad   : > { %v3116_v48 = vadd.f32 %v3115_v62, %v3114_v35  ;;  %v3117_v47 = vpop.f32.mrb[26].mxu1 }
 0x2ae   : > { %v3118_v17 = vpop.f32.mrb[27].mxu1 }
 0x2af   : > { %v2425_v54 = vadd.f32 %v3116_v48, %v5311_v63  ;;  %v3119_v11 = vadd.f32 %v3118_v17, %v3117_v47 }
 0x2b1   : > { %v2515_v24 = vmul.f32 0.5, %v2425_v54  ;;  %v2428_v44 = vadd.f32 %v3119_v11, %v5311_v63 }
 0x2b3   : > { %3682 = vtanh.f32 %v2515_v24  ;;  %v2516_v40 = vmul.f32 0.5, %v2428_v44 }
 0x2b5   : > { %3684 = vtanh.f32 %v2516_v40 }
 0x2bd   : > { %v3683_v51 = vpop.eup %3682 }
 0x2be   : > { %v2579_v15 = vmul.f32 0.5, %v3683_v51 }
 0x2bf   : > { %v3685_v10 = vpop.eup %3684 }
 0x2c0   : > { %v2611_v5 = vadd.f32 0.5, %v2579_v15  ;;  %v2580_v46 = vmul.f32 0.5, %v3685_v10 }
 0x2c2   : > { %v3120_v25 = vpop.f32.mrb[28].mxu1  ;;  %2643 = vst [vmem:[%s5379_s17 + $0x60] sm:$0xff] %v2611_v5  ;;  %v2612_v23 = vadd.f32 0.5, %v2580_v46 }
 0x2c3   : > { %v3121_v60 = vpop.f32.mrb[29].mxu1 }
 0x2c4   : > { %v3122_v43 = vadd.f32 %v3121_v60, %v3120_v25  ;;  %v3123_v12 = vpop.f32.mrb[30].mxu1  ;;  %2644 = vst [vmem:[%s5379_s17 + $0x68] sm:$0xff] %v2612_v23 }
 0x2c5   : > { %v3124_v38 = vpop.f32.mrb[31].mxu1 }
 0x2c6   : > { %v2433_v31 = vadd.f32 %v3122_v43, %v5311_v63  ;;  %v3125_v18 = vadd.f32 %v3124_v38, %v3123_v12 }
 0x2c8   : > { %v2517_v49 = vmul.f32 0.5, %v2433_v31  ;;  %v2436_v9 = vadd.f32 %v3125_v18, %v5311_v63 }
 0x2ca   : > { %3686 = vtanh.f32 %v2517_v49  ;;  %v2518_v58 = vmul.f32 0.5, %v2436_v9 }
 0x2cc   : > { %3688 = vtanh.f32 %v2518_v58 }
 0x2d4   : > { %v3687_v6 = vpop.eup %3686 }
 0x2d5   : > { %v2581_v30 = vmul.f32 0.5, %v3687_v6 }
 0x2d6   : > { %v3689_v26 = vpop.eup %3688 }
 0x2d7   : > { %v2613_v14 = vadd.f32 0.5, %v2581_v30  ;;  %v2582_v56 = vmul.f32 0.5, %v3689_v26 }
 0x2d9   : > { %2645 = vst [vmem:[%s5379_s17 + $0x70] sm:$0xff] %v2613_v14  ;;  %v2614_v1 = vadd.f32 0.5, %v2582_v56 }
 0x2da   : > { %v3126_v7 = vpop.f32.mrb[32].mxu1 }
 0x2db   : > { %2646 = vst [vmem:[%s5379_s17 + $0x78] sm:$0xff] %v2614_v1  ;;  %v3127_v45 = vpop.f32.mrb[33].mxu1 }
 0x2dc   : > { %v3128_v59 = vadd.f32 %v3127_v45, %v3126_v7  ;;  %v3129_v34 = vpop.f32.mrb[34].mxu1 }
 0x2dd   : > { %v3130_v8 = vpop.f32.mrb[35].mxu1 }
 0x2de   : > { %v2441_v42 = vadd.f32 %v3128_v59, %v5311_v63  ;;  %v3131_v61 = vadd.f32 %v3130_v8, %v3129_v34 }
 0x2e0   : > { %v2519_v55 = vmul.f32 0.5, %v2441_v42  ;;  %v2444_v28 = vadd.f32 %v3131_v61, %v5311_v63 }
 0x2e2   : > { %3690 = vtanh.f32 %v2519_v55  ;;  %v2520_v20 = vmul.f32 0.5, %v2444_v28 }
 0x2e4   : > { %3692 = vtanh.f32 %v2520_v20 }
 0x2ec   : > { %v3691_v22 = vpop.eup %3690 }
 0x2ed   : > { %v2583_v36 = vmul.f32 0.5, %v3691_v22 }
 0x2ee   : > { %v3693_v19 = vpop.eup %3692 }
 0x2ef   : > { %v2615_v50 = vadd.f32 0.5, %v2583_v36  ;;  %v2584_v29 = vmul.f32 0.5, %v3693_v19 }
 0x2f1   : > { %2647 = vst [vmem:[%s5379_s17 + $0x80] sm:$0xff] %v2615_v50  ;;  %v2616_v37 = vadd.f32 0.5, %v2584_v29 }
 0x2f3   : > { %2648 = vst [vmem:[%s5379_s17 + $0x88] sm:$0xff] %v2616_v37  ;;  %v3132_v53 = vpop.f32.mrb[36].mxu1 }
 0x2f4   : > { %v3133_v3 = vpop.f32.mrb[37].mxu1 }
 0x2f5   : > { %v3134_v57 = vadd.f32 %v3133_v3, %v3132_v53  ;;  %v3135_v13 = vpop.f32.mrb[38].mxu1 }
 0x2f6   : > { %v3136_v27 = vpop.f32.mrb[39].mxu1 }
 0x2f7   : > { %v2449_v32 = vadd.f32 %v3134_v57, %v5311_v63  ;;  %v3137_v2 = vadd.f32 %v3136_v27, %v3135_v13 }
 0x2f9   : > { %v2521_v16 = vmul.f32 0.5, %v2449_v32  ;;  %v2452_v33 = vadd.f32 %v3137_v2, %v5311_v63 }
 0x2fb   : > { %3694 = vtanh.f32 %v2521_v16  ;;  %v2522_v0 = vmul.f32 0.5, %v2452_v33 }
 0x2fd   : > { %3696 = vtanh.f32 %v2522_v0 }
 0x305   : > { %v3695_v4 = vpop.eup %3694 }
 0x306   : > { %v2585_v52 = vmul.f32 0.5, %v3695_v4 }
 0x307   : > { %v3697_v21 = vpop.eup %3696 }
 0x308   : > { %v2617_v41 = vadd.f32 0.5, %v2585_v52  ;;  %v2586_v39 = vmul.f32 0.5, %v3697_v21 }
 0x30a   : > { %2649 = vst [vmem:[%s5379_s17 + $0x90] sm:$0xff] %v2617_v41  ;;  %v2618_v35 = vadd.f32 0.5, %v2586_v39 }
 0x30b   : > { %v3138_v62 = vpop.f32.mrb[40].mxu1 }
 0x30c   : > { %2650 = vst [vmem:[%s5379_s17 + $0x98] sm:$0xff] %v2618_v35  ;;  %v3139_v48 = vpop.f32.mrb[41].mxu1 }
 0x30d   : > { %v3140_v47 = vadd.f32 %v3139_v48, %v3138_v62  ;;  %v3141_v17 = vpop.f32.mrb[42].mxu1 }
 0x30e   : > { %v3142_v54 = vpop.f32.mrb[43].mxu1 }
 0x30f   : > { %v2457_v11 = vadd.f32 %v3140_v47, %v5311_v63  ;;  %v3143_v24 = vadd.f32 %v3142_v54, %v3141_v17 }
 0x311   : > { %v2523_v44 = vmul.f32 0.5, %v2457_v11  ;;  %v2460_v40 = vadd.f32 %v3143_v24, %v5311_v63 }
 0x313   : > { %3698 = vtanh.f32 %v2523_v44  ;;  %v2524_v51 = vmul.f32 0.5, %v2460_v40 }
 0x315   : > { %3700 = vtanh.f32 %v2524_v51 }
 0x31d   : > { %v3699_v15 = vpop.eup %3698 }
 0x31e   : > { %v2587_v10 = vmul.f32 0.5, %v3699_v15 }
 0x31f   : > { %v3701_v5 = vpop.eup %3700 }
 0x320   : > { %v2619_v46 = vadd.f32 0.5, %v2587_v10  ;;  %v2588_v25 = vmul.f32 0.5, %v3701_v5 }
 0x322   : > { %2651 = vst [vmem:[%s5379_s17 + $0xa0] sm:$0xff] %v2619_v46  ;;  %v2620_v23 = vadd.f32 0.5, %v2588_v25 }
 0x323   : > { %v3144_v60 = vpop.f32.mrb[44].mxu1 }
 0x324   : > { %2652 = vst [vmem:[%s5379_s17 + $0xa8] sm:$0xff] %v2620_v23  ;;  %v3145_v43 = vpop.f32.mrb[45].mxu1 }
 0x325   : > { %v3146_v12 = vadd.f32 %v3145_v43, %v3144_v60  ;;  %v3147_v38 = vpop.f32.mrb[46].mxu1 }
 0x326   : > { %v3148_v31 = vpop.f32.mrb[47].mxu1 }
 0x327   : > { %v2465_v18 = vadd.f32 %v3146_v12, %v5311_v63  ;;  %v3149_v49 = vadd.f32 %v3148_v31, %v3147_v38 }
 0x329   : > { %v2525_v9 = vmul.f32 0.5, %v2465_v18  ;;  %v2468_v58 = vadd.f32 %v3149_v49, %v5311_v63 }
 0x32b   : > { %3702 = vtanh.f32 %v2525_v9  ;;  %v2526_v6 = vmul.f32 0.5, %v2468_v58  ;;  %v3150_v30 = vpop.f32.mrb[48].mxu1 }
 0x32c   : > { %v3151_v26 = vpop.f32.mrb[49].mxu1 }
 0x32d   : > { %3704 = vtanh.f32 %v2526_v6  ;;  %v3152_v14 = vadd.f32 %v3151_v26, %v3150_v30  ;;  %v3153_v56 = vpop.f32.mrb[50].mxu1 }
 0x32e   : > { %v3154_v1 = vpop.f32.mrb[51].mxu1 }
 0x32f   : > { %v2473_v7 = vadd.f32 %v3152_v14, %v5311_v63  ;;  %v3155_v45 = vadd.f32 %v3154_v1, %v3153_v56 }
 0x331   : > { %v2527_v59 = vmul.f32 0.5, %v2473_v7  ;;  %v2476_v34 = vadd.f32 %v3155_v45, %v5311_v63 }
 0x333   : > { %3706 = vtanh.f32 %v2527_v59  ;;  %v2528_v8 = vmul.f32 0.5, %v2476_v34  ;;  %v3156_v42 = vpop.f32.mrb[52].mxu1 }
 0x334   : > { %v3157_v61 = vpop.f32.mrb[53].mxu1 }
 0x335   : > { %v3703_v55 = vpop.eup %3702  ;;  %3708 = vtanh.f32 %v2528_v8  ;;  %v3158_v28 = vadd.f32 %v3157_v61, %v3156_v42  ;;  %v3159_v20 = vpop.f32.mrb[54].mxu1 }
 0x336   : > { %v2589_v22 = vmul.f32 0.5, %v3703_v55  ;;  %v3160_v36 = vpop.f32.mrb[55].mxu1 }
 0x337   : > { %v3705_v19 = vpop.eup %3704  ;;  %v2481_v50 = vadd.f32 %v3158_v28, %v5311_v63  ;;  %v3161_v29 = vadd.f32 %v3160_v36, %v3159_v20 }
 0x338   : > { %v2621_v37 = vadd.f32 0.5, %v2589_v22  ;;  %v2590_v53 = vmul.f32 0.5, %v3705_v19 }
 0x339   : > { %v2529_v3 = vmul.f32 0.5, %v2481_v50  ;;  %v2484_v57 = vadd.f32 %v3161_v29, %v5311_v63 }
 0x33a   : > { %2653 = vst [vmem:[%s5379_s17 + $0xb0] sm:$0xff] %v2621_v37  ;;  %v2622_v13 = vadd.f32 0.5, %v2590_v53 }
 0x33b   : > { %3710 = vtanh.f32 %v2529_v3  ;;  %v2530_v27 = vmul.f32 0.5, %v2484_v57  ;;  %v3162_v32 = vpop.f32.mrb[56].mxu1 }
 0x33c   : > { %2654 = vst [vmem:[%s5379_s17 + $0xb8] sm:$0xff] %v2622_v13  ;;  %v3163_v2 = vpop.f32.mrb[57].mxu1 }
 0x33d   : > { %v3707_v16 = vpop.eup %3706  ;;  %3712 = vtanh.f32 %v2530_v27  ;;  %v3164_v33 = vadd.f32 %v3163_v2, %v3162_v32  ;;  %v3165_v0 = vpop.f32.mrb[58].mxu1 }
 0x33e   : > { %v2591_v4 = vmul.f32 0.5, %v3707_v16  ;;  %v3166_v52 = vpop.f32.mrb[59].mxu1 }
 0x33f   : > { %v3709_v21 = vpop.eup %3708  ;;  %v2489_v41 = vadd.f32 %v3164_v33, %v5311_v63  ;;  %v3167_v39 = vadd.f32 %v3166_v52, %v3165_v0 }
 0x340   : > { %v2623_v35 = vadd.f32 0.5, %v2591_v4  ;;  %v2592_v62 = vmul.f32 0.5, %v3709_v21 }
 0x341   : > { %v2531_v48 = vmul.f32 0.5, %v2489_v41  ;;  %v2492_v47 = vadd.f32 %v3167_v39, %v5311_v63 }
 0x342   : > { %2655 = vst [vmem:[%s5379_s17 + $0xc0] sm:$0xff] %v2623_v35  ;;  %v2624_v17 = vadd.f32 0.5, %v2592_v62 }
 0x343   : > { %3714 = vtanh.f32 %v2531_v48  ;;  %v2532_v54 = vmul.f32 0.5, %v2492_v47  ;;  %v3168_v11 = vpop.f32.mrb[60].mxu1 }
 0x344   : > { %2656 = vst [vmem:[%s5379_s17 + $0xc8] sm:$0xff] %v2624_v17  ;;  %v3169_v24 = vpop.f32.mrb[61].mxu1 }
 0x345   : > { %v3711_v44 = vpop.eup %3710  ;;  %3716 = vtanh.f32 %v2532_v54  ;;  %v3170_v40 = vadd.f32 %v3169_v24, %v3168_v11  ;;  %v3171_v51 = vpop.f32.mrb[62].mxu1 }
 0x346   : > { %v2593_v15 = vmul.f32 0.5, %v3711_v44  ;;  %v3172_v10 = vpop.f32.mrb[63].mxu1 }
 0x347   : > { %v3713_v5 = vpop.eup %3712  ;;  %v2497_v46 = vadd.f32 %v3170_v40, %v5311_v63  ;;  %v3173_v25 = vadd.f32 %v3172_v10, %v3171_v51 }
 0x348   : > { %v2625_v23 = vadd.f32 0.5, %v2593_v15  ;;  %v2594_v60 = vmul.f32 0.5, %v3713_v5 }
 0x349   : > { %v2533_v43 = vmul.f32 0.5, %v2497_v46  ;;  %v2500_v12 = vadd.f32 %v3173_v25, %v5311_v63 }
 0x34a   : > { %2657 = vst [vmem:[%s5379_s17 + $0xd0] sm:$0xff] %v2625_v23  ;;  %v2626_v38 = vadd.f32 0.5, %v2594_v60 }
 0x34b   : > { %3718 = vtanh.f32 %v2533_v43  ;;  %v2534_v31 = vmul.f32 0.5, %v2500_v12 }
 0x34c   : > { %2658 = vst [vmem:[%s5379_s17 + $0xd8] sm:$0xff] %v2626_v38 }
 0x34d   : > { %v3715_v18 = vpop.eup %3714  ;;  %3720 = vtanh.f32 %v2534_v31 }
 0x34e   : > { %v2595_v49 = vmul.f32 0.5, %v3715_v18 }
 0x34f   : > { %v3717_v9 = vpop.eup %3716 }
 0x350   : > { %v2627_v58 = vadd.f32 0.5, %v2595_v49  ;;  %v2596_v6 = vmul.f32 0.5, %v3717_v9 }
 0x352   : > { %2659 = vst [vmem:[%s5379_s17 + $0xe0] sm:$0xff] %v2627_v58  ;;  %v2628_v30 = vadd.f32 0.5, %v2596_v6 }
 0x354   : > { %2660 = vst [vmem:[%s5379_s17 + $0xe8] sm:$0xff] %v2628_v30 }
 0x355   : > { %v3719_v63 = vpop.eup %3718 }
 0x356   : > { %v2597_v26 = vmul.f32 0.5, %v3719_v63 }
 0x357   : > { %v3721_v14 = vpop.eup %3720 }
 0x358   : > { %v2629_v56 = vadd.f32 0.5, %v2597_v26  ;;  %v2598_v1 = vmul.f32 0.5, %v3721_v14 }
 0x35a   : > { %2661 = vst [vmem:[%s5379_s17 + $0xf0] sm:$0xff] %v2629_v56  ;;  %v2630_v7 = vadd.f32 0.5, %v2598_v1 }
 0x35c   : > { %2662 = vst [vmem:[%s5379_s17 + $0xf8] sm:$0xff] %v2630_v7 }
 0x35d   : > { %3735 = shalt.err (!%p3732_p4)
}
 0x35e   : > { %s3736_s12 = scalar_lea.hbm %s5446_s26, 4096  ;;  %s3740_s11 = scalar_lea.hbm %s5500_s5, 8192 }
 0x35f   : > { %p3737_p7 = scmp.ne.s32.totalorder %s5446_s26, %s3736_s12  ;;  %p3741_p10 = scmp.lt.u32.totalorder %s5446_s26, %s5500_s5 }
 0x360   : > { %p3742_p11 = scmp.lt.u32.totalorder %s3740_s11, %s3736_s12  ;;  %p3744_p13 = scmp.lt.u32.totalorder %s3736_s12, %s5446_s26 }
 0x361   : > { %p3738_p8 = pnand %p3737_p7, %p3865_p5 }
 0x362   : > { %p3743_p12 = por %p3742_p11, %p3741_p10 }
 0x363   : > { %p3739_p9 = pneg %p3738_p8 }
 0x364   : > { %p3745_p0 = por %p3744_p13, %p3743_p12 }
 0x366   : > { %p3746_p1 = pnand %p3745_p0, %p3739_p9 }
 0x368   : > { %3749 = shalt.err (!%p3746_p1)
}
 0x369   : > { %s3790_s18 = smov 128   ;;  %s3791_s20 = smov 8  }
 0x36a   : > { %3174 = dma.vmem_to_hbm [thread:$0]  (%p3865_p5), %s5448_s19, 4096, %s5446_s26, %s5454_s28, %s3790_s18, %s3790_s18, %s3791_s20  }
 0x36b PF: > { %p3180_p2 = scmp.ge.s32.totalorder %s3784_s24, 2  ;;  %s2700_s13 = sand.u32 1, %s3772_s21  }
 0x36c   : > { %s2701_s25 = scalar_lea.sflag [#allocation3], %s2700_s13 }
 0x36d   : > { %p3177_p3 = pnand %p3180_p2, %p3869_p6 }
 0x36f   : > { %3767 = dma.done.wait (!%p3177_p3), %s2701_s25, 4096  }
 0x370   : > { %3769 = vsyncadd (!%p3177_p3), %s2701_s25, 4294963200  ;;  %p17_p4 = scmp.ge.s32.totalorder %s3852_s27, 4   ;;  %s5658_s21 = smov %s3776_s22 }
 0x371   : > { %s5659_s22 = smov %s3780_s23  ;;  %s5660_s23 = smov %s3863_s30 }
 0x372   : > { %s5661_s24 = smov %s3852_s27  ;;  %19 = sbr.rel (!%p17_p4) target bundleno = 3 (0x3), region = 87 }
 0x379   :  { %2714 = vsyncpa [#allocation3], 1 }
 0x37a   :  { %2716 = vsyncpa [#allocation3 + $0x1], 1 }

</bundles_post_ra>
